<compile_context>
chip_gen: v7x
topology: tpu7x:2x2x1
jax: 0.10.0
libtpu: 0.0.40
codegen_flags: <defaults>
</compile_context>

<pallas_src>
import functools
import math

import jax
import jax.numpy as jnp
from jax.experimental import pallas as pl
from jax.experimental.pallas import tpu as pltpu


# ----------------------------------------------------------------------------
# helpers
# ----------------------------------------------------------------------------
def _round_up(x, m):
    return ((x + m - 1) // m) * m


def _pad2(a, rows, cols):
    pr, pc = rows - a.shape[0], cols - a.shape[1]
    if pr or pc:
        a = jnp.pad(a, ((0, pr), (0, pc)))
    return a


_TM, _TN, _TK = 512, 1024, 1024          # MXU-friendly default GEMM tiles
_LINEAR_VMEM = 48 * 1024 * 1024          # raised scoped-VMEM budget for GEMMs
_ATTN_VMEM = 32 * 1024 * 1024            # explicit budget (safe on v7x's 64 MiB)
_ATTN_KV_TILE = 512                      # flash kv tile


# ----------------------------------------------------------------------------
# Pallas kernels
# ----------------------------------------------------------------------------
def _linear_kernel(*refs, activation, has_residual, has_ln, k_true, ln_eps):
    """Tiled matmul, grid (M//tm, N//tn, K//tk); f32 accumulator scratch.
    Optional fused input-LayerNorm (requires a single K tile), bias, activation
    and residual-add fused into the k==last epilogue."""
    it = iter(refs)
    x_ref = next(it)
    w_ref = next(it)
    b_ref = next(it)
    g_ref = next(it) if has_ln else None
    bb_ref = next(it) if has_ln else None
    r_ref = next(it) if has_residual else None
    o_ref = next(it)
    acc_ref = next(it)

    k = pl.program_id(2)

    @pl.when(k == 0)
    def _():
        acc_ref[...] = jnp.zeros_like(acc_ref)

    x = x_ref[...]
    if has_ln:
        # LayerNorm over the (single, full-K) tile; padded columns carry
        # gamma=beta=0 so they contribute zeros to the matmul.
        xf = x.astype(jnp.float32)
        inv_k = 1.0 / float(k_true)
        mu = jnp.sum(xf, axis=-1, keepdims=True) * inv_k
        var = jnp.sum(xf * xf, axis=-1, keepdims=True) * inv_k - mu * mu
        xf = (xf - mu) * jax.lax.rsqrt(var + ln_eps)
        xf = xf * g_ref[...].astype(jnp.float32) + bb_ref[...].astype(jnp.float32)
        x = xf.astype(x_ref.dtype)

    acc_ref[...] += jnp.dot(x, w_ref[...], preferred_element_type=jnp.float32)

    @pl.when(k == pl.num_programs(2) - 1)
    def _():
        y = acc_ref[...] + b_ref[...].astype(jnp.float32)
        if activation == "gelu_new":          # GPT2 MLP activation (tanh approx)
            y = 0.5 * y * (1.0 + jnp.tanh(
                0.7978845608028654 * (y + 0.044715 * y * y * y)))
        elif activation == "quick_gelu":      # CLIP MLP activation
            y = y * jax.nn.sigmoid(1.702 * y)
        if has_residual:
            y = y + r_ref[...].astype(jnp.float32)
        o_ref[...] = y.astype(o_ref.dtype)


def _layernorm_kernel(x_ref, g_ref, b_ref, o_ref, *, eps):
    x = x_ref[...].astype(jnp.float32)
    mu = jnp.mean(x, axis=-1, keepdims=True)
    xc = x - mu
    var = jnp.mean(xc * xc, axis=-1, keepdims=True)
    y = xc * jax.lax.rsqrt(var + eps)
    o_ref[...] = (y * g_ref[...].astype(jnp.float32)
                  + b_ref[...].astype(jnp.float32)).astype(o_ref.dtype)


def _flash_mha_kernel(*refs, scale, causal, has_pad, kv_block):
    """Flash attention, one (batch, head) per (b, h) grid point, kv tiled along
    the last ("arbitrary") grid axis with online softmax in VMEM scratch."""
    if has_pad:
        q_ref, k_ref, v_ref, pad_ref, o_ref, m_ref, l_ref, acc_ref = refs
    else:
        q_ref, k_ref, v_ref, o_ref, m_ref, l_ref, acc_ref = refs
        pad_ref = None
    kv = pl.program_id(2)

    @pl.when(kv == 0)
    def _():
        m_ref[...] = jnp.full_like(m_ref, -jnp.inf)
        l_ref[...] = jnp.zeros_like(l_ref)
        acc_ref[...] = jnp.zeros_like(acc_ref)

    q = q_ref[0, 0]                                    # (S, dh) bf16
    k = k_ref[0, 0]                                    # (tkv, dh) bf16
    v = v_ref[0, 0]                                    # (tkv, dh) bf16

    # NT matmul (contraction on the last dim of both) -> no K transpose needed.
    s = jax.lax.dot_general(q, k, (((1,), (1,)), ((), ())),
                            preferred_element_type=jnp.float32) * scale
    if causal:
        S_len, T_blk = s.shape
        row = jax.lax.broadcasted_iota(jnp.int32, (S_len, T_blk), 0)
        col = jax.lax.broadcasted_iota(jnp.int32, (S_len, T_blk), 1) + kv * kv_block
        s = jnp.where(col <= row, s, -1.0e9)
    if has_pad:
        s = s + pad_ref[0]                             # (1, tkv) broadcast

    m_prev = m_ref[...]
    m_new = jnp.maximum(m_prev, jnp.max(s, axis=-1, keepdims=True))
    alpha = jnp.exp(m_prev - m_new)
    p = jnp.exp(s - m_new)
    l_ref[...] = alpha * l_ref[...] + jnp.sum(p, axis=-1, keepdims=True)
    acc_ref[...] = alpha * acc_ref[...] + jnp.dot(
        p.astype(v.dtype), v, preferred_element_type=jnp.float32)
    m_ref[...] = m_new

    @pl.when(kv == pl.num_programs(2) - 1)
    def _():
        o_ref[0, 0] = (acc_ref[...] *
                       pl.reciprocal(l_ref[...], approx=True)).astype(o_ref.dtype)


# ----------------------------------------------------------------------------
# Pallas wrappers
# ----------------------------------------------------------------------------
def pallas_linear(x, w, b, activation=None, residual=None, ln=None,
                  ln_eps=1e-5, out_dtype=None):
    """x: (M, K), w: (K, N), b: (N,), optional residual (M, N), optional input
    LayerNorm params {'g','b'} fused before the matmul (forces a single K tile).
    bf16 operands, f32 accumulate, tiled + pipelined over a 3-D grid."""
    M, K = x.shape
    N = w.shape[1]
    out_dtype = out_dtype or jnp.bfloat16

    tm = min(_TM, _round_up(M, 16))          # bf16 native sublane packing
    tn = min(_TN, _round_up(N, 128))
    if ln is not None:
        tk = _round_up(K, 128)               # full-K tile so LN stats are exact
    else:
        tk = min(_TK, _round_up(K, 128))
    Mp, Np, Kp = _round_up(M, tm), _round_up(N, tn), _round_up(K, tk)

    x_p = _pad2(x.astype(jnp.bfloat16), Mp, Kp)
    w_p = _pad2(w.astype(jnp.bfloat16), Kp, Np)
    b_p = _pad2(b.reshape(1, N).astype(jnp.float32), 1, Np)

    args = [x_p, w_p, b_p]
    in_specs = [
        pl.BlockSpec((tm, tk), lambda i, j, k: (i, k)),
        pl.BlockSpec((tk, tn), lambda i, j, k: (k, j)),
        pl.BlockSpec((1, tn), lambda i, j, k: (0, j)),
    ]
    if ln is not None:
        args.append(_pad2(ln["g"].reshape(1, K).astype(jnp.float32), 1, Kp))
        args.append(_pad2(ln["b"].reshape(1, K).astype(jnp.float32), 1, Kp))
        in_specs.append(pl.BlockSpec((1, tk), lambda i, j, k: (0, k)))
        in_specs.append(pl.BlockSpec((1, tk), lambda i, j, k: (0, k)))
    if residual is not None:
        args.append(_pad2(residual.astype(jnp.bfloat16), Mp, Np))
        in_specs.append(pl.BlockSpec((tm, tn), lambda i, j, k: (i, j)))

    kernel = functools.partial(_linear_kernel, activation=activation,
                               has_residual=residual is not None,
                               has_ln=ln is not None, k_true=K, ln_eps=ln_eps)
    cost = pl.CostEstimate(
        flops=2 * Mp * Np * Kp,
        transcendentals=(Mp * Np) if activation is not None else 0,
        bytes_accessed=2 * (Mp * Kp + Kp * Np + 2 * Mp * Np))
    out = pl.pallas_call(
        kernel,
        out_shape=jax.ShapeDtypeStruct((Mp, Np), out_dtype),
        grid=(Mp // tm, Np // tn, Kp // tk),
        in_specs=in_specs,
        out_specs=pl.BlockSpec((tm, tn), lambda i, j, k: (i, j)),
        scratch_shapes=[pltpu.VMEM((tm, tn), jnp.float32)],
        compiler_params=pltpu.CompilerParams(
            dimension_semantics=("parallel", "parallel", "arbitrary"),
            vmem_limit_bytes=_LINEAR_VMEM),
        cost_estimate=cost,
    )(*args)
    if (Mp, Np) != (M, N):
        out = out[:M, :N]
    return out


def pallas_layernorm(x, ln, eps=1e-5):
    """Row-tiled LayerNorm over the last dim (only used for CLIP pre-layernorm;
    all other LayerNorms are fused into their consumer matmuls)."""
    shape = x.shape
    D = shape[-1]
    x2 = x.reshape(-1, D)
    M = x2.shape[0]
    tm = min(256, _round_up(M, 16))
    Mp = _round_up(M, tm)
    if Mp != M:
        x2 = jnp.pad(x2, ((0, Mp - M), (0, 0)))
    g = ln["g"].reshape(1, D).astype(jnp.float32)
    b = ln["b"].reshape(1, D).astype(jnp.float32)
    out = pl.pallas_call(
        functools.partial(_layernorm_kernel, eps=eps),
        out_shape=jax.ShapeDtypeStruct((Mp, D), x.dtype),
        grid=(Mp // tm,),
        in_specs=[
            pl.BlockSpec((tm, D), lambda i: (i, 0)),
            pl.BlockSpec((1, D), lambda i: (0, 0)),
            pl.BlockSpec((1, D), lambda i: (0, 0)),
        ],
        out_specs=pl.BlockSpec((tm, D), lambda i: (i, 0)),
        compiler_params=pltpu.CompilerParams(dimension_semantics=("parallel",)),
    )(x2, g, b)
    if Mp != M:
        out = out[:M]
    return out.reshape(shape)


def pallas_flash_mha(q, k, v, pad_bias, scale, causal, kv_tile=_ATTN_KV_TILE):
    """q: (B, H, S, dh), k/v: (B, H, T, dh) bf16; pad_bias: (B, 1, T) f32 or None.
    Flash-style: grid (B, H, T//tkv) with online softmax; kv axis 'arbitrary'."""
    B, H, S, dh = q.shape
    T = k.shape[2]
    tkv = T if T <= kv_tile else kv_tile
    Tp = _round_up(T, tkv)
    if Tp != T:
        k = jnp.pad(k, ((0, 0), (0, 0), (0, Tp - T), (0, 0)))
        v = jnp.pad(v, ((0, 0), (0, 0), (0, Tp - T), (0, 0)))
        if pad_bias is None:
            pad_bias = jnp.zeros((B, 1, T), jnp.float32)
        pad_bias = jnp.pad(pad_bias, ((0, 0), (0, 0), (0, Tp - T)),
                           constant_values=-1.0e9)
    has_pad = pad_bias is not None
    num_kv = Tp // tkv

    kernel = functools.partial(_flash_mha_kernel, scale=scale, causal=causal,
                               has_pad=has_pad, kv_block=tkv)
    in_specs = [
        pl.BlockSpec((1, 1, S, dh), lambda b, h, kv: (b, h, 0, 0)),
        pl.BlockSpec((1, 1, tkv, dh), lambda b, h, kv: (b, h, kv, 0)),
        pl.BlockSpec((1, 1, tkv, dh), lambda b, h, kv: (b, h, kv, 0)),
    ]
    args = [q, k, v]
    if has_pad:
        in_specs.append(pl.BlockSpec((1, 1, tkv), lambda b, h, kv: (b, 0, kv)))
        args.append(pad_bias.astype(jnp.float32))

    cost = pl.CostEstimate(
        flops=4 * B * H * S * Tp * dh,
        transcendentals=B * H * S * Tp,
        bytes_accessed=2 * (2 * B * H * S * dh + 2 * B * H * Tp * dh))
    return pl.pallas_call(
        kernel,
        out_shape=jax.ShapeDtypeStruct((B, H, S, dh), q.dtype),
        grid=(B, H, num_kv),
        in_specs=in_specs,
        out_specs=pl.BlockSpec((1, 1, S, dh), lambda b, h, kv: (b, h, 0, 0)),
        scratch_shapes=[pltpu.VMEM((S, 1), jnp.float32),
                        pltpu.VMEM((S, 1), jnp.float32),
                        pltpu.VMEM((S, dh), jnp.float32)],
        compiler_params=pltpu.CompilerParams(
            dimension_semantics=("parallel", "parallel", "arbitrary"),
            vmem_limit_bytes=_ATTN_VMEM),
        cost_estimate=cost,
    )(*args)


# ----------------------------------------------------------------------------
# Model glue (reshapes / embedding gathers stay in plain JAX)
# ----------------------------------------------------------------------------
def fused_self_attention(x, ln, p, n_heads, pad_bias, causal, residual):
    """LayerNorm fused into the QKV projection; residual fused into out-proj."""
    B, S, D = x.shape
    dh = D // n_heads
    qkv = pallas_linear(x.reshape(B * S, D), p["wqkv"], p["bqkv"], ln=ln)
    qkv = qkv.reshape(B, S, 3, n_heads, dh)
    # TODO(synk): head split/merge transposes remain XLA ops; a fully lane-dense
    # in-kernel head slice needs dynamic lane slicing (dh < 128) which Mosaic
    # lowers poorly, so they are kept outside the kernel.
    q = qkv[:, :, 0].transpose(0, 2, 1, 3)
    k = qkv[:, :, 1].transpose(0, 2, 1, 3)
    v = qkv[:, :, 2].transpose(0, 2, 1, 3)
    o = pallas_flash_mha(q, k, v, pad_bias, 1.0 / math.sqrt(dh), causal)
    o = o.transpose(0, 2, 1, 3).reshape(B * S, D)
    out = pallas_linear(o, p["wo"], p["bo"], residual=residual.reshape(B * S, D))
    return out.reshape(B, S, D)


def fused_cross_attention(x, ln, enc, p, n_heads, residual):
    """Cross-attention; LayerNorm fused into the Q projection, fused K/V proj,
    residual fused into the out-proj epilogue."""
    B, S, D = x.shape
    T = enc.shape[1]
    dh = D // n_heads
    q = pallas_linear(x.reshape(B * S, D), p["wq"], p["bq"], ln=ln)
    q = q.reshape(B, S, n_heads, dh).transpose(0, 2, 1, 3)
    kv = pallas_linear(enc.reshape(B * T, D), p["wkv"], p["bkv"])
    kv = kv.reshape(B, T, 2, n_heads, dh)
    k = kv[:, :, 0].transpose(0, 2, 1, 3)
    v = kv[:, :, 1].transpose(0, 2, 1, 3)
    o = pallas_flash_mha(q, k, v, None, 1.0 / math.sqrt(dh), causal=False)
    o = o.transpose(0, 2, 1, 3).reshape(B * S, D)
    out = pallas_linear(o, p["wo"], p["bo"], residual=residual.reshape(B * S, D))
    return out.reshape(B, S, D)


def image_to_patches(x, patch):
    """NCHW -> (B, num_patches, C*patch*patch), non-overlapping, row-major."""
    B, C, H, W = x.shape
    ph, pw = H // patch, W // patch
    x = x.reshape(B, C, ph, patch, pw, patch)
    x = x.transpose(0, 2, 4, 1, 3, 5)
    return x.reshape(B, ph * pw, C * patch * patch)


def vision_encoder(p, image, n_heads, patch):
    """CLIP-style vision encoder: patch embed + cls + pos + pre-LN + 1 layer."""
    B = image.shape[0]
    D = p["patch_w"].shape[1]
    patches = image_to_patches(image, patch)
    P = patches.shape[1]
    x = pallas_linear(patches.reshape(B * P, -1), p["patch_w"], p["patch_b"])
    x = x.reshape(B, P, D)
    cls = jnp.broadcast_to(p["cls"][None, None, :], (B, 1, D)).astype(x.dtype)
    x = jnp.concatenate([cls, x], axis=1)                      # (B, T, D)
    x = x + p["pos"][None, :, :].astype(x.dtype)
    # pre-layernorm output is reused as the residual, so it stays standalone
    x = pallas_layernorm(x, p["pre_ln"])
    x = fused_self_attention(x, p["ln1"], p["attn"], n_heads, None,
                             causal=False, residual=x)
    B_, T, _ = x.shape
    h2 = pallas_linear(x.reshape(B_ * T, D), p["fc1_w"], p["fc1_b"],
                       activation="quick_gelu", ln=p["ln2"])
    x = pallas_linear(h2, p["fc2_w"], p["fc2_b"],
                      residual=x.reshape(B_ * T, D)).reshape(B_, T, D)
    return x   # last_hidden_state (matching CLIPVisionTransformer)


def attention_block(blk, x, enc, pad_bias, n_heads):
    """AttentionBlock.forward: ln_1 -> GPT2 self-attn -> +x -> ln_2 -> cross-attn
    -> +r1 -> ln_3 -> GPT2 MLP -> +r2 (LNs fused into consumer matmuls,
    residuals fused into the producing matmul epilogues)."""
    B, S, D = x.shape
    r1 = fused_self_attention(x, blk["ln1"], blk["self_attn"], n_heads, pad_bias,
                              causal=True, residual=x)
    r2 = fused_cross_attention(r1, blk["ln2"], enc, blk["cross_attn"], n_heads,
                               residual=r1)
    m = pallas_linear(r2.reshape(B * S, D), blk["c_fc_w"], blk["c_fc_b"],
                      activation="gelu_new", ln=blk["ln3"])
    out = pallas_linear(m, blk["c_proj_w"], blk["c_proj_b"],
                        residual=r2.reshape(B * S, D))
    return out.reshape(B, S, D)


def image_captions_forward(params, image_pixel, decoder_input_ids, decoder_mask,
                           *, n_heads, patch, vocab):
    enc = vision_encoder(params["encoder"], image_pixel, n_heads, patch)
    B, S = decoder_input_ids.shape
    D = params["wte"].shape[1]
    # TODO(synk): embedding gathers (wte/wpe) stay in XLA; a Pallas gather would
    # need scalar-prefetch DMA machinery for no gain at these sizes.
    input_embeds = jnp.take(params["wte"], decoder_input_ids, axis=0)
    position_embed = params["wpe"][:S]
    hidden = (input_embeds + position_embed[None, :, :]).astype(jnp.bfloat16)
    pad_bias = None
    if decoder_mask is not None:
        pad_bias = ((1.0 - decoder_mask.astype(jnp.float32)) * -1.0e9).reshape(B, 1, S)
    for blk in params["blocks"]:
        hidden = attention_block(blk, hidden, enc, pad_bias, n_heads)
    # lm head: weights pre-padded to a 128-multiple vocab at init; bf16 logits.
    logits = pallas_linear(hidden.reshape(B * S, D), params["head_w"],
                           params["head_b"])
    return logits.reshape(B, S, -1)[:, :, :vocab]


# ----------------------------------------------------------------------------
# Deterministic synthetic parameter init (bf16 weights, f32 biases / LN params)
# ----------------------------------------------------------------------------
def _dense_params(key, d_in, d_out, scale=0.02):
    kw, kb = jax.random.split(key)
    w = (scale * jax.random.normal(kw, (d_in, d_out), jnp.float32)).astype(jnp.bfloat16)
    b = scale * jax.random.normal(kb, (d_out,), jnp.float32)
    return w, b


def _self_attn_params(key, d):
    kq, kk, kv, ko = jax.random.split(key, 4)
    wq, bq = _dense_params(kq, d, d)
    wk, bk = _dense_params(kk, d, d)
    wv, bv = _dense_params(kv, d, d)
    wo, bo = _dense_params(ko, d, d)
    return {"wqkv": jnp.concatenate([wq, wk, wv], axis=1),
            "bqkv": jnp.concatenate([bq, bk, bv], axis=0),
            "wo": wo, "bo": bo}


def _cross_attn_params(key, d):
    kq, kk, kv, ko = jax.random.split(key, 4)
    wq, bq = _dense_params(kq, d, d)
    wk, bk = _dense_params(kk, d, d)
    wv, bv = _dense_params(kv, d, d)
    wo, bo = _dense_params(ko, d, d)
    return {"wq": wq, "bq": bq,
            "wkv": jnp.concatenate([wk, wv], axis=1),
            "bkv": jnp.concatenate([bk, bv], axis=0),
            "wo": wo, "bo": bo}


def _ln_params(d):
    return {"g": jnp.ones((d,), jnp.float32), "b": jnp.zeros((d,), jnp.float32)}


def init_params(key, *, d_model, n_heads, vocab, max_pos, n_blocks, c_in, patch,
                n_enc_tokens):
    keys = jax.random.split(key, 10 + n_blocks)
    enc = {
        "patch_w": (0.02 * jax.random.normal(
            keys[0], (c_in * patch * patch, d_model), jnp.float32)).astype(jnp.bfloat16),
        "patch_b": jnp.zeros((d_model,), jnp.float32),   # CLIP patch conv has no bias
        "cls": (0.02 * jax.random.normal(keys[1], (d_model,), jnp.float32)).astype(jnp.bfloat16),
        "pos": (0.02 * jax.random.normal(keys[2], (n_enc_tokens, d_model),
                                         jnp.float32)).astype(jnp.bfloat16),
        "pre_ln": _ln_params(d_model),
        "ln1": _ln_params(d_model),
        "attn": _self_attn_params(keys[3], d_model),
        "ln2": _ln_params(d_model),
    }
    enc["fc1_w"], enc["fc1_b"] = _dense_params(keys[4], d_model, 4 * d_model)
    enc["fc2_w"], enc["fc2_b"] = _dense_params(keys[5], 4 * d_model, d_model)

    blocks = []
    for i in range(n_blocks):
        bk = jax.random.split(keys[10 + i], 4)
        blk = {
            "ln1": _ln_params(d_model),
            "self_attn": _self_attn_params(bk[0], d_model),
            "ln2": _ln_params(d_model),
            "cross_attn": _cross_attn_params(bk[1], d_model),
            "ln3": _ln_params(d_model),
        }
        blk["c_fc_w"], blk["c_fc_b"] = _dense_params(bk[2], d_model, 4 * d_model)
        blk["c_proj_w"], blk["c_proj_b"] = _dense_params(bk[3], 4 * d_model, d_model)
        blocks.append(blk)

    # lm head: pre-pad vocab to a multiple of 128 once at init (no per-step copies)
    head_w, head_b = _dense_params(keys[6], d_model, vocab)
    vocab_pad = _round_up(vocab, 128)
    head_w = jnp.pad(head_w, ((0, 0), (0, vocab_pad - vocab)))
    head_b = jnp.pad(head_b, ((0, vocab_pad - vocab),))

    return {
        "encoder": enc,
        "wte": (0.02 * jax.random.normal(keys[7], (vocab, d_model),
                                         jnp.float32)).astype(jnp.bfloat16),
        "wpe": (0.02 * jax.random.normal(keys[8], (max_pos, d_model),
                                         jnp.float32)).astype(jnp.bfloat16),
        "blocks": blocks,
        "head_w": head_w,
        "head_b": head_b,
    }


# ----------------------------------------------------------------------------
# Driver
# ----------------------------------------------------------------------------
if __name__ == "__main__":
    # Small shapes consistent with the module's forward (scaled-down CLIP-L + GPT2-medium):
    B, C, H, W = 2, 3, 16, 16
    patch = 8
    d_model, n_heads = 32, 4
    S = 8                       # decoder sequence length
    vocab = 50                  # synthetic tokenizer.vocab_size
    max_pos = 64
    n_blocks = 2                # number of injected AttentionBlocks
    n_enc_tokens = (H // patch) * (W // patch) + 1   # patches + cls

    key = jax.random.PRNGKey(0)
    k_params, k_img, k_ids = jax.random.split(key, 3)

    params = init_params(
        k_params, d_model=d_model, n_heads=n_heads, vocab=vocab, max_pos=max_pos,
        n_blocks=n_blocks, c_in=C, patch=patch, n_enc_tokens=n_enc_tokens,
    )

    image_pixel = jax.random.normal(k_img, (B, C, H, W), jnp.float32)
    decoder_input_ids = jax.random.randint(k_ids, (B, S), 0, vocab, dtype=jnp.int32)
    decoder_mask = jnp.ones((B, S), jnp.float32).at[1, 6:].set(0.0)  # pad last 2 tokens of batch 1

    forward = jax.jit(functools.partial(image_captions_forward,
                                        n_heads=n_heads, patch=patch, vocab=vocab))
    logits = forward(params, image_pixel, decoder_input_ids, decoder_mask)
    jax.block_until_ready(logits)
    assert logits.shape == (B, S, vocab), logits.shape
    assert bool(jnp.all(jnp.isfinite(logits.astype(jnp.float32))))
    print("KERNEL_OK")
</pallas_src>

<mosaic_0001>
module attributes {stable_mosaic.version = 11 : i64} {
  func.func @_linear_kernel(%arg0: i32, %arg1: i32, %arg2: i32, %arg3: memref<16x256xbf16, #tpu.memory_space<vmem>>, %arg4: memref<256x128xbf16, #tpu.memory_space<vmem>>, %arg5: memref<1x128xf32, #tpu.memory_space<vmem>>, %arg6: memref<16x128xbf16, #tpu.memory_space<vmem>>, %arg7: memref<16x128xf32, #tpu.memory_space<vmem>>) attributes {dimension_semantics = [#tpu.dimension_semantics<parallel>, #tpu.dimension_semantics<parallel>, #tpu.dimension_semantics<arbitrary>], iteration_bounds = array<i64: 1, 1, 1>, scalar_prefetch = 0 : i64, scratch_operands = 1 : i64, tpu.core_type = #tpu.core_type<tc>, window_params = [{transform_indices = @transform_0, window_bounds = array<i64: 16, 256>}, {transform_indices = @transform_1, window_bounds = array<i64: 256, 128>}, {transform_indices = @transform_2, window_bounds = array<i64: 1, 128>}, {transform_indices = @transform_3, window_bounds = array<i64: 16, 128>}]} {
    %c0_i32 = arith.constant 0 : i32
    %0 = arith.cmpi eq, %arg2, %c0_i32 : i32
    %1 = arith.extui %0 : i1 to i32
    %c0_i32_0 = arith.constant 0 : i32
    %2 = arith.cmpi ne, %1, %c0_i32_0 : i32
    scf.if %2 {
      %cst_10 = arith.constant 0.000000e+00 : f32
      %12 = vector.broadcast %cst_10 : f32 to vector<16x128xf32>
      %c0_11 = arith.constant 0 : index
      %c0_12 = arith.constant 0 : index
      %13 = vector.load %arg7[%c0_11, %c0_12] : memref<16x128xf32, #tpu.memory_space<vmem>>, vector<16x128xf32>
      tpu.vector_store %arg7[%c0_11, %c0_12], %12 {strides = array<i32>} : memref<16x128xf32, #tpu.memory_space<vmem>>, vector<16x128xf32>,
    } else {
    }
    %c0 = arith.constant 0 : index
    %c0_1 = arith.constant 0 : index
    %3 = vector.load %arg3[%c0, %c0_1] : memref<16x256xbf16, #tpu.memory_space<vmem>>, vector<16x256xbf16>
    %c0_2 = arith.constant 0 : index
    %c0_3 = arith.constant 0 : index
    %4 = vector.load %arg7[%c0_2, %c0_3] : memref<16x128xf32, #tpu.memory_space<vmem>>, vector<16x128xf32>
    %c0_4 = arith.constant 0 : index
    %c0_5 = arith.constant 0 : index
    %5 = vector.load %arg4[%c0_4, %c0_5] : memref<256x128xbf16, #tpu.memory_space<vmem>>, vector<256x128xbf16>
    %cst = arith.constant dense<0.000000e+00> : vector<16x128xf32>
    %6 = tpu.matmul %3, %5, %cst {dimension_numbers = #tpu.dot_dimension_numbers<[1], [0], [0], [1], [0, 0, 1, 1], [], []>} : vector<16x256xbf16>, vector<256x128xbf16>, vector<16x128xf32> -> vector<16x128xf32>
    %7 = arith.addf %4, %6 : vector<16x128xf32>
    %c0_6 = arith.constant 0 : index
    %c0_7 = arith.constant 0 : index
    %8 = vector.load %arg7[%c0_6, %c0_7] : memref<16x128xf32, #tpu.memory_space<vmem>>, vector<16x128xf32>
    tpu.vector_store %arg7[%c0_6, %c0_7], %7 {strides = array<i32>} : memref<16x128xf32, #tpu.memory_space<vmem>>, vector<16x128xf32>,
    %c0_i32_8 = arith.constant 0 : i32
    %9 = arith.cmpi eq, %arg2, %c0_i32_8 : i32
    %10 = arith.extui %9 : i1 to i32
    %c0_i32_9 = arith.constant 0 : i32
    %11 = arith.cmpi ne, %10, %c0_i32_9 : i32
    scf.if %11 {
      %c0_10 = arith.constant 0 : index
      %c0_11 = arith.constant 0 : index
      %12 = vector.load %arg7[%c0_10, %c0_11] : memref<16x128xf32, #tpu.memory_space<vmem>>, vector<16x128xf32>
      %c0_12 = arith.constant 0 : index
      %c0_13 = arith.constant 0 : index
      %13 = vector.load %arg5[%c0_12, %c0_13] : memref<1x128xf32, #tpu.memory_space<vmem>>, vector<1x128xf32>
      %14 = vector.broadcast %13 : vector<1x128xf32> to vector<16x128xf32>
      %15 = arith.addf %12, %14 : vector<16x128xf32>
      %16 = arith.truncf %15 : vector<16x128xf32> to vector<16x128xbf16>
      %c0_14 = arith.constant 0 : index
      %c0_15 = arith.constant 0 : index
      %17 = vector.load %arg6[%c0_14, %c0_15] : memref<16x128xbf16, #tpu.memory_space<vmem>>, vector<16x128xbf16>
      tpu.vector_store %arg6[%c0_14, %c0_15], %16 {strides = array<i32>} : memref<16x128xbf16, #tpu.memory_space<vmem>>, vector<16x128xbf16>,
    } else {
    }
    return
  }
  func.func @transform_0(%arg0: i32, %arg1: i32, %arg2: i32) -> (i32, i32) {
    %c0_i32 = arith.constant 0 : i32
    return %arg0, %arg2 : i32, i32
  }
  func.func @transform_1(%arg0: i32, %arg1: i32, %arg2: i32) -> (i32, i32) {
    %c0_i32 = arith.constant 0 : i32
    return %arg2, %arg1 : i32, i32
  }
  func.func @transform_2(%arg0: i32, %arg1: i32, %arg2: i32) -> (i32, i32) {
    %c0_i32 = arith.constant 0 : i32
    %c0_i32_0 = arith.constant 0 : i32
    return %c0_i32, %arg1 : i32, i32
  }
  func.func @transform_3(%arg0: i32, %arg1: i32, %arg2: i32) -> (i32, i32) {
    %c0_i32 = arith.constant 0 : i32
    return %arg0, %arg1 : i32, i32
  }
}

module attributes {stable_mosaic.version = 11 : i64} {
  func.func @_layernorm_kernel(%arg0: i32, %arg1: memref<16x32xbf16, #tpu.memory_space<vmem>>, %arg2: memref<1x32xf32, #tpu.memory_space<vmem>>, %arg3: memref<1x32xf32, #tpu.memory_space<vmem>>, %arg4: memref<16x32xbf16, #tpu.memory_space<vmem>>) attributes {dimension_semantics = [#tpu.dimension_semantics<parallel>], iteration_bounds = array<i64: 1>, scalar_prefetch = 0 : i64, scratch_operands = 0 : i64, tpu.core_type = #tpu.core_type<tc>, window_params = [{transform_indices = @transform_0, window_bounds = array<i64: 16, 32>}, {pipeline_mode = #tpu.pipeline_mode<synchronous>, transform_indices = @transform_1, window_bounds = array<i64: 1, 32>}, {pipeline_mode = #tpu.pipeline_mode<synchronous>, transform_indices = @transform_2, window_bounds = array<i64: 1, 32>}, {transform_indices = @transform_3, window_bounds = array<i64: 16, 32>}]} {
    %c0 = arith.constant 0 : index
    %c0_0 = arith.constant 0 : index
    %0 = vector.load %arg1[%c0, %c0_0] : memref<16x32xbf16, #tpu.memory_space<vmem>>, vector<16x32xbf16>
    %1 = arith.extf %0 : vector<16x32xbf16> to vector<16x32xf32>
    %cst = arith.constant dense<0.000000e+00> : vector<16xf32>
    %2 = vector.multi_reduction <add>, %1, %cst [1] : vector<16x32xf32> to vector<16xf32>
    %3 = vector.shape_cast %2 : vector<16xf32> to vector<16x1xf32>
    %cst_1 = arith.constant 3.200000e+01 : f32
    %4 = vector.broadcast %cst_1 : f32 to vector<16x1xf32>
    %5 = arith.divf %3, %4 : vector<16x1xf32>
    %6 = vector.broadcast %5 : vector<16x1xf32> to vector<16x32xf32>
    %7 = arith.subf %1, %6 : vector<16x32xf32>
    %8 = arith.mulf %7, %7 : vector<16x32xf32>
    %cst_2 = arith.constant dense<0.000000e+00> : vector<16xf32>
    %9 = vector.multi_reduction <add>, %8, %cst_2 [1] : vector<16x32xf32> to vector<16xf32>
    %10 = vector.shape_cast %9 : vector<16xf32> to vector<16x1xf32>
    %cst_3 = arith.constant 3.200000e+01 : f32
    %11 = vector.broadcast %cst_3 : f32 to vector<16x1xf32>
    %12 = arith.divf %10, %11 : vector<16x1xf32>
    %cst_4 = arith.constant 9.99999974E-6 : f32
    %13 = vector.broadcast %cst_4 : f32 to vector<16x1xf32>
    %14 = arith.addf %12, %13 : vector<16x1xf32>
    %15 = math.rsqrt %14 : vector<16x1xf32>
    %16 = vector.broadcast %15 : vector<16x1xf32> to vector<16x32xf32>
    %17 = arith.mulf %7, %16 : vector<16x32xf32>
    %c0_5 = arith.constant 0 : index
    %c0_6 = arith.constant 0 : index
    %18 = vector.load %arg2[%c0_5, %c0_6] : memref<1x32xf32, #tpu.memory_space<vmem>>, vector<1x32xf32>
    %19 = vector.broadcast %18 : vector<1x32xf32> to vector<16x32xf32>
    %20 = arith.mulf %17, %19 : vector<16x32xf32>
    %c0_7 = arith.constant 0 : index
    %c0_8 = arith.constant 0 : index
    %21 = vector.load %arg3[%c0_7, %c0_8] : memref<1x32xf32, #tpu.memory_space<vmem>>, vector<1x32xf32>
    %22 = vector.broadcast %21 : vector<1x32xf32> to vector<16x32xf32>
    %23 = arith.addf %20, %22 : vector<16x32xf32>
    %24 = arith.truncf %23 : vector<16x32xf32> to vector<16x32xbf16>
    %c0_9 = arith.constant 0 : index
    %c0_10 = arith.constant 0 : index
    %25 = vector.load %arg4[%c0_9, %c0_10] : memref<16x32xbf16, #tpu.memory_space<vmem>>, vector<16x32xbf16>
    tpu.vector_store %arg4[%c0_9, %c0_10], %24 {strides = array<i32>} : memref<16x32xbf16, #tpu.memory_space<vmem>>, vector<16x32xbf16>,
    return
  }
  func.func @transform_0(%arg0: i32) -> (i32, i32) {
    %c0_i32 = arith.constant 0 : i32
    %c0_i32_0 = arith.constant 0 : i32
    return %arg0, %c0_i32 : i32, i32
  }
  func.func @transform_1(%arg0: i32) -> (i32, i32) {
    %c0_i32 = arith.constant 0 : i32
    %c0_i32_0 = arith.constant 0 : i32
    %c0_i32_1 = arith.constant 0 : i32
    return %c0_i32, %c0_i32_0 : i32, i32
  }
  func.func @transform_2(%arg0: i32) -> (i32, i32) {
    %c0_i32 = arith.constant 0 : i32
    %c0_i32_0 = arith.constant 0 : i32
    %c0_i32_1 = arith.constant 0 : i32
    return %c0_i32, %c0_i32_0 : i32, i32
  }
  func.func @transform_3(%arg0: i32) -> (i32, i32) {
    %c0_i32 = arith.constant 0 : i32
    %c0_i32_0 = arith.constant 0 : i32
    return %arg0, %c0_i32 : i32, i32
  }
}

module attributes {stable_mosaic.version = 11 : i64} {
  func.func @_linear_kernel(%arg0: i32, %arg1: i32, %arg2: i32, %arg3: memref<16x128xbf16, #tpu.memory_space<vmem>>, %arg4: memref<128x128xbf16, #tpu.memory_space<vmem>>, %arg5: memref<1x128xf32, #tpu.memory_space<vmem>>, %arg6: memref<1x128xf32, #tpu.memory_space<vmem>>, %arg7: memref<1x128xf32, #tpu.memory_space<vmem>>, %arg8: memref<16x128xbf16, #tpu.memory_space<vmem>>, %arg9: memref<16x128xf32, #tpu.memory_space<vmem>>) attributes {dimension_semantics = [#tpu.dimension_semantics<parallel>, #tpu.dimension_semantics<parallel>, #tpu.dimension_semantics<arbitrary>], iteration_bounds = array<i64: 1, 1, 1>, scalar_prefetch = 0 : i64, scratch_operands = 1 : i64, tpu.core_type = #tpu.core_type<tc>, window_params = [{transform_indices = @transform_0, window_bounds = array<i64: 16, 128>}, {transform_indices = @transform_1, window_bounds = array<i64: 128, 128>}, {transform_indices = @transform_2, window_bounds = array<i64: 1, 128>}, {transform_indices = @transform_3, window_bounds = array<i64: 1, 128>}, {transform_indices = @transform_4, window_bounds = array<i64: 1, 128>}, {transform_indices = @transform_5, window_bounds = array<i64: 16, 128>}]} {
    %c0_i32 = arith.constant 0 : i32
    %0 = arith.cmpi eq, %arg2, %c0_i32 : i32
    %1 = arith.extui %0 : i1 to i32
    %c0_i32_0 = arith.constant 0 : i32
    %2 = arith.cmpi ne, %1, %c0_i32_0 : i32
    scf.if %2 {
      %cst_19 = arith.constant 0.000000e+00 : f32
      %38 = vector.broadcast %cst_19 : f32 to vector<16x128xf32>
      %c0_20 = arith.constant 0 : index
      %c0_21 = arith.constant 0 : index
      %39 = vector.load %arg9[%c0_20, %c0_21] : memref<16x128xf32, #tpu.memory_space<vmem>>, vector<16x128xf32>
      tpu.vector_store %arg9[%c0_20, %c0_21], %38 {strides = array<i32>} : memref<16x128xf32, #tpu.memory_space<vmem>>, vector<16x128xf32>,
    } else {
    }
    %c0 = arith.constant 0 : index
    %c0_1 = arith.constant 0 : index
    %3 = vector.load %arg3[%c0, %c0_1] : memref<16x128xbf16, #tpu.memory_space<vmem>>, vector<16x128xbf16>
    %4 = arith.extf %3 : vector<16x128xbf16> to vector<16x128xf32>
    %cst = arith.constant dense<0.000000e+00> : vector<16xf32>
    %5 = vector.multi_reduction <add>, %4, %cst [1] : vector<16x128xf32> to vector<16xf32>
    %6 = vector.shape_cast %5 : vector<16xf32> to vector<16x1xf32>
    %cst_2 = arith.constant 3.125000e-02 : f32
    %7 = vector.broadcast %cst_2 : f32 to vector<16x1xf32>
    %8 = arith.mulf %6, %7 : vector<16x1xf32>
    %9 = arith.mulf %4, %4 : vector<16x128xf32>
    %cst_3 = arith.constant dense<0.000000e+00> : vector<16xf32>
    %10 = vector.multi_reduction <add>, %9, %cst_3 [1] : vector<16x128xf32> to vector<16xf32>
    %11 = vector.shape_cast %10 : vector<16xf32> to vector<16x1xf32>
    %cst_4 = arith.constant 3.125000e-02 : f32
    %12 = vector.broadcast %cst_4 : f32 to vector<16x1xf32>
    %13 = arith.mulf %11, %12 : vector<16x1xf32>
    %14 = arith.mulf %8, %8 : vector<16x1xf32>
    %15 = arith.subf %13, %14 : vector<16x1xf32>
    %16 = vector.broadcast %8 : vector<16x1xf32> to vector<16x128xf32>
    %17 = arith.subf %4, %16 : vector<16x128xf32>
    %cst_5 = arith.constant 9.99999974E-6 : f32
    %18 = vector.broadcast %cst_5 : f32 to vector<16x1xf32>
    %19 = arith.addf %15, %18 : vector<16x1xf32>
    %20 = math.rsqrt %19 : vector<16x1xf32>
    %21 = vector.broadcast %20 : vector<16x1xf32> to vector<16x128xf32>
    %22 = arith.mulf %17, %21 : vector<16x128xf32>
    %c0_6 = arith.constant 0 : index
    %c0_7 = arith.constant 0 : index
    %23 = vector.load %arg6[%c0_6, %c0_7] : memref<1x128xf32, #tpu.memory_space<vmem>>, vector<1x128xf32>
    %24 = vector.broadcast %23 : vector<1x128xf32> to vector<16x128xf32>
    %25 = arith.mulf %22, %24 : vector<16x128xf32>
    %c0_8 = arith.constant 0 : index
    %c0_9 = arith.constant 0 : index
    %26 = vector.load %arg7[%c0_8, %c0_9] : memref<1x128xf32, #tpu.memory_space<vmem>>, vector<1x128xf32>
    %27 = vector.broadcast %26 : vector<1x128xf32> to vector<16x128xf32>
    %28 = arith.addf %25, %27 : vector<16x128xf32>
    %29 = arith.truncf %28 : vector<16x128xf32> to vector<16x128xbf16>
    %c0_10 = arith.constant 0 : index
    %c0_11 = arith.constant 0 : index
    %30 = vector.load %arg9[%c0_10, %c0_11] : memref<16x128xf32, #tpu.memory_space<vmem>>, vector<16x128xf32>
    %c0_12 = arith.constant 0 : index
    %c0_13 = arith.constant 0 : index
    %31 = vector.load %arg4[%c0_12, %c0_13] : memref<128x128xbf16, #tpu.memory_space<vmem>>, vector<128x128xbf16>
    %cst_14 = arith.constant dense<0.000000e+00> : vector<16x128xf32>
    %32 = tpu.matmul %29, %31, %cst_14 {dimension_numbers = #tpu.dot_dimension_numbers<[1], [0], [0], [1], [0, 0, 1, 1], [], []>} : vector<16x128xbf16>, vector<128x128xbf16>, vector<16x128xf32> -> vector<16x128xf32>
    %33 = arith.addf %30, %32 : vector<16x128xf32>
    %c0_15 = arith.constant 0 : index
    %c0_16 = arith.constant 0 : index
    %34 = vector.load %arg9[%c0_15, %c0_16] : memref<16x128xf32, #tpu.memory_space<vmem>>, vector<16x128xf32>
    tpu.vector_store %arg9[%c0_15, %c0_16], %33 {strides = array<i32>} : memref<16x128xf32, #tpu.memory_space<vmem>>, vector<16x128xf32>,
    %c0_i32_17 = arith.constant 0 : i32
    %35 = arith.cmpi eq, %arg2, %c0_i32_17 : i32
    %36 = arith.extui %35 : i1 to i32
    %c0_i32_18 = arith.constant 0 : i32
    %37 = arith.cmpi ne, %36, %c0_i32_18 : i32
    scf.if %37 {
      %c0_19 = arith.constant 0 : index
      %c0_20 = arith.constant 0 : index
      %38 = vector.load %arg9[%c0_19, %c0_20] : memref<16x128xf32, #tpu.memory_space<vmem>>, vector<16x128xf32>
      %c0_21 = arith.constant 0 : index
      %c0_22 = arith.constant 0 : index
      %39 = vector.load %arg5[%c0_21, %c0_22] : memref<1x128xf32, #tpu.memory_space<vmem>>, vector<1x128xf32>
      %40 = vector.broadcast %39 : vector<1x128xf32> to vector<16x128xf32>
      %41 = arith.addf %38, %40 : vector<16x128xf32>
      %42 = arith.truncf %41 : vector<16x128xf32> to vector<16x128xbf16>
      %c0_23 = arith.constant 0 : index
      %c0_24 = arith.constant 0 : index
      %43 = vector.load %arg8[%c0_23, %c0_24] : memref<16x128xbf16, #tpu.memory_space<vmem>>, vector<16x128xbf16>
      tpu.vector_store %arg8[%c0_23, %c0_24], %42 {strides = array<i32>} : memref<16x128xbf16, #tpu.memory_space<vmem>>, vector<16x128xbf16>,
    } else {
    }
    return
  }
  func.func @transform_0(%arg0: i32, %arg1: i32, %arg2: i32) -> (i32, i32) {
    %c0_i32 = arith.constant 0 : i32
    return %arg0, %arg2 : i32, i32
  }
  func.func @transform_1(%arg0: i32, %arg1: i32, %arg2: i32) -> (i32, i32) {
    %c0_i32 = arith.constant 0 : i32
    return %arg2, %arg1 : i32, i32
  }
  func.func @transform_2(%arg0: i32, %arg1: i32, %arg2: i32) -> (i32, i32) {
    %c0_i32 = arith.constant 0 : i32
    %c0_i32_0 = arith.constant 0 : i32
    return %c0_i32, %arg1 : i32, i32
  }
  func.func @transform_3(%arg0: i32, %arg1: i32, %arg2: i32) -> (i32, i32) {
    %c0_i32 = arith.constant 0 : i32
    %c0_i32_0 = arith.constant 0 : i32
    return %c0_i32, %arg2 : i32, i32
  }
  func.func @transform_4(%arg0: i32, %arg1: i32, %arg2: i32) -> (i32, i32) {
    %c0_i32 = arith.constant 0 : i32
    %c0_i32_0 = arith.constant 0 : i32
    return %c0_i32, %arg2 : i32, i32
  }
  func.func @transform_5(%arg0: i32, %arg1: i32, %arg2: i32) -> (i32, i32) {
    %c0_i32 = arith.constant 0 : i32
    return %arg0, %arg1 : i32, i32
  }
}

module attributes {stable_mosaic.version = 11 : i64} {
  func.func @_flash_mha_kernel(%arg0: i32, %arg1: i32, %arg2: i32, %arg3: memref<1x1x5x8xbf16, #tpu.memory_space<vmem>>, %arg4: memref<1x1x5x8xbf16, #tpu.memory_space<vmem>>, %arg5: memref<1x1x5x8xbf16, #tpu.memory_space<vmem>>, %arg6: memref<1x1x5x8xbf16, #tpu.memory_space<vmem>>, %arg7: memref<5x1xf32, #tpu.memory_space<vmem>>, %arg8: memref<5x1xf32, #tpu.memory_space<vmem>>, %arg9: memref<5x8xf32, #tpu.memory_space<vmem>>) attributes {dimension_semantics = [#tpu.dimension_semantics<parallel>, #tpu.dimension_semantics<parallel>, #tpu.dimension_semantics<arbitrary>], iteration_bounds = array<i64: 2, 4, 1>, scalar_prefetch = 0 : i64, scratch_operands = 3 : i64, tpu.core_type = #tpu.core_type<tc>, window_params = [{transform_indices = @transform_0, window_bounds = array<i64: 1, 1, 5, 8>}, {transform_indices = @transform_1, window_bounds = array<i64: 1, 1, 5, 8>}, {transform_indices = @transform_2, window_bounds = array<i64: 1, 1, 5, 8>}, {transform_indices = @transform_3, window_bounds = array<i64: 1, 1, 5, 8>}]} {
    %c0_i32 = arith.constant 0 : i32
    %0 = arith.cmpi eq, %arg2, %c0_i32 : i32
    %1 = arith.extui %0 : i1 to i32
    %c0_i32_0 = arith.constant 0 : i32
    %2 = arith.cmpi ne, %1, %c0_i32_0 : i32
    scf.if %2 {
      %cst_30 = arith.constant 0xFF800000 : f32
      %38 = vector.broadcast %cst_30 : f32 to vector<5x1xf32>
      %c0_31 = arith.constant 0 : index
      %c0_32 = arith.constant 0 : index
      %39 = vector.load %arg7[%c0_31, %c0_32] : memref<5x1xf32, #tpu.memory_space<vmem>>, vector<5x1xf32>
      tpu.vector_store %arg7[%c0_31, %c0_32], %38 {strides = array<i32>} : memref<5x1xf32, #tpu.memory_space<vmem>>, vector<5x1xf32>,
      %cst_33 = arith.constant 0.000000e+00 : f32
      %40 = vector.broadcast %cst_33 : f32 to vector<5x1xf32>
      %c0_34 = arith.constant 0 : index
      %c0_35 = arith.constant 0 : index
      %41 = vector.load %arg8[%c0_34, %c0_35] : memref<5x1xf32, #tpu.memory_space<vmem>>, vector<5x1xf32>
      tpu.vector_store %arg8[%c0_34, %c0_35], %40 {strides = array<i32>} : memref<5x1xf32, #tpu.memory_space<vmem>>, vector<5x1xf32>,
      %cst_36 = arith.constant 0.000000e+00 : f32
      %42 = vector.broadcast %cst_36 : f32 to vector<5x8xf32>
      %c0_37 = arith.constant 0 : index
      %c0_38 = arith.constant 0 : index
      %43 = vector.load %arg9[%c0_37, %c0_38] : memref<5x8xf32, #tpu.memory_space<vmem>>, vector<5x8xf32>
      tpu.vector_store %arg9[%c0_37, %c0_38], %42 {strides = array<i32>} : memref<5x8xf32, #tpu.memory_space<vmem>>, vector<5x8xf32>,
    } else {
    }
    %c0 = arith.constant 0 : index
    %c0_1 = arith.constant 0 : index
    %c0_2 = arith.constant 0 : index
    %c0_3 = arith.constant 0 : index
    %3 = vector.load %arg3[%c0, %c0_1, %c0_2, %c0_3] : memref<1x1x5x8xbf16, #tpu.memory_space<vmem>>, vector<1x1x5x8xbf16>
    %4 = vector.shape_cast %3 : vector<1x1x5x8xbf16> to vector<5x8xbf16>
    %c0_4 = arith.constant 0 : index
    %c0_5 = arith.constant 0 : index
    %c0_6 = arith.constant 0 : index
    %c0_7 = arith.constant 0 : index
    %5 = vector.load %arg4[%c0_4, %c0_5, %c0_6, %c0_7] : memref<1x1x5x8xbf16, #tpu.memory_space<vmem>>, vector<1x1x5x8xbf16>
    %6 = vector.shape_cast %5 : vector<1x1x5x8xbf16> to vector<5x8xbf16>
    %c0_8 = arith.constant 0 : index
    %c0_9 = arith.constant 0 : index
    %c0_10 = arith.constant 0 : index
    %c0_11 = arith.constant 0 : index
    %7 = vector.load %arg5[%c0_8, %c0_9, %c0_10, %c0_11] : memref<1x1x5x8xbf16, #tpu.memory_space<vmem>>, vector<1x1x5x8xbf16>
    %8 = vector.shape_cast %7 : vector<1x1x5x8xbf16> to vector<5x8xbf16>
    %cst = arith.constant dense<0.000000e+00> : vector<5x5xf32>
    %9 = tpu.matmul %4, %6, %cst {dimension_numbers = #tpu.dot_dimension_numbers<[1], [1], [0], [0], [0, 0, 1, 0], [], []>} : vector<5x8xbf16>, vector<5x8xbf16>, vector<5x5xf32> -> vector<5x5xf32>
    %cst_12 = arith.constant 0.353553385 : f32
    %10 = vector.broadcast %cst_12 : f32 to vector<5x5xf32>
    %11 = arith.mulf %9, %10 : vector<5x5xf32>
    %c0_13 = arith.constant 0 : index
    %c0_14 = arith.constant 0 : index
    %12 = vector.load %arg7[%c0_13, %c0_14] : memref<5x1xf32, #tpu.memory_space<vmem>>, vector<5x1xf32>
    %cst_15 = arith.constant dense<0xFF800000> : vector<5xf32>
    %13 = vector.multi_reduction <maximumf>, %11, %cst_15 [1] : vector<5x5xf32> to vector<5xf32>
    %14 = vector.shape_cast %13 : vector<5xf32> to vector<5x1xf32>
    %15 = arith.maximumf %12, %14 : vector<5x1xf32>
    %16 = arith.subf %12, %15 : vector<5x1xf32>
    %17 = math.exp %16 : vector<5x1xf32>
    %18 = vector.broadcast %15 : vector<5x1xf32> to vector<5x5xf32>
    %19 = arith.subf %11, %18 : vector<5x5xf32>
    %20 = math.exp %19 : vector<5x5xf32>
    %c0_16 = arith.constant 0 : index
    %c0_17 = arith.constant 0 : index
    %21 = vector.load %arg8[%c0_16, %c0_17] : memref<5x1xf32, #tpu.memory_space<vmem>>, vector<5x1xf32>
    %22 = arith.mulf %17, %21 : vector<5x1xf32>
    %cst_18 = arith.constant dense<0.000000e+00> : vector<5xf32>
    %23 = vector.multi_reduction <add>, %20, %cst_18 [1] : vector<5x5xf32> to vector<5xf32>
    %24 = vector.shape_cast %23 : vector<5xf32> to vector<5x1xf32>
    %25 = arith.addf %22, %24 : vector<5x1xf32>
    %c0_19 = arith.constant 0 : index
    %c0_20 = arith.constant 0 : index
    %26 = vector.load %arg8[%c0_19, %c0_20] : memref<5x1xf32, #tpu.memory_space<vmem>>, vector<5x1xf32>
    tpu.vector_store %arg8[%c0_19, %c0_20], %25 {strides = array<i32>} : memref<5x1xf32, #tpu.memory_space<vmem>>, vector<5x1xf32>,
    %c0_21 = arith.constant 0 : index
    %c0_22 = arith.constant 0 : index
    %27 = vector.load %arg9[%c0_21, %c0_22] : memref<5x8xf32, #tpu.memory_space<vmem>>, vector<5x8xf32>
    %28 = vector.broadcast %17 : vector<5x1xf32> to vector<5x8xf32>
    %29 = arith.mulf %28, %27 : vector<5x8xf32>
    %30 = arith.truncf %20 : vector<5x5xf32> to vector<5x5xbf16>
    %cst_23 = arith.constant dense<0.000000e+00> : vector<5x8xf32>
    %31 = tpu.matmul %30, %8, %cst_23 {dimension_numbers = #tpu.dot_dimension_numbers<[1], [0], [0], [1], [0, 0, 1, 1], [], []>} : vector<5x5xbf16>, vector<5x8xbf16>, vector<5x8xf32> -> vector<5x8xf32>
    %32 = arith.addf %29, %31 : vector<5x8xf32>
    %c0_24 = arith.constant 0 : index
    %c0_25 = arith.constant 0 : index
    %33 = vector.load %arg9[%c0_24, %c0_25] : memref<5x8xf32, #tpu.memory_space<vmem>>, vector<5x8xf32>
    tpu.vector_store %arg9[%c0_24, %c0_25], %32 {strides = array<i32>} : memref<5x8xf32, #tpu.memory_space<vmem>>, vector<5x8xf32>,
    %c0_26 = arith.constant 0 : index
    %c0_27 = arith.constant 0 : index
    %34 = vector.load %arg7[%c0_26, %c0_27] : memref<5x1xf32, #tpu.memory_space<vmem>>, vector<5x1xf32>
    tpu.vector_store %arg7[%c0_26, %c0_27], %15 {strides = array<i32>} : memref<5x1xf32, #tpu.memory_space<vmem>>, vector<5x1xf32>,
    %c0_i32_28 = arith.constant 0 : i32
    %35 = arith.cmpi eq, %arg2, %c0_i32_28 : i32
    %36 = arith.extui %35 : i1 to i32
    %c0_i32_29 = arith.constant 0 : i32
    %37 = arith.cmpi ne, %36, %c0_i32_29 : i32
    scf.if %37 {
      %c0_30 = arith.constant 0 : index
      %c0_31 = arith.constant 0 : index
      %38 = vector.load %arg9[%c0_30, %c0_31] : memref<5x8xf32, #tpu.memory_space<vmem>>, vector<5x8xf32>
      %c0_32 = arith.constant 0 : index
      %c0_33 = arith.constant 0 : index
      %39 = vector.load %arg8[%c0_32, %c0_33] : memref<5x1xf32, #tpu.memory_space<vmem>>, vector<5x1xf32>
      %40 = tpu.reciprocal %39 {approx = true} : vector<5x1xf32> -> vector<5x1xf32>
      %41 = vector.broadcast %40 : vector<5x1xf32> to vector<5x8xf32>
      %42 = arith.mulf %38, %41 : vector<5x8xf32>
      %43 = arith.truncf %42 : vector<5x8xf32> to vector<5x8xbf16>
      %c0_34 = arith.constant 0 : index
      %c0_35 = arith.constant 0 : index
      %c0_36 = arith.constant 0 : index
      %c0_37 = arith.constant 0 : index
      %44 = vector.load %arg6[%c0_34, %c0_35, %c0_36, %c0_37] : memref<1x1x5x8xbf16, #tpu.memory_space<vmem>>, vector<1x1x5x8xbf16>
      %45 = vector.shape_cast %44 : vector<1x1x5x8xbf16> to vector<5x8xbf16>
      %46 = vector.shape_cast %43 : vector<5x8xbf16> to vector<1x1x5x8xbf16>
      tpu.vector_store %arg6[%c0_34, %c0_35, %c0_36, %c0_37], %46 {strides = array<i32>} : memref<1x1x5x8xbf16, #tpu.memory_space<vmem>>, vector<1x1x5x8xbf16>,
    } else {
    }
    return
  }
  func.func @transform_0(%arg0: i32, %arg1: i32, %arg2: i32) -> (i32, i32, i32, i32) {
    %c0_i32 = arith.constant 0 : i32
    %c0_i32_0 = arith.constant 0 : i32
    %c0_i32_1 = arith.constant 0 : i32
    return %arg0, %arg1, %c0_i32, %c0_i32_0 : i32, i32, i32, i32
  }
  func.func @transform_1(%arg0: i32, %arg1: i32, %arg2: i32) -> (i32, i32, i32, i32) {
    %c0_i32 = arith.constant 0 : i32
    %c0_i32_0 = arith.constant 0 : i32
    return %arg0, %arg1, %arg2, %c0_i32 : i32, i32, i32, i32
  }
  func.func @transform_2(%arg0: i32, %arg1: i32, %arg2: i32) -> (i32, i32, i32, i32) {
    %c0_i32 = arith.constant 0 : i32
    %c0_i32_0 = arith.constant 0 : i32
    return %arg0, %arg1, %arg2, %c0_i32 : i32, i32, i32, i32
  }
  func.func @transform_3(%arg0: i32, %arg1: i32, %arg2: i32) -> (i32, i32, i32, i32) {
    %c0_i32 = arith.constant 0 : i32
    %c0_i32_0 = arith.constant 0 : i32
    %c0_i32_1 = arith.constant 0 : i32
    return %arg0, %arg1, %c0_i32, %c0_i32_0 : i32, i32, i32, i32
  }
}

module attributes {stable_mosaic.version = 11 : i64} {
  func.func @_linear_kernel(%arg0: i32, %arg1: i32, %arg2: i32, %arg3: memref<16x128xbf16, #tpu.memory_space<vmem>>, %arg4: memref<128x128xbf16, #tpu.memory_space<vmem>>, %arg5: memref<1x128xf32, #tpu.memory_space<vmem>>, %arg6: memref<16x128xbf16, #tpu.memory_space<vmem>>, %arg7: memref<16x128xbf16, #tpu.memory_space<vmem>>, %arg8: memref<16x128xf32, #tpu.memory_space<vmem>>) attributes {dimension_semantics = [#tpu.dimension_semantics<parallel>, #tpu.dimension_semantics<parallel>, #tpu.dimension_semantics<arbitrary>], iteration_bounds = array<i64: 1, 1, 1>, scalar_prefetch = 0 : i64, scratch_operands = 1 : i64, tpu.core_type = #tpu.core_type<tc>, window_params = [{transform_indices = @transform_0, window_bounds = array<i64: 16, 128>}, {transform_indices = @transform_1, window_bounds = array<i64: 128, 128>}, {transform_indices = @transform_2, window_bounds = array<i64: 1, 128>}, {transform_indices = @transform_3, window_bounds = array<i64: 16, 128>}, {transform_indices = @transform_4, window_bounds = array<i64: 16, 128>}]} {
    %c0_i32 = arith.constant 0 : i32
    %0 = arith.cmpi eq, %arg2, %c0_i32 : i32
    %1 = arith.extui %0 : i1 to i32
    %c0_i32_0 = arith.constant 0 : i32
    %2 = arith.cmpi ne, %1, %c0_i32_0 : i32
    scf.if %2 {
      %cst_10 = arith.constant 0.000000e+00 : f32
      %12 = vector.broadcast %cst_10 : f32 to vector<16x128xf32>
      %c0_11 = arith.constant 0 : index
      %c0_12 = arith.constant 0 : index
      %13 = vector.load %arg8[%c0_11, %c0_12] : memref<16x128xf32, #tpu.memory_space<vmem>>, vector<16x128xf32>
      tpu.vector_store %arg8[%c0_11, %c0_12], %12 {strides = array<i32>} : memref<16x128xf32, #tpu.memory_space<vmem>>, vector<16x128xf32>,
    } else {
    }
    %c0 = arith.constant 0 : index
    %c0_1 = arith.constant 0 : index
    %3 = vector.load %arg3[%c0, %c0_1] : memref<16x128xbf16, #tpu.memory_space<vmem>>, vector<16x128xbf16>
    %c0_2 = arith.constant 0 : index
    %c0_3 = arith.constant 0 : index
    %4 = vector.load %arg8[%c0_2, %c0_3] : memref<16x128xf32, #tpu.memory_space<vmem>>, vector<16x128xf32>
    %c0_4 = arith.constant 0 : index
    %c0_5 = arith.constant 0 : index
    %5 = vector.load %arg4[%c0_4, %c0_5] : memref<128x128xbf16, #tpu.memory_space<vmem>>, vector<128x128xbf16>
    %cst = arith.constant dense<0.000000e+00> : vector<16x128xf32>
    %6 = tpu.matmul %3, %5, %cst {dimension_numbers = #tpu.dot_dimension_numbers<[1], [0], [0], [1], [0, 0, 1, 1], [], []>} : vector<16x128xbf16>, vector<128x128xbf16>, vector<16x128xf32> -> vector<16x128xf32>
    %7 = arith.addf %4, %6 : vector<16x128xf32>
    %c0_6 = arith.constant 0 : index
    %c0_7 = arith.constant 0 : index
    %8 = vector.load %arg8[%c0_6, %c0_7] : memref<16x128xf32, #tpu.memory_space<vmem>>, vector<16x128xf32>
    tpu.vector_store %arg8[%c0_6, %c0_7], %7 {strides = array<i32>} : memref<16x128xf32, #tpu.memory_space<vmem>>, vector<16x128xf32>,
    %c0_i32_8 = arith.constant 0 : i32
    %9 = arith.cmpi eq, %arg2, %c0_i32_8 : i32
    %10 = arith.extui %9 : i1 to i32
    %c0_i32_9 = arith.constant 0 : i32
    %11 = arith.cmpi ne, %10, %c0_i32_9 : i32
    scf.if %11 {
      %c0_10 = arith.constant 0 : index
      %c0_11 = arith.constant 0 : index
      %12 = vector.load %arg8[%c0_10, %c0_11] : memref<16x128xf32, #tpu.memory_space<vmem>>, vector<16x128xf32>
      %c0_12 = arith.constant 0 : index
      %c0_13 = arith.constant 0 : index
      %13 = vector.load %arg5[%c0_12, %c0_13] : memref<1x128xf32, #tpu.memory_space<vmem>>, vector<1x128xf32>
      %14 = vector.broadcast %13 : vector<1x128xf32> to vector<16x128xf32>
      %15 = arith.addf %12, %14 : vector<16x128xf32>
      %c0_14 = arith.constant 0 : index
      %c0_15 = arith.constant 0 : index
      %16 = vector.load %arg6[%c0_14, %c0_15] : memref<16x128xbf16, #tpu.memory_space<vmem>>, vector<16x128xbf16>
      %17 = arith.extf %16 : vector<16x128xbf16> to vector<16x128xf32>
      %18 = arith.addf %15, %17 : vector<16x128xf32>
      %19 = arith.truncf %18 : vector<16x128xf32> to vector<16x128xbf16>
      %c0_16 = arith.constant 0 : index
      %c0_17 = arith.constant 0 : index
      %20 = vector.load %arg7[%c0_16, %c0_17] : memref<16x128xbf16, #tpu.memory_space<vmem>>, vector<16x128xbf16>
      tpu.vector_store %arg7[%c0_16, %c0_17], %19 {strides = array<i32>} : memref<16x128xbf16, #tpu.memory_space<vmem>>, vector<16x128xbf16>,
    } else {
    }
    return
  }
  func.func @transform_0(%arg0: i32, %arg1: i32, %arg2: i32) -> (i32, i32) {
    %c0_i32 = arith.constant 0 : i32
    return %arg0, %arg2 : i32, i32
  }
  func.func @transform_1(%arg0: i32, %arg1: i32, %arg2: i32) -> (i32, i32) {
    %c0_i32 = arith.constant 0 : i32
    return %arg2, %arg1 : i32, i32
  }
  func.func @transform_2(%arg0: i32, %arg1: i32, %arg2: i32) -> (i32, i32) {
    %c0_i32 = arith.constant 0 : i32
    %c0_i32_0 = arith.constant 0 : i32
    return %c0_i32, %arg1 : i32, i32
  }
  func.func @transform_3(%arg0: i32, %arg1: i32, %arg2: i32) -> (i32, i32) {
    %c0_i32 = arith.constant 0 : i32
    return %arg0, %arg1 : i32, i32
  }
  func.func @transform_4(%arg0: i32, %arg1: i32, %arg2: i32) -> (i32, i32) {
    %c0_i32 = arith.constant 0 : i32
    return %arg0, %arg1 : i32, i32
  }
}

module attributes {stable_mosaic.version = 11 : i64} {
  func.func @_linear_kernel(%arg0: i32, %arg1: i32, %arg2: i32, %arg3: memref<16x128xbf16, #tpu.memory_space<vmem>>, %arg4: memref<128x128xbf16, #tpu.memory_space<vmem>>, %arg5: memref<1x128xf32, #tpu.memory_space<vmem>>, %arg6: memref<1x128xf32, #tpu.memory_space<vmem>>, %arg7: memref<1x128xf32, #tpu.memory_space<vmem>>, %arg8: memref<16x128xbf16, #tpu.memory_space<vmem>>, %arg9: memref<16x128xf32, #tpu.memory_space<vmem>>) attributes {dimension_semantics = [#tpu.dimension_semantics<parallel>, #tpu.dimension_semantics<parallel>, #tpu.dimension_semantics<arbitrary>], iteration_bounds = array<i64: 1, 1, 1>, scalar_prefetch = 0 : i64, scratch_operands = 1 : i64, tpu.core_type = #tpu.core_type<tc>, window_params = [{transform_indices = @transform_0, window_bounds = array<i64: 16, 128>}, {transform_indices = @transform_1, window_bounds = array<i64: 128, 128>}, {transform_indices = @transform_2, window_bounds = array<i64: 1, 128>}, {transform_indices = @transform_3, window_bounds = array<i64: 1, 128>}, {transform_indices = @transform_4, window_bounds = array<i64: 1, 128>}, {transform_indices = @transform_5, window_bounds = array<i64: 16, 128>}]} {
    %c0_i32 = arith.constant 0 : i32
    %0 = arith.cmpi eq, %arg2, %c0_i32 : i32
    %1 = arith.extui %0 : i1 to i32
    %c0_i32_0 = arith.constant 0 : i32
    %2 = arith.cmpi ne, %1, %c0_i32_0 : i32
    scf.if %2 {
      %cst_19 = arith.constant 0.000000e+00 : f32
      %38 = vector.broadcast %cst_19 : f32 to vector<16x128xf32>
      %c0_20 = arith.constant 0 : index
      %c0_21 = arith.constant 0 : index
      %39 = vector.load %arg9[%c0_20, %c0_21] : memref<16x128xf32, #tpu.memory_space<vmem>>, vector<16x128xf32>
      tpu.vector_store %arg9[%c0_20, %c0_21], %38 {strides = array<i32>} : memref<16x128xf32, #tpu.memory_space<vmem>>, vector<16x128xf32>,
    } else {
    }
    %c0 = arith.constant 0 : index
    %c0_1 = arith.constant 0 : index
    %3 = vector.load %arg3[%c0, %c0_1] : memref<16x128xbf16, #tpu.memory_space<vmem>>, vector<16x128xbf16>
    %4 = arith.extf %3 : vector<16x128xbf16> to vector<16x128xf32>
    %cst = arith.constant dense<0.000000e+00> : vector<16xf32>
    %5 = vector.multi_reduction <add>, %4, %cst [1] : vector<16x128xf32> to vector<16xf32>
    %6 = vector.shape_cast %5 : vector<16xf32> to vector<16x1xf32>
    %cst_2 = arith.constant 3.125000e-02 : f32
    %7 = vector.broadcast %cst_2 : f32 to vector<16x1xf32>
    %8 = arith.mulf %6, %7 : vector<16x1xf32>
    %9 = arith.mulf %4, %4 : vector<16x128xf32>
    %cst_3 = arith.constant dense<0.000000e+00> : vector<16xf32>
    %10 = vector.multi_reduction <add>, %9, %cst_3 [1] : vector<16x128xf32> to vector<16xf32>
    %11 = vector.shape_cast %10 : vector<16xf32> to vector<16x1xf32>
    %cst_4 = arith.constant 3.125000e-02 : f32
    %12 = vector.broadcast %cst_4 : f32 to vector<16x1xf32>
    %13 = arith.mulf %11, %12 : vector<16x1xf32>
    %14 = arith.mulf %8, %8 : vector<16x1xf32>
    %15 = arith.subf %13, %14 : vector<16x1xf32>
    %16 = vector.broadcast %8 : vector<16x1xf32> to vector<16x128xf32>
    %17 = arith.subf %4, %16 : vector<16x128xf32>
    %cst_5 = arith.constant 9.99999974E-6 : f32
    %18 = vector.broadcast %cst_5 : f32 to vector<16x1xf32>
    %19 = arith.addf %15, %18 : vector<16x1xf32>
    %20 = math.rsqrt %19 : vector<16x1xf32>
    %21 = vector.broadcast %20 : vector<16x1xf32> to vector<16x128xf32>
    %22 = arith.mulf %17, %21 : vector<16x128xf32>
    %c0_6 = arith.constant 0 : index
    %c0_7 = arith.constant 0 : index
    %23 = vector.load %arg6[%c0_6, %c0_7] : memref<1x128xf32, #tpu.memory_space<vmem>>, vector<1x128xf32>
    %24 = vector.broadcast %23 : vector<1x128xf32> to vector<16x128xf32>
    %25 = arith.mulf %22, %24 : vector<16x128xf32>
    %c0_8 = arith.constant 0 : index
    %c0_9 = arith.constant 0 : index
    %26 = vector.load %arg7[%c0_8, %c0_9] : memref<1x128xf32, #tpu.memory_space<vmem>>, vector<1x128xf32>
    %27 = vector.broadcast %26 : vector<1x128xf32> to vector<16x128xf32>
    %28 = arith.addf %25, %27 : vector<16x128xf32>
    %29 = arith.truncf %28 : vector<16x128xf32> to vector<16x128xbf16>
    %c0_10 = arith.constant 0 : index
    %c0_11 = arith.constant 0 : index
    %30 = vector.load %arg9[%c0_10, %c0_11] : memref<16x128xf32, #tpu.memory_space<vmem>>, vector<16x128xf32>
    %c0_12 = arith.constant 0 : index
    %c0_13 = arith.constant 0 : index
    %31 = vector.load %arg4[%c0_12, %c0_13] : memref<128x128xbf16, #tpu.memory_space<vmem>>, vector<128x128xbf16>
    %cst_14 = arith.constant dense<0.000000e+00> : vector<16x128xf32>
    %32 = tpu.matmul %29, %31, %cst_14 {dimension_numbers = #tpu.dot_dimension_numbers<[1], [0], [0], [1], [0, 0, 1, 1], [], []>} : vector<16x128xbf16>, vector<128x128xbf16>, vector<16x128xf32> -> vector<16x128xf32>
    %33 = arith.addf %30, %32 : vector<16x128xf32>
    %c0_15 = arith.constant 0 : index
    %c0_16 = arith.constant 0 : index
    %34 = vector.load %arg9[%c0_15, %c0_16] : memref<16x128xf32, #tpu.memory_space<vmem>>, vector<16x128xf32>
    tpu.vector_store %arg9[%c0_15, %c0_16], %33 {strides = array<i32>} : memref<16x128xf32, #tpu.memory_space<vmem>>, vector<16x128xf32>,
    %c0_i32_17 = arith.constant 0 : i32
    %35 = arith.cmpi eq, %arg2, %c0_i32_17 : i32
    %36 = arith.extui %35 : i1 to i32
    %c0_i32_18 = arith.constant 0 : i32
    %37 = arith.cmpi ne, %36, %c0_i32_18 : i32
    scf.if %37 {
      %c0_19 = arith.constant 0 : index
      %c0_20 = arith.constant 0 : index
      %38 = vector.load %arg9[%c0_19, %c0_20] : memref<16x128xf32, #tpu.memory_space<vmem>>, vector<16x128xf32>
      %c0_21 = arith.constant 0 : index
      %c0_22 = arith.constant 0 : index
      %39 = vector.load %arg5[%c0_21, %c0_22] : memref<1x128xf32, #tpu.memory_space<vmem>>, vector<1x128xf32>
      %40 = vector.broadcast %39 : vector<1x128xf32> to vector<16x128xf32>
      %41 = arith.addf %38, %40 : vector<16x128xf32>
      %cst_23 = arith.constant 1.702000e+00 : f32
      %42 = vector.broadcast %cst_23 : f32 to vector<16x128xf32>
      %43 = arith.mulf %42, %41 : vector<16x128xf32>
      %44 = arith.negf %43 : vector<16x128xf32>
      %45 = math.exp %44 : vector<16x128xf32>
      %cst_24 = arith.constant 1.000000e+00 : f32
      %46 = vector.broadcast %cst_24 : f32 to vector<16x128xf32>
      %47 = arith.addf %46, %45 : vector<16x128xf32>
      %48 = arith.divf %46, %47 : vector<16x128xf32>
      %49 = arith.mulf %41, %48 : vector<16x128xf32>
      %50 = arith.truncf %49 : vector<16x128xf32> to vector<16x128xbf16>
      %c0_25 = arith.constant 0 : index
      %c0_26 = arith.constant 0 : index
      %51 = vector.load %arg8[%c0_25, %c0_26] : memref<16x128xbf16, #tpu.memory_space<vmem>>, vector<16x128xbf16>
      tpu.vector_store %arg8[%c0_25, %c0_26], %50 {strides = array<i32>} : memref<16x128xbf16, #tpu.memory_space<vmem>>, vector<16x128xbf16>,
    } else {
    }
    return
  }
  func.func @transform_0(%arg0: i32, %arg1: i32, %arg2: i32) -> (i32, i32) {
    %c0_i32 = arith.constant 0 : i32
    return %arg0, %arg2 : i32, i32
  }
  func.func @transform_1(%arg0: i32, %arg1: i32, %arg2: i32) -> (i32, i32) {
    %c0_i32 = arith.constant 0 : i32
    return %arg2, %arg1 : i32, i32
  }
  func.func @transform_2(%arg0: i32, %arg1: i32, %arg2: i32) -> (i32, i32) {
    %c0_i32 = arith.constant 0 : i32
    %c0_i32_0 = arith.constant 0 : i32
    return %c0_i32, %arg1 : i32, i32
  }
  func.func @transform_3(%arg0: i32, %arg1: i32, %arg2: i32) -> (i32, i32) {
    %c0_i32 = arith.constant 0 : i32
    %c0_i32_0 = arith.constant 0 : i32
    return %c0_i32, %arg2 : i32, i32
  }
  func.func @transform_4(%arg0: i32, %arg1: i32, %arg2: i32) -> (i32, i32) {
    %c0_i32 = arith.constant 0 : i32
    %c0_i32_0 = arith.constant 0 : i32
    return %c0_i32, %arg2 : i32, i32
  }
  func.func @transform_5(%arg0: i32, %arg1: i32, %arg2: i32) -> (i32, i32) {
    %c0_i32 = arith.constant 0 : i32
    return %arg0, %arg1 : i32, i32
  }
}

module attributes {stable_mosaic.version = 11 : i64} {
  func.func @_linear_kernel(%arg0: i32, %arg1: i32, %arg2: i32, %arg3: memref<16x128xbf16, #tpu.memory_space<vmem>>, %arg4: memref<128x128xbf16, #tpu.memory_space<vmem>>, %arg5: memref<1x128xf32, #tpu.memory_space<vmem>>, %arg6: memref<16x128xbf16, #tpu.memory_space<vmem>>, %arg7: memref<16x128xf32, #tpu.memory_space<vmem>>) attributes {dimension_semantics = [#tpu.dimension_semantics<parallel>, #tpu.dimension_semantics<parallel>, #tpu.dimension_semantics<arbitrary>], iteration_bounds = array<i64: 1, 1, 1>, scalar_prefetch = 0 : i64, scratch_operands = 1 : i64, tpu.core_type = #tpu.core_type<tc>, window_params = [{transform_indices = @transform_0, window_bounds = array<i64: 16, 128>}, {transform_indices = @transform_1, window_bounds = array<i64: 128, 128>}, {transform_indices = @transform_2, window_bounds = array<i64: 1, 128>}, {transform_indices = @transform_3, window_bounds = array<i64: 16, 128>}]} {
    %c0_i32 = arith.constant 0 : i32
    %0 = arith.cmpi eq, %arg2, %c0_i32 : i32
    %1 = arith.extui %0 : i1 to i32
    %c0_i32_0 = arith.constant 0 : i32
    %2 = arith.cmpi ne, %1, %c0_i32_0 : i32
    scf.if %2 {
      %cst_10 = arith.constant 0.000000e+00 : f32
      %12 = vector.broadcast %cst_10 : f32 to vector<16x128xf32>
      %c0_11 = arith.constant 0 : index
      %c0_12 = arith.constant 0 : index
      %13 = vector.load %arg7[%c0_11, %c0_12] : memref<16x128xf32, #tpu.memory_space<vmem>>, vector<16x128xf32>
      tpu.vector_store %arg7[%c0_11, %c0_12], %12 {strides = array<i32>} : memref<16x128xf32, #tpu.memory_space<vmem>>, vector<16x128xf32>,
    } else {
    }
    %c0 = arith.constant 0 : index
    %c0_1 = arith.constant 0 : index
    %3 = vector.load %arg3[%c0, %c0_1] : memref<16x128xbf16, #tpu.memory_space<vmem>>, vector<16x128xbf16>
    %c0_2 = arith.constant 0 : index
    %c0_3 = arith.constant 0 : index
    %4 = vector.load %arg7[%c0_2, %c0_3] : memref<16x128xf32, #tpu.memory_space<vmem>>, vector<16x128xf32>
    %c0_4 = arith.constant 0 : index
    %c0_5 = arith.constant 0 : index
    %5 = vector.load %arg4[%c0_4, %c0_5] : memref<128x128xbf16, #tpu.memory_space<vmem>>, vector<128x128xbf16>
    %cst = arith.constant dense<0.000000e+00> : vector<16x128xf32>
    %6 = tpu.matmul %3, %5, %cst {dimension_numbers = #tpu.dot_dimension_numbers<[1], [0], [0], [1], [0, 0, 1, 1], [], []>} : vector<16x128xbf16>, vector<128x128xbf16>, vector<16x128xf32> -> vector<16x128xf32>
    %7 = arith.addf %4, %6 : vector<16x128xf32>
    %c0_6 = arith.constant 0 : index
    %c0_7 = arith.constant 0 : index
    %8 = vector.load %arg7[%c0_6, %c0_7] : memref<16x128xf32, #tpu.memory_space<vmem>>, vector<16x128xf32>
    tpu.vector_store %arg7[%c0_6, %c0_7], %7 {strides = array<i32>} : memref<16x128xf32, #tpu.memory_space<vmem>>, vector<16x128xf32>,
    %c0_i32_8 = arith.constant 0 : i32
    %9 = arith.cmpi eq, %arg2, %c0_i32_8 : i32
    %10 = arith.extui %9 : i1 to i32
    %c0_i32_9 = arith.constant 0 : i32
    %11 = arith.cmpi ne, %10, %c0_i32_9 : i32
    scf.if %11 {
      %c0_10 = arith.constant 0 : index
      %c0_11 = arith.constant 0 : index
      %12 = vector.load %arg7[%c0_10, %c0_11] : memref<16x128xf32, #tpu.memory_space<vmem>>, vector<16x128xf32>
      %c0_12 = arith.constant 0 : index
      %c0_13 = arith.constant 0 : index
      %13 = vector.load %arg5[%c0_12, %c0_13] : memref<1x128xf32, #tpu.memory_space<vmem>>, vector<1x128xf32>
      %14 = vector.broadcast %13 : vector<1x128xf32> to vector<16x128xf32>
      %15 = arith.addf %12, %14 : vector<16x128xf32>
      %16 = arith.truncf %15 : vector<16x128xf32> to vector<16x128xbf16>
      %c0_14 = arith.constant 0 : index
      %c0_15 = arith.constant 0 : index
      %17 = vector.load %arg6[%c0_14, %c0_15] : memref<16x128xbf16, #tpu.memory_space<vmem>>, vector<16x128xbf16>
      tpu.vector_store %arg6[%c0_14, %c0_15], %16 {strides = array<i32>} : memref<16x128xbf16, #tpu.memory_space<vmem>>, vector<16x128xbf16>,
    } else {
    }
    return
  }
  func.func @transform_0(%arg0: i32, %arg1: i32, %arg2: i32) -> (i32, i32) {
    %c0_i32 = arith.constant 0 : i32
    return %arg0, %arg2 : i32, i32
  }
  func.func @transform_1(%arg0: i32, %arg1: i32, %arg2: i32) -> (i32, i32) {
    %c0_i32 = arith.constant 0 : i32
    return %arg2, %arg1 : i32, i32
  }
  func.func @transform_2(%arg0: i32, %arg1: i32, %arg2: i32) -> (i32, i32) {
    %c0_i32 = arith.constant 0 : i32
    %c0_i32_0 = arith.constant 0 : i32
    return %c0_i32, %arg1 : i32, i32
  }
  func.func @transform_3(%arg0: i32, %arg1: i32, %arg2: i32) -> (i32, i32) {
    %c0_i32 = arith.constant 0 : i32
    return %arg0, %arg1 : i32, i32
  }
}

module attributes {stable_mosaic.version = 11 : i64} {
  func.func @_flash_mha_kernel(%arg0: i32, %arg1: i32, %arg2: i32, %arg3: memref<1x1x8x8xbf16, #tpu.memory_space<vmem>>, %arg4: memref<1x1x8x8xbf16, #tpu.memory_space<vmem>>, %arg5: memref<1x1x8x8xbf16, #tpu.memory_space<vmem>>, %arg6: memref<1x1x8xf32, #tpu.memory_space<vmem>>, %arg7: memref<1x1x8x8xbf16, #tpu.memory_space<vmem>>, %arg8: memref<8x1xf32, #tpu.memory_space<vmem>>, %arg9: memref<8x1xf32, #tpu.memory_space<vmem>>, %arg10: memref<8x8xf32, #tpu.memory_space<vmem>>) attributes {dimension_semantics = [#tpu.dimension_semantics<parallel>, #tpu.dimension_semantics<parallel>, #tpu.dimension_semantics<arbitrary>], iteration_bounds = array<i64: 2, 4, 1>, scalar_prefetch = 0 : i64, scratch_operands = 3 : i64, tpu.core_type = #tpu.core_type<tc>, window_params = [{transform_indices = @transform_0, window_bounds = array<i64: 1, 1, 8, 8>}, {transform_indices = @transform_1, window_bounds = array<i64: 1, 1, 8, 8>}, {transform_indices = @transform_2, window_bounds = array<i64: 1, 1, 8, 8>}, {transform_indices = @transform_3, window_bounds = array<i64: 1, 1, 8>}, {transform_indices = @transform_4, window_bounds = array<i64: 1, 1, 8, 8>}]} {
    %c0_i32 = arith.constant 0 : i32
    %0 = arith.cmpi eq, %arg2, %c0_i32 : i32
    %1 = arith.extui %0 : i1 to i32
    %c0_i32_0 = arith.constant 0 : i32
    %2 = arith.cmpi ne, %1, %c0_i32_0 : i32
    scf.if %2 {
      %cst_34 = arith.constant 0xFF800000 : f32
      %50 = vector.broadcast %cst_34 : f32 to vector<8x1xf32>
      %c0_35 = arith.constant 0 : index
      %c0_36 = arith.constant 0 : index
      %51 = vector.load %arg8[%c0_35, %c0_36] : memref<8x1xf32, #tpu.memory_space<vmem>>, vector<8x1xf32>
      tpu.vector_store %arg8[%c0_35, %c0_36], %50 {strides = array<i32>} : memref<8x1xf32, #tpu.memory_space<vmem>>, vector<8x1xf32>,
      %cst_37 = arith.constant 0.000000e+00 : f32
      %52 = vector.broadcast %cst_37 : f32 to vector<8x1xf32>
      %c0_38 = arith.constant 0 : index
      %c0_39 = arith.constant 0 : index
      %53 = vector.load %arg9[%c0_38, %c0_39] : memref<8x1xf32, #tpu.memory_space<vmem>>, vector<8x1xf32>
      tpu.vector_store %arg9[%c0_38, %c0_39], %52 {strides = array<i32>} : memref<8x1xf32, #tpu.memory_space<vmem>>, vector<8x1xf32>,
      %cst_40 = arith.constant 0.000000e+00 : f32
      %54 = vector.broadcast %cst_40 : f32 to vector<8x8xf32>
      %c0_41 = arith.constant 0 : index
      %c0_42 = arith.constant 0 : index
      %55 = vector.load %arg10[%c0_41, %c0_42] : memref<8x8xf32, #tpu.memory_space<vmem>>, vector<8x8xf32>
      tpu.vector_store %arg10[%c0_41, %c0_42], %54 {strides = array<i32>} : memref<8x8xf32, #tpu.memory_space<vmem>>, vector<8x8xf32>,
    } else {
    }
    %c0 = arith.constant 0 : index
    %c0_1 = arith.constant 0 : index
    %c0_2 = arith.constant 0 : index
    %c0_3 = arith.constant 0 : index
    %3 = vector.load %arg3[%c0, %c0_1, %c0_2, %c0_3] : memref<1x1x8x8xbf16, #tpu.memory_space<vmem>>, vector<1x1x8x8xbf16>
    %4 = vector.shape_cast %3 : vector<1x1x8x8xbf16> to vector<8x8xbf16>
    %c0_4 = arith.constant 0 : index
    %c0_5 = arith.constant 0 : index
    %c0_6 = arith.constant 0 : index
    %c0_7 = arith.constant 0 : index
    %5 = vector.load %arg4[%c0_4, %c0_5, %c0_6, %c0_7] : memref<1x1x8x8xbf16, #tpu.memory_space<vmem>>, vector<1x1x8x8xbf16>
    %6 = vector.shape_cast %5 : vector<1x1x8x8xbf16> to vector<8x8xbf16>
    %c0_8 = arith.constant 0 : index
    %c0_9 = arith.constant 0 : index
    %c0_10 = arith.constant 0 : index
    %c0_11 = arith.constant 0 : index
    %7 = vector.load %arg5[%c0_8, %c0_9, %c0_10, %c0_11] : memref<1x1x8x8xbf16, #tpu.memory_space<vmem>>, vector<1x1x8x8xbf16>
    %8 = vector.shape_cast %7 : vector<1x1x8x8xbf16> to vector<8x8xbf16>
    %cst = arith.constant dense<0.000000e+00> : vector<8x8xf32>
    %9 = tpu.matmul %4, %6, %cst {dimension_numbers = #tpu.dot_dimension_numbers<[1], [1], [0], [0], [0, 0, 1, 0], [], []>} : vector<8x8xbf16>, vector<8x8xbf16>, vector<8x8xf32> -> vector<8x8xf32>
    %cst_12 = arith.constant 0.353553385 : f32
    %10 = vector.broadcast %cst_12 : f32 to vector<8x8xf32>
    %11 = arith.mulf %9, %10 : vector<8x8xf32>
    %12 = tpu.iota {dimensions = array<i32: 0>} : vector<8x8xi32>
    %13 = tpu.iota {dimensions = array<i32: 1>} : vector<8x8xi32>
    %c8_i32 = arith.constant 8 : i32
    %14 = arith.muli %arg2, %c8_i32 : i32
    %15 = vector.broadcast %14 : i32 to vector<8x8xi32>
    %16 = arith.addi %13, %15 : vector<8x8xi32>
    %17 = arith.cmpi sle, %16, %12 : vector<8x8xi32>
    %cst_13 = arith.constant -1.000000e+09 : f32
    %18 = vector.broadcast %cst_13 : f32 to vector<8x8xf32>
    %19 = arith.select %17, %11, %18 : vector<8x8xi1>, vector<8x8xf32>
    %c0_14 = arith.constant 0 : index
    %c0_15 = arith.constant 0 : index
    %c0_16 = arith.constant 0 : index
    %20 = vector.load %arg6[%c0_14, %c0_15, %c0_16] : memref<1x1x8xf32, #tpu.memory_space<vmem>>, vector<1x1x8xf32>
    %21 = vector.shape_cast %20 : vector<1x1x8xf32> to vector<1x8xf32>
    %22 = vector.broadcast %21 : vector<1x8xf32> to vector<8x8xf32>
    %23 = arith.addf %19, %22 : vector<8x8xf32>
    %c0_17 = arith.constant 0 : index
    %c0_18 = arith.constant 0 : index
    %24 = vector.load %arg8[%c0_17, %c0_18] : memref<8x1xf32, #tpu.memory_space<vmem>>, vector<8x1xf32>
    %cst_19 = arith.constant dense<0xFF800000> : vector<8xf32>
    %25 = vector.multi_reduction <maximumf>, %23, %cst_19 [1] : vector<8x8xf32> to vector<8xf32>
    %26 = vector.shape_cast %25 : vector<8xf32> to vector<8x1xf32>
    %27 = arith.maximumf %24, %26 : vector<8x1xf32>
    %28 = arith.subf %24, %27 : vector<8x1xf32>
    %29 = math.exp %28 : vector<8x1xf32>
    %30 = vector.broadcast %27 : vector<8x1xf32> to vector<8x8xf32>
    %31 = arith.subf %23, %30 : vector<8x8xf32>
    %32 = math.exp %31 : vector<8x8xf32>
    %c0_20 = arith.constant 0 : index
    %c0_21 = arith.constant 0 : index
    %33 = vector.load %arg9[%c0_20, %c0_21] : memref<8x1xf32, #tpu.memory_space<vmem>>, vector<8x1xf32>
    %34 = arith.mulf %29, %33 : vector<8x1xf32>
    %cst_22 = arith.constant dense<0.000000e+00> : vector<8xf32>
    %35 = vector.multi_reduction <add>, %32, %cst_22 [1] : vector<8x8xf32> to vector<8xf32>
    %36 = vector.shape_cast %35 : vector<8xf32> to vector<8x1xf32>
    %37 = arith.addf %34, %36 : vector<8x1xf32>
    %c0_23 = arith.constant 0 : index
    %c0_24 = arith.constant 0 : index
    %38 = vector.load %arg9[%c0_23, %c0_24] : memref<8x1xf32, #tpu.memory_space<vmem>>, vector<8x1xf32>
    tpu.vector_store %arg9[%c0_23, %c0_24], %37 {strides = array<i32>} : memref<8x1xf32, #tpu.memory_space<vmem>>, vector<8x1xf32>,
    %c0_25 = arith.constant 0 : index
    %c0_26 = arith.constant 0 : index
    %39 = vector.load %arg10[%c0_25, %c0_26] : memref<8x8xf32, #tpu.memory_space<vmem>>, vector<8x8xf32>
    %40 = vector.broadcast %29 : vector<8x1xf32> to vector<8x8xf32>
    %41 = arith.mulf %40, %39 : vector<8x8xf32>
    %42 = arith.truncf %32 : vector<8x8xf32> to vector<8x8xbf16>
    %cst_27 = arith.constant dense<0.000000e+00> : vector<8x8xf32>
    %43 = tpu.matmul %42, %8, %cst_27 {dimension_numbers = #tpu.dot_dimension_numbers<[1], [0], [0], [1], [0, 0, 1, 1], [], []>} : vector<8x8xbf16>, vector<8x8xbf16>, vector<8x8xf32> -> vector<8x8xf32>
    %44 = arith.addf %41, %43 : vector<8x8xf32>
    %c0_28 = arith.constant 0 : index
    %c0_29 = arith.constant 0 : index
    %45 = vector.load %arg10[%c0_28, %c0_29] : memref<8x8xf32, #tpu.memory_space<vmem>>, vector<8x8xf32>
    tpu.vector_store %arg10[%c0_28, %c0_29], %44 {strides = array<i32>} : memref<8x8xf32, #tpu.memory_space<vmem>>, vector<8x8xf32>,
    %c0_30 = arith.constant 0 : index
    %c0_31 = arith.constant 0 : index
    %46 = vector.load %arg8[%c0_30, %c0_31] : memref<8x1xf32, #tpu.memory_space<vmem>>, vector<8x1xf32>
    tpu.vector_store %arg8[%c0_30, %c0_31], %27 {strides = array<i32>} : memref<8x1xf32, #tpu.memory_space<vmem>>, vector<8x1xf32>,
    %c0_i32_32 = arith.constant 0 : i32
    %47 = arith.cmpi eq, %arg2, %c0_i32_32 : i32
    %48 = arith.extui %47 : i1 to i32
    %c0_i32_33 = arith.constant 0 : i32
    %49 = arith.cmpi ne, %48, %c0_i32_33 : i32
    scf.if %49 {
      %c0_34 = arith.constant 0 : index
      %c0_35 = arith.constant 0 : index
      %50 = vector.load %arg10[%c0_34, %c0_35] : memref<8x8xf32, #tpu.memory_space<vmem>>, vector<8x8xf32>
      %c0_36 = arith.constant 0 : index
      %c0_37 = arith.constant 0 : index
      %51 = vector.load %arg9[%c0_36, %c0_37] : memref<8x1xf32, #tpu.memory_space<vmem>>, vector<8x1xf32>
      %52 = tpu.reciprocal %51 {approx = true} : vector<8x1xf32> -> vector<8x1xf32>
      %53 = vector.broadcast %52 : vector<8x1xf32> to vector<8x8xf32>
      %54 = arith.mulf %50, %53 : vector<8x8xf32>
      %55 = arith.truncf %54 : vector<8x8xf32> to vector<8x8xbf16>
      %c0_38 = arith.constant 0 : index
      %c0_39 = arith.constant 0 : index
      %c0_40 = arith.constant 0 : index
      %c0_41 = arith.constant 0 : index
      %56 = vector.load %arg7[%c0_38, %c0_39, %c0_40, %c0_41] : memref<1x1x8x8xbf16, #tpu.memory_space<vmem>>, vector<1x1x8x8xbf16>
      %57 = vector.shape_cast %56 : vector<1x1x8x8xbf16> to vector<8x8xbf16>
      %58 = vector.shape_cast %55 : vector<8x8xbf16> to vector<1x1x8x8xbf16>
      tpu.vector_store %arg7[%c0_38, %c0_39, %c0_40, %c0_41], %58 {strides = array<i32>} : memref<1x1x8x8xbf16, #tpu.memory_space<vmem>>, vector<1x1x8x8xbf16>,
    } else {
    }
    return
  }
  func.func @transform_0(%arg0: i32, %arg1: i32, %arg2: i32) -> (i32, i32, i32, i32) {
    %c0_i32 = arith.constant 0 : i32
    %c0_i32_0 = arith.constant 0 : i32
    %c0_i32_1 = arith.constant 0 : i32
    return %arg0, %arg1, %c0_i32, %c0_i32_0 : i32, i32, i32, i32
  }
  func.func @transform_1(%arg0: i32, %arg1: i32, %arg2: i32) -> (i32, i32, i32, i32) {
    %c0_i32 = arith.constant 0 : i32
    %c0_i32_0 = arith.constant 0 : i32
    return %arg0, %arg1, %arg2, %c0_i32 : i32, i32, i32, i32
  }
  func.func @transform_2(%arg0: i32, %arg1: i32, %arg2: i32) -> (i32, i32, i32, i32) {
    %c0_i32 = arith.constant 0 : i32
    %c0_i32_0 = arith.constant 0 : i32
    return %arg0, %arg1, %arg2, %c0_i32 : i32, i32, i32, i32
  }
  func.func @transform_3(%arg0: i32, %arg1: i32, %arg2: i32) -> (i32, i32, i32) {
    %c0_i32 = arith.constant 0 : i32
    %c0_i32_0 = arith.constant 0 : i32
    return %arg0, %c0_i32, %arg2 : i32, i32, i32
  }
  func.func @transform_4(%arg0: i32, %arg1: i32, %arg2: i32) -> (i32, i32, i32, i32) {
    %c0_i32 = arith.constant 0 : i32
    %c0_i32_0 = arith.constant 0 : i32
    %c0_i32_1 = arith.constant 0 : i32
    return %arg0, %arg1, %c0_i32, %c0_i32_0 : i32, i32, i32, i32
  }
}

module attributes {stable_mosaic.version = 11 : i64} {
  func.func @_flash_mha_kernel(%arg0: i32, %arg1: i32, %arg2: i32, %arg3: memref<1x1x8x8xbf16, #tpu.memory_space<vmem>>, %arg4: memref<1x1x5x8xbf16, #tpu.memory_space<vmem>>, %arg5: memref<1x1x5x8xbf16, #tpu.memory_space<vmem>>, %arg6: memref<1x1x8x8xbf16, #tpu.memory_space<vmem>>, %arg7: memref<8x1xf32, #tpu.memory_space<vmem>>, %arg8: memref<8x1xf32, #tpu.memory_space<vmem>>, %arg9: memref<8x8xf32, #tpu.memory_space<vmem>>) attributes {dimension_semantics = [#tpu.dimension_semantics<parallel>, #tpu.dimension_semantics<parallel>, #tpu.dimension_semantics<arbitrary>], iteration_bounds = array<i64: 2, 4, 1>, scalar_prefetch = 0 : i64, scratch_operands = 3 : i64, tpu.core_type = #tpu.core_type<tc>, window_params = [{transform_indices = @transform_0, window_bounds = array<i64: 1, 1, 8, 8>}, {transform_indices = @transform_1, window_bounds = array<i64: 1, 1, 5, 8>}, {transform_indices = @transform_2, window_bounds = array<i64: 1, 1, 5, 8>}, {transform_indices = @transform_3, window_bounds = array<i64: 1, 1, 8, 8>}]} {
    %c0_i32 = arith.constant 0 : i32
    %0 = arith.cmpi eq, %arg2, %c0_i32 : i32
    %1 = arith.extui %0 : i1 to i32
    %c0_i32_0 = arith.constant 0 : i32
    %2 = arith.cmpi ne, %1, %c0_i32_0 : i32
    scf.if %2 {
      %cst_30 = arith.constant 0xFF800000 : f32
      %38 = vector.broadcast %cst_30 : f32 to vector<8x1xf32>
      %c0_31 = arith.constant 0 : index
      %c0_32 = arith.constant 0 : index
      %39 = vector.load %arg7[%c0_31, %c0_32] : memref<8x1xf32, #tpu.memory_space<vmem>>, vector<8x1xf32>
      tpu.vector_store %arg7[%c0_31, %c0_32], %38 {strides = array<i32>} : memref<8x1xf32, #tpu.memory_space<vmem>>, vector<8x1xf32>,
      %cst_33 = arith.constant 0.000000e+00 : f32
      %40 = vector.broadcast %cst_33 : f32 to vector<8x1xf32>
      %c0_34 = arith.constant 0 : index
      %c0_35 = arith.constant 0 : index
      %41 = vector.load %arg8[%c0_34, %c0_35] : memref<8x1xf32, #tpu.memory_space<vmem>>, vector<8x1xf32>
      tpu.vector_store %arg8[%c0_34, %c0_35], %40 {strides = array<i32>} : memref<8x1xf32, #tpu.memory_space<vmem>>, vector<8x1xf32>,
      %cst_36 = arith.constant 0.000000e+00 : f32
      %42 = vector.broadcast %cst_36 : f32 to vector<8x8xf32>
      %c0_37 = arith.constant 0 : index
      %c0_38 = arith.constant 0 : index
      %43 = vector.load %arg9[%c0_37, %c0_38] : memref<8x8xf32, #tpu.memory_space<vmem>>, vector<8x8xf32>
      tpu.vector_store %arg9[%c0_37, %c0_38], %42 {strides = array<i32>} : memref<8x8xf32, #tpu.memory_space<vmem>>, vector<8x8xf32>,
    } else {
    }
    %c0 = arith.constant 0 : index
    %c0_1 = arith.constant 0 : index
    %c0_2 = arith.constant 0 : index
    %c0_3 = arith.constant 0 : index
    %3 = vector.load %arg3[%c0, %c0_1, %c0_2, %c0_3] : memref<1x1x8x8xbf16, #tpu.memory_space<vmem>>, vector<1x1x8x8xbf16>
    %4 = vector.shape_cast %3 : vector<1x1x8x8xbf16> to vector<8x8xbf16>
    %c0_4 = arith.constant 0 : index
    %c0_5 = arith.constant 0 : index
    %c0_6 = arith.constant 0 : index
    %c0_7 = arith.constant 0 : index
    %5 = vector.load %arg4[%c0_4, %c0_5, %c0_6, %c0_7] : memref<1x1x5x8xbf16, #tpu.memory_space<vmem>>, vector<1x1x5x8xbf16>
    %6 = vector.shape_cast %5 : vector<1x1x5x8xbf16> to vector<5x8xbf16>
    %c0_8 = arith.constant 0 : index
    %c0_9 = arith.constant 0 : index
    %c0_10 = arith.constant 0 : index
    %c0_11 = arith.constant 0 : index
    %7 = vector.load %arg5[%c0_8, %c0_9, %c0_10, %c0_11] : memref<1x1x5x8xbf16, #tpu.memory_space<vmem>>, vector<1x1x5x8xbf16>
    %8 = vector.shape_cast %7 : vector<1x1x5x8xbf16> to vector<5x8xbf16>
    %cst = arith.constant dense<0.000000e+00> : vector<8x5xf32>
    %9 = tpu.matmul %4, %6, %cst {dimension_numbers = #tpu.dot_dimension_numbers<[1], [1], [0], [0], [0, 0, 1, 0], [], []>} : vector<8x8xbf16>, vector<5x8xbf16>, vector<8x5xf32> -> vector<8x5xf32>
    %cst_12 = arith.constant 0.353553385 : f32
    %10 = vector.broadcast %cst_12 : f32 to vector<8x5xf32>
    %11 = arith.mulf %9, %10 : vector<8x5xf32>
    %c0_13 = arith.constant 0 : index
    %c0_14 = arith.constant 0 : index
    %12 = vector.load %arg7[%c0_13, %c0_14] : memref<8x1xf32, #tpu.memory_space<vmem>>, vector<8x1xf32>
    %cst_15 = arith.constant dense<0xFF800000> : vector<8xf32>
    %13 = vector.multi_reduction <maximumf>, %11, %cst_15 [1] : vector<8x5xf32> to vector<8xf32>
    %14 = vector.shape_cast %13 : vector<8xf32> to vector<8x1xf32>
    %15 = arith.maximumf %12, %14 : vector<8x1xf32>
    %16 = arith.subf %12, %15 : vector<8x1xf32>
    %17 = math.exp %16 : vector<8x1xf32>
    %18 = vector.broadcast %15 : vector<8x1xf32> to vector<8x5xf32>
    %19 = arith.subf %11, %18 : vector<8x5xf32>
    %20 = math.exp %19 : vector<8x5xf32>
    %c0_16 = arith.constant 0 : index
    %c0_17 = arith.constant 0 : index
    %21 = vector.load %arg8[%c0_16, %c0_17] : memref<8x1xf32, #tpu.memory_space<vmem>>, vector<8x1xf32>
    %22 = arith.mulf %17, %21 : vector<8x1xf32>
    %cst_18 = arith.constant dense<0.000000e+00> : vector<8xf32>
    %23 = vector.multi_reduction <add>, %20, %cst_18 [1] : vector<8x5xf32> to vector<8xf32>
    %24 = vector.shape_cast %23 : vector<8xf32> to vector<8x1xf32>
    %25 = arith.addf %22, %24 : vector<8x1xf32>
    %c0_19 = arith.constant 0 : index
    %c0_20 = arith.constant 0 : index
    %26 = vector.load %arg8[%c0_19, %c0_20] : memref<8x1xf32, #tpu.memory_space<vmem>>, vector<8x1xf32>
    tpu.vector_store %arg8[%c0_19, %c0_20], %25 {strides = array<i32>} : memref<8x1xf32, #tpu.memory_space<vmem>>, vector<8x1xf32>,
    %c0_21 = arith.constant 0 : index
    %c0_22 = arith.constant 0 : index
    %27 = vector.load %arg9[%c0_21, %c0_22] : memref<8x8xf32, #tpu.memory_space<vmem>>, vector<8x8xf32>
    %28 = vector.broadcast %17 : vector<8x1xf32> to vector<8x8xf32>
    %29 = arith.mulf %28, %27 : vector<8x8xf32>
    %30 = arith.truncf %20 : vector<8x5xf32> to vector<8x5xbf16>
    %cst_23 = arith.constant dense<0.000000e+00> : vector<8x8xf32>
    %31 = tpu.matmul %30, %8, %cst_23 {dimension_numbers = #tpu.dot_dimension_numbers<[1], [0], [0], [1], [0, 0, 1, 1], [], []>} : vector<8x5xbf16>, vector<5x8xbf16>, vector<8x8xf32> -> vector<8x8xf32>
    %32 = arith.addf %29, %31 : vector<8x8xf32>
    %c0_24 = arith.constant 0 : index
    %c0_25 = arith.constant 0 : index
    %33 = vector.load %arg9[%c0_24, %c0_25] : memref<8x8xf32, #tpu.memory_space<vmem>>, vector<8x8xf32>
    tpu.vector_store %arg9[%c0_24, %c0_25], %32 {strides = array<i32>} : memref<8x8xf32, #tpu.memory_space<vmem>>, vector<8x8xf32>,
    %c0_26 = arith.constant 0 : index
    %c0_27 = arith.constant 0 : index
    %34 = vector.load %arg7[%c0_26, %c0_27] : memref<8x1xf32, #tpu.memory_space<vmem>>, vector<8x1xf32>
    tpu.vector_store %arg7[%c0_26, %c0_27], %15 {strides = array<i32>} : memref<8x1xf32, #tpu.memory_space<vmem>>, vector<8x1xf32>,
    %c0_i32_28 = arith.constant 0 : i32
    %35 = arith.cmpi eq, %arg2, %c0_i32_28 : i32
    %36 = arith.extui %35 : i1 to i32
    %c0_i32_29 = arith.constant 0 : i32
    %37 = arith.cmpi ne, %36, %c0_i32_29 : i32
    scf.if %37 {
      %c0_30 = arith.constant 0 : index
      %c0_31 = arith.constant 0 : index
      %38 = vector.load %arg9[%c0_30, %c0_31] : memref<8x8xf32, #tpu.memory_space<vmem>>, vector<8x8xf32>
      %c0_32 = arith.constant 0 : index
      %c0_33 = arith.constant 0 : index
      %39 = vector.load %arg8[%c0_32, %c0_33] : memref<8x1xf32, #tpu.memory_space<vmem>>, vector<8x1xf32>
      %40 = tpu.reciprocal %39 {approx = true} : vector<8x1xf32> -> vector<8x1xf32>
      %41 = vector.broadcast %40 : vector<8x1xf32> to vector<8x8xf32>
      %42 = arith.mulf %38, %41 : vector<8x8xf32>
      %43 = arith.truncf %42 : vector<8x8xf32> to vector<8x8xbf16>
      %c0_34 = arith.constant 0 : index
      %c0_35 = arith.constant 0 : index
      %c0_36 = arith.constant 0 : index
      %c0_37 = arith.constant 0 : index
      %44 = vector.load %arg6[%c0_34, %c0_35, %c0_36, %c0_37] : memref<1x1x8x8xbf16, #tpu.memory_space<vmem>>, vector<1x1x8x8xbf16>
      %45 = vector.shape_cast %44 : vector<1x1x8x8xbf16> to vector<8x8xbf16>
      %46 = vector.shape_cast %43 : vector<8x8xbf16> to vector<1x1x8x8xbf16>
      tpu.vector_store %arg6[%c0_34, %c0_35, %c0_36, %c0_37], %46 {strides = array<i32>} : memref<1x1x8x8xbf16, #tpu.memory_space<vmem>>, vector<1x1x8x8xbf16>,
    } else {
    }
    return
  }
  func.func @transform_0(%arg0: i32, %arg1: i32, %arg2: i32) -> (i32, i32, i32, i32) {
    %c0_i32 = arith.constant 0 : i32
    %c0_i32_0 = arith.constant 0 : i32
    %c0_i32_1 = arith.constant 0 : i32
    return %arg0, %arg1, %c0_i32, %c0_i32_0 : i32, i32, i32, i32
  }
  func.func @transform_1(%arg0: i32, %arg1: i32, %arg2: i32) -> (i32, i32, i32, i32) {
    %c0_i32 = arith.constant 0 : i32
    %c0_i32_0 = arith.constant 0 : i32
    return %arg0, %arg1, %arg2, %c0_i32 : i32, i32, i32, i32
  }
  func.func @transform_2(%arg0: i32, %arg1: i32, %arg2: i32) -> (i32, i32, i32, i32) {
    %c0_i32 = arith.constant 0 : i32
    %c0_i32_0 = arith.constant 0 : i32
    return %arg0, %arg1, %arg2, %c0_i32 : i32, i32, i32, i32
  }
  func.func @transform_3(%arg0: i32, %arg1: i32, %arg2: i32) -> (i32, i32, i32, i32) {
    %c0_i32 = arith.constant 0 : i32
    %c0_i32_0 = arith.constant 0 : i32
    %c0_i32_1 = arith.constant 0 : i32
    return %arg0, %arg1, %c0_i32, %c0_i32_0 : i32, i32, i32, i32
  }
}

module attributes {stable_mosaic.version = 11 : i64} {
  func.func @_linear_kernel(%arg0: i32, %arg1: i32, %arg2: i32, %arg3: memref<16x128xbf16, #tpu.memory_space<vmem>>, %arg4: memref<128x128xbf16, #tpu.memory_space<vmem>>, %arg5: memref<1x128xf32, #tpu.memory_space<vmem>>, %arg6: memref<1x128xf32, #tpu.memory_space<vmem>>, %arg7: memref<1x128xf32, #tpu.memory_space<vmem>>, %arg8: memref<16x128xbf16, #tpu.memory_space<vmem>>, %arg9: memref<16x128xf32, #tpu.memory_space<vmem>>) attributes {dimension_semantics = [#tpu.dimension_semantics<parallel>, #tpu.dimension_semantics<parallel>, #tpu.dimension_semantics<arbitrary>], iteration_bounds = array<i64: 1, 1, 1>, scalar_prefetch = 0 : i64, scratch_operands = 1 : i64, tpu.core_type = #tpu.core_type<tc>, window_params = [{transform_indices = @transform_0, window_bounds = array<i64: 16, 128>}, {transform_indices = @transform_1, window_bounds = array<i64: 128, 128>}, {transform_indices = @transform_2, window_bounds = array<i64: 1, 128>}, {transform_indices = @transform_3, window_bounds = array<i64: 1, 128>}, {transform_indices = @transform_4, window_bounds = array<i64: 1, 128>}, {transform_indices = @transform_5, window_bounds = array<i64: 16, 128>}]} {
    %c0_i32 = arith.constant 0 : i32
    %0 = arith.cmpi eq, %arg2, %c0_i32 : i32
    %1 = arith.extui %0 : i1 to i32
    %c0_i32_0 = arith.constant 0 : i32
    %2 = arith.cmpi ne, %1, %c0_i32_0 : i32
    scf.if %2 {
      %cst_19 = arith.constant 0.000000e+00 : f32
      %38 = vector.broadcast %cst_19 : f32 to vector<16x128xf32>
      %c0_20 = arith.constant 0 : index
      %c0_21 = arith.constant 0 : index
      %39 = vector.load %arg9[%c0_20, %c0_21] : memref<16x128xf32, #tpu.memory_space<vmem>>, vector<16x128xf32>
      tpu.vector_store %arg9[%c0_20, %c0_21], %38 {strides = array<i32>} : memref<16x128xf32, #tpu.memory_space<vmem>>, vector<16x128xf32>,
    } else {
    }
    %c0 = arith.constant 0 : index
    %c0_1 = arith.constant 0 : index
    %3 = vector.load %arg3[%c0, %c0_1] : memref<16x128xbf16, #tpu.memory_space<vmem>>, vector<16x128xbf16>
    %4 = arith.extf %3 : vector<16x128xbf16> to vector<16x128xf32>
    %cst = arith.constant dense<0.000000e+00> : vector<16xf32>
    %5 = vector.multi_reduction <add>, %4, %cst [1] : vector<16x128xf32> to vector<16xf32>
    %6 = vector.shape_cast %5 : vector<16xf32> to vector<16x1xf32>
    %cst_2 = arith.constant 3.125000e-02 : f32
    %7 = vector.broadcast %cst_2 : f32 to vector<16x1xf32>
    %8 = arith.mulf %6, %7 : vector<16x1xf32>
    %9 = arith.mulf %4, %4 : vector<16x128xf32>
    %cst_3 = arith.constant dense<0.000000e+00> : vector<16xf32>
    %10 = vector.multi_reduction <add>, %9, %cst_3 [1] : vector<16x128xf32> to vector<16xf32>
    %11 = vector.shape_cast %10 : vector<16xf32> to vector<16x1xf32>
    %cst_4 = arith.constant 3.125000e-02 : f32
    %12 = vector.broadcast %cst_4 : f32 to vector<16x1xf32>
    %13 = arith.mulf %11, %12 : vector<16x1xf32>
    %14 = arith.mulf %8, %8 : vector<16x1xf32>
    %15 = arith.subf %13, %14 : vector<16x1xf32>
    %16 = vector.broadcast %8 : vector<16x1xf32> to vector<16x128xf32>
    %17 = arith.subf %4, %16 : vector<16x128xf32>
    %cst_5 = arith.constant 9.99999974E-6 : f32
    %18 = vector.broadcast %cst_5 : f32 to vector<16x1xf32>
    %19 = arith.addf %15, %18 : vector<16x1xf32>
    %20 = math.rsqrt %19 : vector<16x1xf32>
    %21 = vector.broadcast %20 : vector<16x1xf32> to vector<16x128xf32>
    %22 = arith.mulf %17, %21 : vector<16x128xf32>
    %c0_6 = arith.constant 0 : index
    %c0_7 = arith.constant 0 : index
    %23 = vector.load %arg6[%c0_6, %c0_7] : memref<1x128xf32, #tpu.memory_space<vmem>>, vector<1x128xf32>
    %24 = vector.broadcast %23 : vector<1x128xf32> to vector<16x128xf32>
    %25 = arith.mulf %22, %24 : vector<16x128xf32>
    %c0_8 = arith.constant 0 : index
    %c0_9 = arith.constant 0 : index
    %26 = vector.load %arg7[%c0_8, %c0_9] : memref<1x128xf32, #tpu.memory_space<vmem>>, vector<1x128xf32>
    %27 = vector.broadcast %26 : vector<1x128xf32> to vector<16x128xf32>
    %28 = arith.addf %25, %27 : vector<16x128xf32>
    %29 = arith.truncf %28 : vector<16x128xf32> to vector<16x128xbf16>
    %c0_10 = arith.constant 0 : index
    %c0_11 = arith.constant 0 : index
    %30 = vector.load %arg9[%c0_10, %c0_11] : memref<16x128xf32, #tpu.memory_space<vmem>>, vector<16x128xf32>
    %c0_12 = arith.constant 0 : index
    %c0_13 = arith.constant 0 : index
    %31 = vector.load %arg4[%c0_12, %c0_13] : memref<128x128xbf16, #tpu.memory_space<vmem>>, vector<128x128xbf16>
    %cst_14 = arith.constant dense<0.000000e+00> : vector<16x128xf32>
    %32 = tpu.matmul %29, %31, %cst_14 {dimension_numbers = #tpu.dot_dimension_numbers<[1], [0], [0], [1], [0, 0, 1, 1], [], []>} : vector<16x128xbf16>, vector<128x128xbf16>, vector<16x128xf32> -> vector<16x128xf32>
    %33 = arith.addf %30, %32 : vector<16x128xf32>
    %c0_15 = arith.constant 0 : index
    %c0_16 = arith.constant 0 : index
    %34 = vector.load %arg9[%c0_15, %c0_16] : memref<16x128xf32, #tpu.memory_space<vmem>>, vector<16x128xf32>
    tpu.vector_store %arg9[%c0_15, %c0_16], %33 {strides = array<i32>} : memref<16x128xf32, #tpu.memory_space<vmem>>, vector<16x128xf32>,
    %c0_i32_17 = arith.constant 0 : i32
    %35 = arith.cmpi eq, %arg2, %c0_i32_17 : i32
    %36 = arith.extui %35 : i1 to i32
    %c0_i32_18 = arith.constant 0 : i32
    %37 = arith.cmpi ne, %36, %c0_i32_18 : i32
    scf.if %37 {
      %c0_19 = arith.constant 0 : index
      %c0_20 = arith.constant 0 : index
      %38 = vector.load %arg9[%c0_19, %c0_20] : memref<16x128xf32, #tpu.memory_space<vmem>>, vector<16x128xf32>
      %c0_21 = arith.constant 0 : index
      %c0_22 = arith.constant 0 : index
      %39 = vector.load %arg5[%c0_21, %c0_22] : memref<1x128xf32, #tpu.memory_space<vmem>>, vector<1x128xf32>
      %40 = vector.broadcast %39 : vector<1x128xf32> to vector<16x128xf32>
      %41 = arith.addf %38, %40 : vector<16x128xf32>
      %cst_23 = arith.constant 5.000000e-01 : f32
      %42 = vector.broadcast %cst_23 : f32 to vector<16x128xf32>
      %43 = arith.mulf %42, %41 : vector<16x128xf32>
      %cst_24 = arith.constant 4.471500e-02 : f32
      %44 = vector.broadcast %cst_24 : f32 to vector<16x128xf32>
      %45 = arith.mulf %44, %41 : vector<16x128xf32>
      %46 = arith.mulf %45, %41 : vector<16x128xf32>
      %47 = arith.mulf %46, %41 : vector<16x128xf32>
      %48 = arith.addf %41, %47 : vector<16x128xf32>
      %cst_25 = arith.constant 0.797884583 : f32
      %49 = vector.broadcast %cst_25 : f32 to vector<16x128xf32>
      %50 = arith.mulf %49, %48 : vector<16x128xf32>
      %51 = math.tanh %50 : vector<16x128xf32>
      %cst_26 = arith.constant 1.000000e+00 : f32
      %52 = vector.broadcast %cst_26 : f32 to vector<16x128xf32>
      %53 = arith.addf %52, %51 : vector<16x128xf32>
      %54 = arith.mulf %43, %53 : vector<16x128xf32>
      %55 = arith.truncf %54 : vector<16x128xf32> to vector<16x128xbf16>
      %c0_27 = arith.constant 0 : index
      %c0_28 = arith.constant 0 : index
      %56 = vector.load %arg8[%c0_27, %c0_28] : memref<16x128xbf16, #tpu.memory_space<vmem>>, vector<16x128xbf16>
      tpu.vector_store %arg8[%c0_27, %c0_28], %55 {strides = array<i32>} : memref<16x128xbf16, #tpu.memory_space<vmem>>, vector<16x128xbf16>,
    } else {
    }
    return
  }
  func.func @transform_0(%arg0: i32, %arg1: i32, %arg2: i32) -> (i32, i32) {
    %c0_i32 = arith.constant 0 : i32
    return %arg0, %arg2 : i32, i32
  }
  func.func @transform_1(%arg0: i32, %arg1: i32, %arg2: i32) -> (i32, i32) {
    %c0_i32 = arith.constant 0 : i32
    return %arg2, %arg1 : i32, i32
  }
  func.func @transform_2(%arg0: i32, %arg1: i32, %arg2: i32) -> (i32, i32) {
    %c0_i32 = arith.constant 0 : i32
    %c0_i32_0 = arith.constant 0 : i32
    return %c0_i32, %arg1 : i32, i32
  }
  func.func @transform_3(%arg0: i32, %arg1: i32, %arg2: i32) -> (i32, i32) {
    %c0_i32 = arith.constant 0 : i32
    %c0_i32_0 = arith.constant 0 : i32
    return %c0_i32, %arg2 : i32, i32
  }
  func.func @transform_4(%arg0: i32, %arg1: i32, %arg2: i32) -> (i32, i32) {
    %c0_i32 = arith.constant 0 : i32
    %c0_i32_0 = arith.constant 0 : i32
    return %c0_i32, %arg2 : i32, i32
  }
  func.func @transform_5(%arg0: i32, %arg1: i32, %arg2: i32) -> (i32, i32) {
    %c0_i32 = arith.constant 0 : i32
    return %arg0, %arg1 : i32, i32
  }
}

module attributes {stable_mosaic.version = 11 : i64} {
  func.func @_linear_kernel(%arg0: i32, %arg1: i32, %arg2: i32, %arg3: memref<16x128xbf16, #tpu.memory_space<vmem>>, %arg4: memref<128x128xbf16, #tpu.memory_space<vmem>>, %arg5: memref<1x128xf32, #tpu.memory_space<vmem>>, %arg6: memref<16x128xbf16, #tpu.memory_space<vmem>>, %arg7: memref<16x128xf32, #tpu.memory_space<vmem>>) attributes {dimension_semantics = [#tpu.dimension_semantics<parallel>, #tpu.dimension_semantics<parallel>, #tpu.dimension_semantics<arbitrary>], iteration_bounds = array<i64: 1, 1, 1>, scalar_prefetch = 0 : i64, scratch_operands = 1 : i64, tpu.core_type = #tpu.core_type<tc>, window_params = [{transform_indices = @transform_0, window_bounds = array<i64: 16, 128>}, {transform_indices = @transform_1, window_bounds = array<i64: 128, 128>}, {transform_indices = @transform_2, window_bounds = array<i64: 1, 128>}, {transform_indices = @transform_3, window_bounds = array<i64: 16, 128>}]} {
    %c0_i32 = arith.constant 0 : i32
    %0 = arith.cmpi eq, %arg2, %c0_i32 : i32
    %1 = arith.extui %0 : i1 to i32
    %c0_i32_0 = arith.constant 0 : i32
    %2 = arith.cmpi ne, %1, %c0_i32_0 : i32
    scf.if %2 {
      %cst_10 = arith.constant 0.000000e+00 : f32
      %12 = vector.broadcast %cst_10 : f32 to vector<16x128xf32>
      %c0_11 = arith.constant 0 : index
      %c0_12 = arith.constant 0 : index
      %13 = vector.load %arg7[%c0_11, %c0_12] : memref<16x128xf32, #tpu.memory_space<vmem>>, vector<16x128xf32>
      tpu.vector_store %arg7[%c0_11, %c0_12], %12 {strides = array<i32>} : memref<16x128xf32, #tpu.memory_space<vmem>>, vector<16x128xf32>,
    } else {
    }
    %c0 = arith.constant 0 : index
    %c0_1 = arith.constant 0 : index
    %3 = vector.load %arg3[%c0, %c0_1] : memref<16x128xbf16, #tpu.memory_space<vmem>>, vector<16x128xbf16>
    %c0_2 = arith.constant 0 : index
    %c0_3 = arith.constant 0 : index
    %4 = vector.load %arg7[%c0_2, %c0_3] : memref<16x128xf32, #tpu.memory_space<vmem>>, vector<16x128xf32>
    %c0_4 = arith.constant 0 : index
    %c0_5 = arith.constant 0 : index
    %5 = vector.load %arg4[%c0_4, %c0_5] : memref<128x128xbf16, #tpu.memory_space<vmem>>, vector<128x128xbf16>
    %cst = arith.constant dense<0.000000e+00> : vector<16x128xf32>
    %6 = tpu.matmul %3, %5, %cst {dimension_numbers = #tpu.dot_dimension_numbers<[1], [0], [0], [1], [0, 0, 1, 1], [], []>} : vector<16x128xbf16>, vector<128x128xbf16>, vector<16x128xf32> -> vector<16x128xf32>
    %7 = arith.addf %4, %6 : vector<16x128xf32>
    %c0_6 = arith.constant 0 : index
    %c0_7 = arith.constant 0 : index
    %8 = vector.load %arg7[%c0_6, %c0_7] : memref<16x128xf32, #tpu.memory_space<vmem>>, vector<16x128xf32>
    tpu.vector_store %arg7[%c0_6, %c0_7], %7 {strides = array<i32>} : memref<16x128xf32, #tpu.memory_space<vmem>>, vector<16x128xf32>,
    %c0_i32_8 = arith.constant 0 : i32
    %9 = arith.cmpi eq, %arg2, %c0_i32_8 : i32
    %10 = arith.extui %9 : i1 to i32
    %c0_i32_9 = arith.constant 0 : i32
    %11 = arith.cmpi ne, %10, %c0_i32_9 : i32
    scf.if %11 {
      %c0_10 = arith.constant 0 : index
      %c0_11 = arith.constant 0 : index
      %12 = vector.load %arg7[%c0_10, %c0_11] : memref<16x128xf32, #tpu.memory_space<vmem>>, vector<16x128xf32>
      %c0_12 = arith.constant 0 : index
      %c0_13 = arith.constant 0 : index
      %13 = vector.load %arg5[%c0_12, %c0_13] : memref<1x128xf32, #tpu.memory_space<vmem>>, vector<1x128xf32>
      %14 = vector.broadcast %13 : vector<1x128xf32> to vector<16x128xf32>
      %15 = arith.addf %12, %14 : vector<16x128xf32>
      %16 = arith.truncf %15 : vector<16x128xf32> to vector<16x128xbf16>
      %c0_14 = arith.constant 0 : index
      %c0_15 = arith.constant 0 : index
      %17 = vector.load %arg6[%c0_14, %c0_15] : memref<16x128xbf16, #tpu.memory_space<vmem>>, vector<16x128xbf16>
      tpu.vector_store %arg6[%c0_14, %c0_15], %16 {strides = array<i32>} : memref<16x128xbf16, #tpu.memory_space<vmem>>, vector<16x128xbf16>,
    } else {
    }
    return
  }
  func.func @transform_0(%arg0: i32, %arg1: i32, %arg2: i32) -> (i32, i32) {
    %c0_i32 = arith.constant 0 : i32
    return %arg0, %arg2 : i32, i32
  }
  func.func @transform_1(%arg0: i32, %arg1: i32, %arg2: i32) -> (i32, i32) {
    %c0_i32 = arith.constant 0 : i32
    return %arg2, %arg1 : i32, i32
  }
  func.func @transform_2(%arg0: i32, %arg1: i32, %arg2: i32) -> (i32, i32) {
    %c0_i32 = arith.constant 0 : i32
    %c0_i32_0 = arith.constant 0 : i32
    return %c0_i32, %arg1 : i32, i32
  }
  func.func @transform_3(%arg0: i32, %arg1: i32, %arg2: i32) -> (i32, i32) {
    %c0_i32 = arith.constant 0 : i32
    return %arg0, %arg1 : i32, i32
  }
}

</mosaic_0001>

<bundles_post_ra>
// kernel: image_captions_forward.27
= control target key start
LH: loop header
LB: loop body
LE: loop exit
PB: predicated region body
PF: predicated region fallthrough
CT: control target
= control target key end

     0   :  { %vm18_vm0 = vcmask 261120   ;;  %vm72_vm1 = vcmask 257024   ;;  %s132_s0 = inlined_call_operand.vmem [shape: bf16[16,32], index: 0, kind: input, shape index: {}]   ;;  %s133_s1 = inlined_call_operand.vmem [shape: f32[1,32], index: 1, kind: input, shape index: {}]   ;;  %s134_s2 = inlined_call_operand.vmem [shape: f32[1,32], index: 2, kind: input, shape index: {}]   ;;  %s135_s3 = inlined_call_operand.vmem [shape: bf16[16,32], index: 3, kind: output, shape index: {}]  }
   0x1   :  { %v86_v0 = vld [vmem:[%s132_s0] sm:$0xff]  }
   0x2   :  { %v87_v1 = vunpack.c.l.bf16 %v86_v0  ;;  %v88_v2 = vunpack.c.h.bf16 %v86_v0  ;;  %v79_v22 = vld [vmem:[%s133_s1] ss:$0 sm:$0xff] }
   0x3   :  { %v80_v24 = vld [vmem:[%s134_s2] ss:$0 sm:$0xff] }
   0x4   :  { %v19_v3 = vsel %vm18_vm0, %v87_v1, 0.0  ;;  %v22_v4 = vsel %vm18_vm0, %v88_v2, 0.0 }
   0x5   :  { %20 = vadd.xlane.f32.xlu0 %v19_v3 }
   0x9   :  { %23 = vadd.xlane.f32.xlu0 %v22_v4 }
  0x92   :  { %v21_v5 = vpop.xlane.xlu0 %20 }
  0x93   :  { %v26_v6 = vmul.f32 0.03125, %v21_v5 }
  0x95   :  { %v28_v7 = vsub.f32 %v87_v1, %v26_v6 }
  0x96   :  { %v24_v8 = vpop.xlane.xlu0 %23 }
  0x97   :  { %v27_v9 = vmul.f32 0.03125, %v24_v8  ;;  %v30_v10 = vmul.f32 %v28_v7, %v28_v7 }
  0x99   :  { %v29_v11 = vsub.f32 %v88_v2, %v27_v9  ;;  %v32_v12 = vsel %vm18_vm0, %v30_v10, 0.0 }
  0x9a   :  { %33 = vadd.xlane.f32.xlu1 %v32_v12 }
  0x9b   :  { %v31_v13 = vmul.f32 %v29_v11, %v29_v11 }
  0x9d   :  { %v35_v14 = vsel %vm18_vm0, %v31_v13, 0.0 }
  0x9e   :  { %36 = vadd.xlane.f32.xlu1 %v35_v14 }
 0x127   :  { %v34_v15 = vpop.xlane.xlu1 %33 }
 0x128   :  { %v38_v16 = vmul.f32 0.03125, %v34_v15 }
 0x12a   :  { %v40_v17 = vadd.f32 1e-05, %v38_v16 }
 0x12b   :  { %v37_v18 = vpop.xlane.xlu1 %36 }
 0x12c   :  { %89 = vrsqrt.f32 %v40_v17  ;;  %v39_v19 = vmul.f32 0.03125, %v37_v18 }
 0x12e   :  { %v41_v20 = vadd.f32 1e-05, %v39_v19 }
 0x130   :  { %91 = vrsqrt.f32 %v41_v20 }
 0x136   :  { %v90_v21 = vpop.eup %89 }
 0x137   :  { %v44_v23 = vmul.f32 %v90_v21, %v28_v7 }
 0x139   :  { %v53_v25 = vmul.f32 %v79_v22, %v44_v23 }
 0x13a   :  { %v92_v26 = vpop.eup %91 }
 0x13b   :  { %v62_v27 = vadd.f32 %v80_v24, %v53_v25  ;;  %v45_v28 = vmul.f32 %v92_v26, %v29_v11 }
 0x13d   :  { %v83_v29 = vpack.c.bf16 %v62_v27, %v62_v27  ;;  %v54_v30 = vmul.f32 %v79_v22, %v45_v28 }
 0x13f   :  { %73 = vst.msk [vmem:[%s135_s3] sm:$0xf] %vm72_vm1, %v83_v29  ;;  %v63_v31 = vadd.f32 %v80_v24, %v54_v30 }
 0x141   :  { %v84_v32 = vpack.c.bf16 %v63_v31, %v63_v31 }
 0x143   :  { %74 = vst.msk [vmem:[%s135_s3 + $0x4] sm:$0xf] %vm72_vm1, %v84_v32 }

// kernel: image_captions_forward.26
= control target key start
LH: loop header
LB: loop body
LE: loop exit
PB: predicated region body
PF: predicated region fallthrough
CT: control target
= control target key end

     0   :  { %s385_s1 = inlined_call_operand.vmem [shape: bf16[256,128], index: 1, kind: input, shape index: {}]   ;;  %s386_s0 = inlined_call_operand.vmem [shape: bf16[16,256], index: 0, kind: input, shape index: {}]   ;;  %s387_s2 = inlined_call_operand.vmem [shape: f32[1,128], index: 2, kind: input, shape index: {}]   ;;  %s388_s3 = inlined_call_operand.vmem [shape: bf16[16,128], index: 3, kind: output, shape index: {}]  }
   0x1   :  { %v286_v0 = vld [vmem:[%s385_s1 + $0x40] sm:$0xff]   ;;  %v288_v2 = vld [vmem:[%s385_s1 + $0x48] sm:$0xff]   ;;  %v290_v4 = vld [vmem:[%s385_s1 + $0x50] sm:$0xff]  }
   0x2   :  { %v287_v1 = vld [vmem:[%s385_s1] sm:$0xff]   ;;  %264 = vmatprep.subr.bf16.mxu0 %v286_v0  ;;  %v289_v3 = vld [vmem:[%s385_s1 + $0x8] sm:$0xff]   ;;  %v291_v5 = vld [vmem:[%s385_s1 + $0x10] sm:$0xff]  }
   0x3   :  { %265 = vmatpush3.bf16.msra.mxu0 %v287_v1  ;;  %v292_v6 = vld [vmem:[%s385_s1 + $0x58] sm:$0xff]   ;;  %v294_v8 = vld [vmem:[%s385_s1 + $0x60] sm:$0xff]   ;;  %v296_v10 = vld [vmem:[%s385_s1 + $0x68] sm:$0xff]  }
   0x4   :  { %266 = vmatprep.subr.bf16.mxu0 %v288_v2  ;;  %v293_v7 = vld [vmem:[%s385_s1 + $0x18] sm:$0xff]   ;;  %v295_v9 = vld [vmem:[%s385_s1 + $0x20] sm:$0xff]   ;;  %v297_v12 = vld [vmem:[%s385_s1 + $0x28] sm:$0xff]  }
   0x5   :  { %v304_v11 = vld [vmem:[%s386_s0 + $0x4] ss:$8 sps:$4 sm:$0xff]   ;;  %v298_v13 = vld [vmem:[%s385_s1 + $0x70] sm:$0xff]   ;;  %v300_v15 = vld [vmem:[%s385_s1 + $0x78] sm:$0xff]  }
   0x6   :  { %195 = vmatprep.mubr.bf16.mxu0 %v304_v11  ;;  %v299_v14 = vld [vmem:[%s385_s1 + $0x30] sm:$0xff]   ;;  %v301_v16 = vld [vmem:[%s385_s1 + $0x38] sm:$0xff]   ;;  %v302_v17 = vld [vmem:[%s386_s0] ss:$8 sps:$4 sm:$0xff]  }
   0x7   :  { %267 = vmatpush3.bf16.msra.mxu0 %v289_v3  ;;  %v254_v22 = vld [vmem:[%s387_s2] ss:$0 sm:$0xff] }
   0x8   :  { %268 = vmatprep.subr.bf16.mxu0 %v290_v4 }
   0xb   :  { %269 = vmatpush3.bf16.msra.mxu0 %v291_v5 }
   0xc   :  { %270 = vmatprep.subr.bf16.mxu0 %v292_v6 }
   0xf   :  { %271 = vmatpush3.bf16.msra.mxu0 %v293_v7 }
  0x10   :  { %272 = vmatprep.subr.bf16.mxu0 %v294_v8 }
  0x13   :  { %273 = vmatpush3.bf16.msra.mxu0 %v295_v9 }
  0x14   :  { %274 = vmatprep.subr.bf16.mxu0 %v296_v10 }
  0x17   :  { %275 = vmatpush3.bf16.msra.mxu0 %v297_v12 }
  0x18   :  { %276 = vmatprep.subr.bf16.mxu0 %v298_v13 }
  0x1b   :  { %277 = vmatpush3.bf16.msra.mxu0 %v299_v14 }
  0x1c   :  { %278 = vmatprep.subr.bf16.mxu0 %v300_v15 }
  0x1f   :  { %279 = vmatpush3.bf16.msra.mxu0 %v301_v16 }
  0x22   :  { %196 = vmatmul.mubr.bf16.vlgmr.msra.gmra.mrb[0].mxu0 %v302_v17 }
  0xf5   :  { %v280_v18 = vpop.f32.mrb[0].mxu0 }
  0xf6   :  { %v281_v19 = vpop.f32.mrb[1].mxu0 }
  0xf7   :  { %v282_v20 = vadd.f32 %v281_v19, %v280_v18  ;;  %v283_v21 = vpop.f32.mrb[2].mxu0 }
  0xf8   :  { %v284_v23 = vpop.f32.mrb[3].mxu0 }
  0xf9   :  { %v285_v24 = vadd.f32 %v284_v23, %v283_v21  ;;  %v220_v25 = vadd.f32 %v282_v20, %v254_v22 }
  0xfb   :  { %v221_v26 = vadd.f32 %v285_v24, %v254_v22 }
  0xfd   :  { %v262_v27 = vpack.c.bf16 %v221_v26, %v220_v25 }
  0xff   :  { %263 = vst [vmem:[%s388_s3] sm:$0xff] %v262_v27  }

// kernel: image_captions_forward.28
= control target key start
LH: loop header
LB: loop body
LE: loop exit
PB: predicated region body
PF: predicated region fallthrough
CT: control target
= control target key end

     0   :  { %v282_v1 = vmov 0.0   ;;  %vm283_vm0 = vmmov 0   ;;  %s353_s0 = inlined_call_operand.vmem [shape: bf16[16,128], index: 0, kind: input, shape index: {}]   ;;  %s354_s1 = inlined_call_operand.vmem [shape: bf16[128,128], index: 1, kind: input, shape index: {}]   ;;  %s355_s3 = inlined_call_operand.vmem [shape: f32[1,128], index: 3, kind: input, shape index: {}]   ;;  %s356_s4 = inlined_call_operand.vmem [shape: f32[1,128], index: 4, kind: input, shape index: {}]   ;;  %s357_s2 = inlined_call_operand.vmem [shape: f32[1,128], index: 2, kind: input, shape index: {}]   ;;  %s358_s5 = inlined_call_operand.vmem [shape: bf16[16,128], index: 5, kind: output, shape index: {}]  }
   0x1   :  { %v231_v0 = vld [vmem:[%s353_s0] sm:$0xff]   ;;  %248 = vmatprep.subr.bf16.mxu0 %v282_v1  ;;  %v271_v7 = vld [vmem:[%s354_s1 + $0x8] sm:$0xff]   ;;  %v272_v8 = vld [vmem:[%s354_s1 + $0x10] sm:$0xff]   ;;  %264 = vmatprep.mubr.msk.bf16.mxu0 %vm283_vm0, %v282_v1 }
   0x2   :  { %v232_v2 = vunpack.c.l.bf16 %v231_v0  ;;  %v233_v3 = vunpack.c.h.bf16 %v231_v0  ;;  %v270_v6 = vld [vmem:[%s354_s1] sm:$0xff]   ;;  %v273_v9 = vld [vmem:[%s354_s1 + $0x18] sm:$0xff]   ;;  %v275_v11 = vld [vmem:[%s354_s1 + $0x28] sm:$0xff]  }
   0x3   :  { %249 = vmatpush3.bf16.msra.mxu0 %v270_v6  ;;  %v274_v10 = vld [vmem:[%s354_s1 + $0x20] sm:$0xff]   ;;  %v276_v12 = vld [vmem:[%s354_s1 + $0x30] sm:$0xff]   ;;  %v277_v13 = vld [vmem:[%s354_s1 + $0x38] sm:$0xff]  }
   0x4   :  { %31 = vadd.xlane.f32.xlu0 %v232_v2  ;;  %v37_v4 = vmul.f32 %v232_v2, %v232_v2  ;;  %v38_v5 = vmul.f32 %v233_v3, %v233_v3  ;;  %250 = vmatprep.subr.bf16.mxu0 %v282_v1  ;;  %v215_v31 = vld [vmem:[%s355_s3] ss:$0 sm:$0xff] }
   0x5   :  { %v216_v36 = vld [vmem:[%s356_s4] ss:$0 sm:$0xff] }
   0x6   :  { %39 = vadd.xlane.f32.xlu1 %v37_v4  ;;  %v225_v42 = vld [vmem:[%s357_s2] ss:$0 sm:$0xff] }
   0x7   :  { %251 = vmatpush3.bf16.msra.mxu0 %v271_v7 }
   0x8   :  { %33 = vadd.xlane.f32.xlu0 %v233_v3  ;;  %252 = vmatprep.subr.bf16.mxu0 %v282_v1 }
   0xa   :  { %41 = vadd.xlane.f32.xlu1 %v38_v5 }
   0xb   :  { %253 = vmatpush3.bf16.msra.mxu0 %v272_v8 }
   0xc   :  { %254 = vmatprep.subr.bf16.mxu0 %v282_v1 }
   0xf   :  { %255 = vmatpush3.bf16.msra.mxu0 %v273_v9 }
  0x10   :  { %256 = vmatprep.subr.bf16.mxu0 %v282_v1 }
  0x13   :  { %257 = vmatpush3.bf16.msra.mxu0 %v274_v10 }
  0x14   :  { %258 = vmatprep.subr.bf16.mxu0 %v282_v1 }
  0x17   :  { %259 = vmatpush3.bf16.msra.mxu0 %v275_v11 }
  0x18   :  { %260 = vmatprep.subr.bf16.mxu0 %v282_v1 }
  0x1b   :  { %261 = vmatpush3.bf16.msra.mxu0 %v276_v12 }
  0x1c   :  { %262 = vmatprep.subr.bf16.mxu0 %v282_v1 }
  0x1f   :  { %263 = vmatpush3.bf16.msra.mxu0 %v277_v13 }
  0x91   :  { %v32_v14 = vpop.xlane.xlu0 %31 }
  0x92   :  { %v35_v15 = vmul.f32 0.03125, %v32_v14 }
  0x93   :  { %v40_v16 = vpop.xlane.xlu1 %39 }
  0x94   :  { %v45_v17 = vmul.f32 %v35_v15, %v35_v15  ;;  %v43_v18 = vmul.f32 0.03125, %v40_v16  ;;  %v49_v28 = vsub.f32 %v232_v2, %v35_v15 }
  0x95   :  { %v34_v19 = vpop.xlane.xlu0 %33 }
  0x96   :  { %v47_v20 = vsub.f32 %v43_v18, %v45_v17  ;;  %v36_v21 = vmul.f32 0.03125, %v34_v19 }
  0x97   :  { %v42_v22 = vpop.xlane.xlu1 %41 }
  0x98   :  { %v51_v23 = vadd.f32 1e-05, %v47_v20  ;;  %v46_v24 = vmul.f32 %v36_v21, %v36_v21  ;;  %v44_v25 = vmul.f32 0.03125, %v42_v22  ;;  %v50_v32 = vsub.f32 %v233_v3, %v36_v21 }
  0x9a   :  { %278 = vrsqrt.f32 %v51_v23  ;;  %v48_v26 = vsub.f32 %v44_v25, %v46_v24 }
  0x9c   :  { %v52_v27 = vadd.f32 1e-05, %v48_v26 }
  0x9e   :  { %280 = vrsqrt.f32 %v52_v27 }
  0xa4   :  { %v279_v29 = vpop.eup %278 }
  0xa5   :  { %v55_v30 = vmul.f32 %v279_v29, %v49_v28 }
  0xa7   :  { %v64_v35 = vmul.f32 %v215_v31, %v55_v30 }
  0xa8   :  { %v281_v33 = vpop.eup %280 }
  0xa9   :  { %v56_v34 = vmul.f32 %v281_v33, %v50_v32  ;;  %v73_v38 = vadd.f32 %v216_v36, %v64_v35 }
  0xab   :  { %v65_v37 = vmul.f32 %v215_v31, %v56_v34 }
  0xad   :  { %v74_v39 = vadd.f32 %v216_v36, %v65_v37 }
  0xaf   :  { %v75_v40 = vpack.c.bf16 %v74_v39, %v73_v38 }
  0xb1   :  { %265 = vmatmul.mubr.bf16.vlgmr.msra.gmra.mrb[0].mxu0 %v75_v40 }
 0x184   :  { %v176_v41 = vpop.f32.mrb[0].mxu0 }
 0x185   :  { %v266_v43 = vpop.f32.mrb[1].mxu0  ;;  %v199_v45 = vadd.f32 %v225_v42, %v176_v41 }
 0x186   :  { %v179_v44 = vpop.f32.mrb[2].mxu0 }
 0x187   :  { %v200_v46 = vadd.f32 %v225_v42, %v179_v44  ;;  %v267_v47 = vpop.f32.mrb[3].mxu0 }
 0x189   :  { %v237_v48 = vpack.c.bf16 %v200_v46, %v199_v45 }
 0x18b   :  { %238 = vst [vmem:[%s358_s5] sm:$0xff] %v237_v48  }

// kernel: image_captions_forward.29
= control target key start
LH: loop header
LB: loop body
LE: loop exit
PB: predicated region body
PF: predicated region fallthrough
CT: control target
= control target key end

     0   :  { %s743_s12 = smov 0   ;;  %s745_s13 = smov 0   ;;  %s814_s0 = inlined_call_operand.vmem [shape: bf16[2,4,5,8], index: 0, kind: input, shape index: {}]   ;;  %s815_s1 = inlined_call_operand.vmem [shape: bf16[2,4,5,8], index: 1, kind: input, shape index: {}]   ;;  %s816_s2 = inlined_call_operand.vmem [shape: bf16[2,4,5,8], index: 2, kind: input, shape index: {}]   ;;  %s817_s3 = inlined_call_operand.vmem [shape: bf16[2,4,5,8], index: 3, kind: output, shape index: {}]  }
   0x1   :  { %s747_s14 = smov 0   ;;  %s749_s15 = smov 0  }
   0x2   :  { %s751_s16 = smov 0  }
   0x3 LB: > { %s28_s17 = sadd.s32 1, %s708_s14  ;;  %s32_s18 = sadd.s32 1, %s712_s15  ;;  %s716_s16 = sphi %s751_s16, %s13_s16   ;;  %s712_s15 = sphi %s749_s15, %s821_s15   ;;  %s708_s14 = sphi %s747_s14, %s820_s14   ;;  %s704_s13 = sphi %s745_s13, %s819_s13   ;;  %s700_s12 = sphi %s743_s12, %s818_s12  }
   0x4   : > { %p30_p0 = scmp.ge.s32.totalorder %s28_s17, 4  ;;  %p596_p1 = scmp.ge.s32.totalorder %s716_s16, 1 }
   0x5   : > { %p203_p2 = scmp.lt.s32.totalorder %s716_s16, 9 }
   0x6   : > { %s823_s17 = smov (%p30_p0, %s28_s17), 0  ;;  %s825_s18 = smov (!%p30_p0, %s32_s18), %s712_s15 }
   0x7   : > { %p204_p3 = pnand %p596_p1, %p203_p2  ;;  %p34_p4 = scmp.ge.s32.totalorder %s825_s18, 2 }
   0x8   : > { %vm301_vm0 = vcmask (!%p204_p3), 61440   ;;  %p255_p5 = scmp.lt.s32.totalorder (!%p204_p3), %s704_s13, 1  ;;  %p257_p6 = scmp.lt.s32.totalorder (!%p204_p3), %s700_s12, 3  ;;  %v718_v0 = vmov (!%p204_p3), 0.0   ;;  %vm719_vm1 = vmmov (!%p204_p3), 0   ;;  %vm306_vm2 = vcmask (!%p204_p3), 64512  }
   0x9   : > { %s827_s18 = smov (%p34_p4, %s825_s18), 0  ;;  %207 = sbr.rel (%p204_p3) target bundleno = 830 (0x33e), region = 32 }
   0xa   : > { %302 = vst.msk [vmem:[#allocation4] sm:$0x1f] (!%p204_p3), %vm301_vm0, %v718_v0  ;;  %613 = vmatprep.subr.bf16.mxu0 (!%p204_p3), %v718_v0  ;;  %615 = vmatprep.mubr.msk.bf16.mxu0 (!%p204_p3), %vm719_vm1, %v718_v0  ;;  %vm298_vm3 = vcmask (!%p204_p3), 4096   ;;  %v720_v4 = vmov (!%p204_p3), -inf   ;;  %vm355_vm4 = vcmask (!%p204_p3), 36864   ;;  %v721_v11 = vmov (!%p204_p3), 0  }
   0xb   : > { %619 = vmatprep.subr.bf16.mxu1 (!%p204_p3), %v718_v0  ;;  %621 = vmatprep.mubr.msk.bf16.mxu1 (!%p204_p3), %vm719_vm1, %v718_v0  ;;  %299 = vst.msk [vmem:[#allocation2] sm:$0x1f] (!%p204_p3), %vm298_vm3, %v720_v4  ;;  %300 = vst.msk [vmem:[#allocation3] sm:$0x1f] (!%p204_p3), %vm298_vm3, %v718_v0  ;;  %vm391_vm5 = vcmask (!%p204_p3), 1041408   ;;  %vm392_vm6 = vcmask (!%p204_p3), 1042432  }
   0xc   : > { %670 = vset.pattern.permute.xlu0 (!%p204_p3), %v721_v11  ;;  %671 = vset.pattern.permute.xlu1 (!%p204_p3), %v721_v11  ;;  %v722_v17 = vmov (!%p204_p3), 65535   ;;  %vm387_vm7 = vcmask (!%p204_p3), 39936   ;;  %vm455_vm8 = vcmask (!%p204_p3), 59392   ;;  %vm456_vm9 = vsmask.f32 (!%p204_p3), 2304 }
   0xd   : > { %v393_v18 = vsel (!%p204_p3), %vm391_vm5, 4294967295, %v722_v17  ;;  %vm457_vm10 = vmand (!%p204_p3), %vm455_vm8, %vm456_vm9 }
   0xe   : > { %v394_v19 = vsel (!%p204_p3), %vm392_vm6, %v393_v18, 0 }
  0x10   : > { %s829_s13 = smov (!%p255_p5, %s704_s13), 1  ;;  %s831_s12 = smov (!%p257_p6, %s700_s12), 3 }
  0x11   : > { %s597_s19 = sshll.u32 %s829_s13, 2  ;;  %v379_v35 = vld [vmem:[#allocation4] sm:$0x1f] }
  0x12   : > { %s260_s20 = sadd.s32 %s597_s19, %s831_s12  ;;  %v354_v12 = vld [vmem:[#allocation2] sm:$0x1f]  ;;  %v371_v29 = vld [vmem:[#allocation3] sm:$0x1f] }
  0x13   : > { %s774_s21 = sshll.u32 %s260_s20, 2 }
  0x14   : > { %s273_s24 = scalar_lea.vmem %s815_s1, %s774_s21  ;;  %s262_s27 = scalar_lea.vmem %s814_s0, %s774_s21 }
  0x15   : > { %v304_v1 = vld [vmem:[%s273_s24] sm:$0x7]  ;;  %s284_s30 = scalar_lea.vmem %s816_s2, %s774_s21  ;;  %s292_s6 = scalar_lea.vmem %s817_s3, %s774_s21 }
  0x16   : > { %v311_v2 = vsel %vm306_vm2, %v304_v1, 0  ;;  %v303_v3 = vld [vmem:[%s262_s27] sm:$0x7] }
  0x17   : > { %614 = vmatpush3.bf16.xpose.msra.mxu0 %v311_v2  ;;  %v305_v16 = vld [vmem:[%s284_s30] sm:$0x7] }
  0x18   : > { %v396_v20 = vand.u32 %v394_v19, %v305_v16  ;;  %v458_v46 = vld [vmem:[%s292_s6] sm:$0x7] }
  0x1a   : > { %620 = vmatpush3.bf16.msra.mxu1 %v396_v20 }
  0x1e   : > { %616 = vmatmul.mubr.msk.bf16.vlgmr.msra.gmra.mrb[0].mxu0 %vm306_vm2, %v303_v3 }
  0xf1   : > { %v347_v5 = vpop.f32.mrb[0].mxu0 }
  0xf2   : > { %v353_v6 = vmul.f32 0.35355338, %v347_v5  ;;  %v617_v7 = vpop.f32.mrb[1].mxu0 }
  0xf3   : > { %v350_v8 = vpop.f32.mrb[2].mxu0 }
  0xf4   : > { %v618_v9 = vpop.f32.mrb[3].mxu0  ;;  %v356_v10 = vsel %vm355_vm4, %v353_v6, -inf }
  0xf5   : > { %357 = vmax.xlane.f32.xlu0 %v356_v10 }
 0x182   : > { %v358_v13 = vpop.xlane.xlu0 %357 }
 0x183   : > { %v359_v14 = vmax.f32 %v354_v12, %v358_v13 }
 0x185   : > { %v360_v15 = vsub.f32 %v354_v12, %v359_v14  ;;  %441 = vst.msk [vmem:[#allocation2] sm:$0x1f] %vm298_vm3, %v359_v14  ;;  %365 = vperm.xlu0 %670, %v359_v14  }
 0x187   : > { %v361_v27 = vmul.f32 1.442695, %v360_v15 }
 0x204   : > { %v366_v21 = vpop.permute.xlu0 %365 }
 0x205   : > { %v368_v22 = vsub.f32 %v353_v6, %v366_v21 }
 0x207   : > { %v369_v23 = vmul.f32 1.442695, %v368_v22 }
 0x209   : > { %672 = vpow2.f32 %v369_v23 }
 0x20a   : > { %674 = vpow2.f32 %v361_v27 }
 0x213   : > { %v673_v24 = vpop.eup %672 }
 0x214   : > { %v373_v25 = vsel %vm355_vm4, %v673_v24, 0.0  ;;  %v386_v26 = vpack.c.bf16 %v673_v24, %v673_v24  ;;  %v675_v28 = vpop.eup %674 }
 0x215   : > { %374 = vadd.xlane.f32.xlu1 %v373_v25  ;;  %v372_v30 = vmul.f32 %v675_v28, %v371_v29 }
 0x216   : > { %622 = vmatmul.mubr.msk.bf16.vlgmr.msra.gmra.mrb[0].mxu1 %vm387_vm7, %v386_v26 }
 0x226   : > { %382 = vperm.xlu1 %671, %v675_v28  }
 0x2a2   : > { %v375_v31 = vpop.xlane.xlu1 %374 }
 0x2a3   : > { %v376_v32 = vadd.f32 %v375_v31, %v372_v30 }
 0x2a5   : > { %378 = vst.msk [vmem:[#allocation3] sm:$0x1f] %vm298_vm3, %v376_v32 }
 0x2a6   : > { %v383_v36 = vpop.permute.xlu1 %382 }
 0x2a7   : > { %v385_v37 = vmul.f32 %v383_v36, %v379_v35 }
 0x2ac   : > { %v446_v33 = vld [vmem:[#allocation3] sm:$0x1f] }
 0x2ad   : > { %676 = vrcp.f32 %v446_v33 }
 0x2b7   : > { %v677_v34 = vpop.eup %676 }
 0x2b8   : > { %450 = vperm.xlu1 %671, %v677_v34  }
 0x2e9   : > { %v432_v38 = vpop.f32.mrb[0].mxu1 }
 0x2ea   : > { %v438_v39 = vadd.f32 %v432_v38, %v385_v37  ;;  %v623_v40 = vpop.f32.mrb[1].mxu1 }
 0x2eb   : > { %v435_v41 = vpop.f32.mrb[2].mxu1 }
 0x2ec   : > { %440 = vst.msk [vmem:[#allocation4] sm:$0x1f] %vm301_vm0, %v438_v39  ;;  %v624_v42 = vpop.f32.mrb[3].mxu1 }
 0x2f3   : > { %v445_v43 = vld [vmem:[#allocation4] sm:$0x1f] }
 0x337   : > { %v451_v44 = vpop.permute.xlu1 %450 }
 0x338   : > { %v453_v45 = vmul.f32 %v451_v44, %v445_v43 }
 0x33a   : > { %v454_v47 = vpack.c.bf16 %v453_v45, %v453_v45 }
 0x33c   : > { %v459_v48 = vsel %vm457_vm10, %v454_v47, %v458_v46 }
 0x33d   : > { %460 = vst [vmem:[%s292_s6] sm:$0x7] %v459_v48 }
 0x33e PF: > { %s13_s16 = sadd.s32 1, %s716_s16   ;;  %s818_s12 = smov %s708_s14 }
 0x33f   : > { %p10_p7 = scmp.ge.s32.totalorder %s13_s16, 10   ;;  %s819_s13 = smov %s712_s15 }
 0x340   : > { %s820_s14 = smov %s823_s17  ;;  %s821_s15 = smov %s827_s18 }
 0x341   :  { %12 = sbr.rel (!%p10_p7) target bundleno = 3 (0x3), region = 76 }

// kernel: image_captions_forward.30
= control target key start
LH: loop header
LB: loop body
LE: loop exit
PB: predicated region body
PF: predicated region fallthrough
CT: control target
= control target key end

     0   :  { %v240_v0 = vmov 0.0   ;;  %vm241_vm0 = vmmov 0   ;;  %s303_s1 = inlined_call_operand.vmem [shape: bf16[128,128], index: 1, kind: input, shape index: {}]   ;;  %s304_s0 = inlined_call_operand.vmem [shape: bf16[16,128], index: 0, kind: input, shape index: {}]   ;;  %s305_s2 = inlined_call_operand.vmem [shape: f32[1,128], index: 2, kind: input, shape index: {}]   ;;  %s306_s3 = inlined_call_operand.vmem [shape: bf16[16,128], index: 3, kind: input, shape index: {}]   ;;  %s307_s4 = inlined_call_operand.vmem [shape: bf16[16,128], index: 4, kind: output, shape index: {}]  }
   0x1   :  { %209 = vmatprep.subr.bf16.mxu0 %v240_v0  ;;  %v231_v1 = vld [vmem:[%s303_s1] sm:$0xff]   ;;  %225 = vmatprep.mubr.msk.bf16.mxu0 %vm241_vm0, %v240_v0  ;;  %v232_v2 = vld [vmem:[%s303_s1 + $0x8] sm:$0xff]   ;;  %v233_v3 = vld [vmem:[%s303_s1 + $0x10] sm:$0xff]  }
   0x2   :  { %210 = vmatpush3.bf16.msra.mxu0 %v231_v1  ;;  %v234_v4 = vld [vmem:[%s303_s1 + $0x18] sm:$0xff]   ;;  %v235_v5 = vld [vmem:[%s303_s1 + $0x20] sm:$0xff]   ;;  %v236_v6 = vld [vmem:[%s303_s1 + $0x28] sm:$0xff]  }
   0x3   :  { %211 = vmatprep.subr.bf16.mxu0 %v240_v0  ;;  %v237_v7 = vld [vmem:[%s303_s1 + $0x30] sm:$0xff]   ;;  %v238_v8 = vld [vmem:[%s303_s1 + $0x38] sm:$0xff]   ;;  %v239_v9 = vld [vmem:[%s304_s0] sm:$0xff]  }
   0x4   :  { %v186_v10 = vld [vmem:[%s305_s2] ss:$0 sm:$0xff] }
   0x5   :  { %v192_v11 = vld [vmem:[%s306_s3] sm:$0xff]  }
   0x6   :  { %212 = vmatpush3.bf16.msra.mxu0 %v232_v2  ;;  %v193_v14 = vunpack.c.l.bf16 %v192_v11  ;;  %v194_v16 = vunpack.c.h.bf16 %v192_v11 }
   0x7   :  { %213 = vmatprep.subr.bf16.mxu0 %v240_v0 }
   0xa   :  { %214 = vmatpush3.bf16.msra.mxu0 %v233_v3 }
   0xb   :  { %215 = vmatprep.subr.bf16.mxu0 %v240_v0 }
   0xe   :  { %216 = vmatpush3.bf16.msra.mxu0 %v234_v4 }
   0xf   :  { %217 = vmatprep.subr.bf16.mxu0 %v240_v0 }
  0x12   :  { %218 = vmatpush3.bf16.msra.mxu0 %v235_v5 }
  0x13   :  { %219 = vmatprep.subr.bf16.mxu0 %v240_v0 }
  0x16   :  { %220 = vmatpush3.bf16.msra.mxu0 %v236_v6 }
  0x17   :  { %221 = vmatprep.subr.bf16.mxu0 %v240_v0 }
  0x1a   :  { %222 = vmatpush3.bf16.msra.mxu0 %v237_v7 }
  0x1b   :  { %223 = vmatprep.subr.bf16.mxu0 %v240_v0 }
  0x1e   :  { %224 = vmatpush3.bf16.msra.mxu0 %v238_v8 }
  0x21   :  { %226 = vmatmul.mubr.bf16.vlgmr.msra.gmra.mrb[0].mxu0 %v239_v9 }
  0xf4   :  { %v132_v12 = vpop.f32.mrb[0].mxu0 }
  0xf5   :  { %v155_v13 = vadd.f32 %v186_v10, %v132_v12  ;;  %v227_v15 = vpop.f32.mrb[1].mxu0 }
  0xf6   :  { %v135_v17 = vpop.f32.mrb[2].mxu0 }
  0xf7   :  { %v156_v18 = vadd.f32 %v186_v10, %v135_v17  ;;  %v228_v19 = vpop.f32.mrb[3].mxu0  ;;  %v161_v20 = vadd.f32 %v193_v14, %v155_v13 }
  0xf9   :  { %v162_v21 = vadd.f32 %v194_v16, %v156_v18 }
  0xfb   :  { %v198_v22 = vpack.c.bf16 %v162_v21, %v161_v20 }
  0xfd   :  { %199 = vst [vmem:[%s307_s4] sm:$0xff] %v198_v22  }

// kernel: image_captions_forward.31
= control target key start
LH: loop header
LB: loop body
LE: loop exit
PB: predicated region body
PF: predicated region fallthrough
CT: control target
= control target key end

     0   :  { %v308_v1 = vmov 0.0   ;;  %vm309_vm0 = vmmov 0   ;;  %s379_s0 = inlined_call_operand.vmem [shape: bf16[16,128], index: 0, kind: input, shape index: {}]   ;;  %s380_s1 = inlined_call_operand.vmem [shape: bf16[128,128], index: 1, kind: input, shape index: {}]   ;;  %s381_s3 = inlined_call_operand.vmem [shape: f32[1,128], index: 3, kind: input, shape index: {}]   ;;  %s382_s4 = inlined_call_operand.vmem [shape: f32[1,128], index: 4, kind: input, shape index: {}]   ;;  %s383_s2 = inlined_call_operand.vmem [shape: f32[1,128], index: 2, kind: input, shape index: {}]   ;;  %s384_s5 = inlined_call_operand.vmem [shape: bf16[16,128], index: 5, kind: output, shape index: {}]  }
   0x1   :  { %v249_v0 = vld [vmem:[%s379_s0] sm:$0xff]   ;;  %266 = vmatprep.subr.bf16.mxu0 %v308_v1  ;;  %v289_v7 = vld [vmem:[%s380_s1 + $0x8] sm:$0xff]   ;;  %v290_v8 = vld [vmem:[%s380_s1 + $0x10] sm:$0xff]   ;;  %282 = vmatprep.mubr.msk.bf16.mxu0 %vm309_vm0, %v308_v1 }
   0x2   :  { %v250_v2 = vunpack.c.l.bf16 %v249_v0  ;;  %v251_v3 = vunpack.c.h.bf16 %v249_v0  ;;  %v288_v6 = vld [vmem:[%s380_s1] sm:$0xff]   ;;  %v291_v9 = vld [vmem:[%s380_s1 + $0x18] sm:$0xff]   ;;  %v293_v11 = vld [vmem:[%s380_s1 + $0x28] sm:$0xff]  }
   0x3   :  { %267 = vmatpush3.bf16.msra.mxu0 %v288_v6  ;;  %v292_v10 = vld [vmem:[%s380_s1 + $0x20] sm:$0xff]   ;;  %v294_v12 = vld [vmem:[%s380_s1 + $0x30] sm:$0xff]   ;;  %v295_v13 = vld [vmem:[%s380_s1 + $0x38] sm:$0xff]  }
   0x4   :  { %31 = vadd.xlane.f32.xlu0 %v250_v2  ;;  %v37_v4 = vmul.f32 %v250_v2, %v250_v2  ;;  %v38_v5 = vmul.f32 %v251_v3, %v251_v3  ;;  %268 = vmatprep.subr.bf16.mxu0 %v308_v1  ;;  %v231_v31 = vld [vmem:[%s381_s3] ss:$0 sm:$0xff] }
   0x5   :  { %v232_v36 = vld [vmem:[%s382_s4] ss:$0 sm:$0xff] }
   0x6   :  { %39 = vadd.xlane.f32.xlu1 %v37_v4  ;;  %v241_v41 = vld [vmem:[%s383_s2] ss:$0 sm:$0xff] }
   0x7   :  { %269 = vmatpush3.bf16.msra.mxu0 %v289_v7 }
   0x8   :  { %33 = vadd.xlane.f32.xlu0 %v251_v3  ;;  %270 = vmatprep.subr.bf16.mxu0 %v308_v1 }
   0xa   :  { %41 = vadd.xlane.f32.xlu1 %v38_v5 }
   0xb   :  { %271 = vmatpush3.bf16.msra.mxu0 %v290_v8 }
   0xc   :  { %272 = vmatprep.subr.bf16.mxu0 %v308_v1 }
   0xf   :  { %273 = vmatpush3.bf16.msra.mxu0 %v291_v9 }
  0x10   :  { %274 = vmatprep.subr.bf16.mxu0 %v308_v1 }
  0x13   :  { %275 = vmatpush3.bf16.msra.mxu0 %v292_v10 }
  0x14   :  { %276 = vmatprep.subr.bf16.mxu0 %v308_v1 }
  0x17   :  { %277 = vmatpush3.bf16.msra.mxu0 %v293_v11 }
  0x18   :  { %278 = vmatprep.subr.bf16.mxu0 %v308_v1 }
  0x1b   :  { %279 = vmatpush3.bf16.msra.mxu0 %v294_v12 }
  0x1c   :  { %280 = vmatprep.subr.bf16.mxu0 %v308_v1 }
  0x1f   :  { %281 = vmatpush3.bf16.msra.mxu0 %v295_v13 }
  0x91   :  { %v32_v14 = vpop.xlane.xlu0 %31 }
  0x92   :  { %v35_v15 = vmul.f32 0.03125, %v32_v14 }
  0x93   :  { %v40_v16 = vpop.xlane.xlu1 %39 }
  0x94   :  { %v45_v17 = vmul.f32 %v35_v15, %v35_v15  ;;  %v43_v18 = vmul.f32 0.03125, %v40_v16  ;;  %v49_v28 = vsub.f32 %v250_v2, %v35_v15 }
  0x95   :  { %v34_v19 = vpop.xlane.xlu0 %33 }
  0x96   :  { %v47_v20 = vsub.f32 %v43_v18, %v45_v17  ;;  %v36_v21 = vmul.f32 0.03125, %v34_v19 }
  0x97   :  { %v42_v22 = vpop.xlane.xlu1 %41 }
  0x98   :  { %v51_v23 = vadd.f32 1e-05, %v47_v20  ;;  %v46_v24 = vmul.f32 %v36_v21, %v36_v21  ;;  %v44_v25 = vmul.f32 0.03125, %v42_v22  ;;  %v50_v32 = vsub.f32 %v251_v3, %v36_v21 }
  0x9a   :  { %296 = vrsqrt.f32 %v51_v23  ;;  %v48_v26 = vsub.f32 %v44_v25, %v46_v24 }
  0x9c   :  { %v52_v27 = vadd.f32 1e-05, %v48_v26 }
  0x9e   :  { %298 = vrsqrt.f32 %v52_v27 }
  0xa4   :  { %v297_v29 = vpop.eup %296 }
  0xa5   :  { %v55_v30 = vmul.f32 %v297_v29, %v49_v28 }
  0xa7   :  { %v64_v35 = vmul.f32 %v231_v31, %v55_v30 }
  0xa8   :  { %v299_v33 = vpop.eup %298 }
  0xa9   :  { %v56_v34 = vmul.f32 %v299_v33, %v50_v32  ;;  %v73_v38 = vadd.f32 %v232_v36, %v64_v35 }
  0xab   :  { %v65_v37 = vmul.f32 %v231_v31, %v56_v34 }
  0xad   :  { %v74_v39 = vadd.f32 %v232_v36, %v65_v37 }
  0xaf   :  { %v75_v40 = vpack.c.bf16 %v74_v39, %v73_v38 }
  0xb1   :  { %283 = vmatmul.mubr.bf16.vlgmr.msra.gmra.mrb[0].mxu0 %v75_v40 }
 0x184   :  { %v176_v42 = vpop.f32.mrb[0].mxu0 }
 0x185   :  { %v199_v43 = vadd.f32 %v241_v41, %v176_v42  ;;  %v284_v44 = vpop.f32.mrb[1].mxu0 }
 0x186   :  { %v179_v45 = vpop.f32.mrb[2].mxu0 }
 0x187   :  { %v242_v46 = vmul.f32 -1.702, %v199_v43  ;;  %v200_v47 = vadd.f32 %v241_v41, %v179_v45  ;;  %v285_v48 = vpop.f32.mrb[3].mxu0 }
 0x189   :  { %v205_v49 = vmul.f32 1.442695, %v242_v46  ;;  %v243_v50 = vmul.f32 -1.702, %v200_v47 }
 0x18b   :  { %300 = vpow2.f32 %v205_v49  ;;  %v207_v51 = vmul.f32 1.442695, %v243_v50 }
 0x18d   :  { %302 = vpow2.f32 %v207_v51 }
 0x195   :  { %v301_v52 = vpop.eup %300 }
 0x196   :  { %v209_v53 = vadd.f32 1.0, %v301_v52 }
 0x197   :  { %v303_v54 = vpop.eup %302 }
 0x198   :  { %304 = vrcp.f32 %v209_v53  ;;  %v210_v55 = vadd.f32 1.0, %v303_v54 }
 0x19a   :  { %306 = vrcp.f32 %v210_v55 }
 0x1a2   :  { %v305_v56 = vpop.eup %304 }
 0x1a3   :  { %v215_v58 = vmul.f32 %v305_v56, %v199_v43 }
 0x1a4   :  { %v307_v57 = vpop.eup %306 }
 0x1a5   :  { %v216_v59 = vmul.f32 %v307_v57, %v200_v47 }
 0x1a7   :  { %v255_v60 = vpack.c.bf16 %v216_v59, %v215_v58 }
 0x1a9   :  { %256 = vst [vmem:[%s384_s5] sm:$0xff] %v255_v60  }

// kernel: image_captions_forward.37
= control target key start
LH: loop header
LB: loop body
LE: loop exit
PB: predicated region body
PF: predicated region fallthrough
CT: control target
= control target key end

     0   :  { %v227_v0 = vmov 0.0   ;;  %vm228_vm0 = vmmov 0   ;;  %s282_s1 = inlined_call_operand.vmem [shape: bf16[128,128], index: 1, kind: input, shape index: {}]   ;;  %s283_s0 = inlined_call_operand.vmem [shape: bf16[16,128], index: 0, kind: input, shape index: {}]   ;;  %s284_s2 = inlined_call_operand.vmem [shape: f32[1,128], index: 2, kind: input, shape index: {}]   ;;  %s285_s3 = inlined_call_operand.vmem [shape: bf16[16,128], index: 3, kind: output, shape index: {}]  }
   0x1   :  { %196 = vmatprep.subr.bf16.mxu0 %v227_v0  ;;  %v218_v1 = vld [vmem:[%s282_s1] sm:$0xff]   ;;  %212 = vmatprep.mubr.msk.bf16.mxu0 %vm228_vm0, %v227_v0  ;;  %v219_v2 = vld [vmem:[%s282_s1 + $0x8] sm:$0xff]   ;;  %v220_v3 = vld [vmem:[%s282_s1 + $0x10] sm:$0xff]  }
   0x2   :  { %197 = vmatpush3.bf16.msra.mxu0 %v218_v1  ;;  %v221_v4 = vld [vmem:[%s282_s1 + $0x18] sm:$0xff]   ;;  %v222_v5 = vld [vmem:[%s282_s1 + $0x20] sm:$0xff]   ;;  %v223_v6 = vld [vmem:[%s282_s1 + $0x28] sm:$0xff]  }
   0x3   :  { %198 = vmatprep.subr.bf16.mxu0 %v227_v0  ;;  %v224_v7 = vld [vmem:[%s282_s1 + $0x30] sm:$0xff]   ;;  %v225_v8 = vld [vmem:[%s282_s1 + $0x38] sm:$0xff]   ;;  %v226_v9 = vld [vmem:[%s283_s0] sm:$0xff]  }
   0x4   :  { %v177_v11 = vld [vmem:[%s284_s2] ss:$0 sm:$0xff] }
   0x6   :  { %199 = vmatpush3.bf16.msra.mxu0 %v219_v2 }
   0x7   :  { %200 = vmatprep.subr.bf16.mxu0 %v227_v0 }
   0xa   :  { %201 = vmatpush3.bf16.msra.mxu0 %v220_v3 }
   0xb   :  { %202 = vmatprep.subr.bf16.mxu0 %v227_v0 }
   0xe   :  { %203 = vmatpush3.bf16.msra.mxu0 %v221_v4 }
   0xf   :  { %204 = vmatprep.subr.bf16.mxu0 %v227_v0 }
  0x12   :  { %205 = vmatpush3.bf16.msra.mxu0 %v222_v5 }
  0x13   :  { %206 = vmatprep.subr.bf16.mxu0 %v227_v0 }
  0x16   :  { %207 = vmatpush3.bf16.msra.mxu0 %v223_v6 }
  0x17   :  { %208 = vmatprep.subr.bf16.mxu0 %v227_v0 }
  0x1a   :  { %209 = vmatpush3.bf16.msra.mxu0 %v224_v7 }
  0x1b   :  { %210 = vmatprep.subr.bf16.mxu0 %v227_v0 }
  0x1e   :  { %211 = vmatpush3.bf16.msra.mxu0 %v225_v8 }
  0x21   :  { %213 = vmatmul.mubr.bf16.vlgmr.msra.gmra.mrb[0].mxu0 %v226_v9 }
  0xf4   :  { %v129_v10 = vpop.f32.mrb[0].mxu0 }
  0xf5   :  { %v214_v12 = vpop.f32.mrb[1].mxu0  ;;  %v152_v14 = vadd.f32 %v177_v11, %v129_v10 }
  0xf6   :  { %v132_v13 = vpop.f32.mrb[2].mxu0 }
  0xf7   :  { %v153_v15 = vadd.f32 %v177_v11, %v132_v13  ;;  %v215_v16 = vpop.f32.mrb[3].mxu0 }
  0xf9   :  { %v185_v17 = vpack.c.bf16 %v153_v15, %v152_v14 }
  0xfb   :  { %186 = vst [vmem:[%s285_s3] sm:$0xff] %v185_v17  }

// kernel: image_captions_forward.51
= control target key start
LH: loop header
LB: loop body
LE: loop exit
PB: predicated region body
PF: predicated region fallthrough
CT: control target
= control target key end

     0   :  { %v267_v1 = vmov 0.0   ;;  %vm268_vm0 = vmmov 0   ;;  %s334_s0 = inlined_call_operand.vmem [shape: bf16[16,128], index: 0, kind: input, shape index: {}]   ;;  %s335_s1 = inlined_call_operand.vmem [shape: bf16[128,128], index: 1, kind: input, shape index: {}]   ;;  %s336_s2 = inlined_call_operand.vmem [shape: f32[1,128], index: 2, kind: input, shape index: {}]   ;;  %s337_s3 = inlined_call_operand.hbm [shape: bf16[16,128], index: 3, kind: output, shape index: {}]  }
   0x1   :  { %v234_v0 = vld [vmem:[%s335_s1] sm:$0xff]   ;;  %209 = vmatprep.subr.bf16.mxu0 %v267_v1  ;;  %v235_v2 = vld [vmem:[%s335_s1 + $0x8] sm:$0xff]   ;;  %225 = vmatprep.mubr.msk.bf16.mxu0 %vm268_vm0, %v267_v1  ;;  %v236_v3 = vld [vmem:[%s335_s1 + $0x10] sm:$0xff]  }
   0x2   :  { %210 = vmatpush3.bf16.msra.mxu0 %v234_v0 }
   0x3   :  { %211 = vmatprep.subr.bf16.mxu0 %v267_v1 }
   0x6   :  { %212 = vmatpush3.bf16.msra.mxu0 %v235_v2 }
   0x7   :  { %213 = vmatprep.subr.bf16.mxu0 %v267_v1 }
   0x8   :  { %8 = vsyncpa [#allocation4], 0  ;;  %v237_v4 = vld [vmem:[%s335_s1 + $0x18] sm:$0xff]   ;;  %v238_v5 = vld [vmem:[%s335_s1 + $0x20] sm:$0xff]   ;;  %s269_s5 = smov [#allocation3]  }
   0x9   :  { %v239_v6 = vld [vmem:[%s335_s1 + $0x28] sm:$0xff]   ;;  %v240_v7 = vld [vmem:[%s335_s1 + $0x30] sm:$0xff]   ;;  %v241_v8 = vld [vmem:[%s335_s1 + $0x38] sm:$0xff]   ;;  %s170_s6 = sshll.u32 %s269_s5, 4  ;;  %s171_s6 = int_to_ptr.vmem [resolvable:$true] %s170_s6 }
   0xa   :  { %214 = vmatpush3.bf16.msra.mxu0 %v236_v3  ;;  %v242_v9 = vld [vmem:[%s334_s0] sm:$0xff]   ;;  %s243_s1 = scalar_lea.vmem %s171_s6, 128  ;;  %p248_p1 = scmp.lt.s32.totalorder %s171_s6, %s171_s6 }
   0xb   :  { %215 = vmatprep.subr.bf16.mxu0 %v267_v1  ;;  %v190_v11 = vld [vmem:[%s336_s2] ss:$0 sm:$0xff]  ;;  %p244_p0 = scmp.ne.s32.totalorder %s171_s6, %s243_s1  ;;  %p249_p2 = scmp.lt.s32.totalorder %s243_s1, %s243_s1 }
   0xd   :  { %p250_p3 = por %p249_p2, %p248_p1 }
   0xe   :  { %216 = vmatpush3.bf16.msra.mxu0 %v237_v4 }
   0xf   :  { %217 = vmatprep.subr.bf16.mxu0 %v267_v1  ;;  %p251_p4 = pnand %p250_p3, %p244_p0 }
  0x12   :  { %218 = vmatpush3.bf16.msra.mxu0 %v238_v5 }
  0x13   :  { %219 = vmatprep.subr.bf16.mxu0 %v267_v1 }
  0x16   :  { %220 = vmatpush3.bf16.msra.mxu0 %v239_v6 }
  0x17   :  { %221 = vmatprep.subr.bf16.mxu0 %v267_v1 }
  0x1a   :  { %222 = vmatpush3.bf16.msra.mxu0 %v240_v7 }
  0x1b   :  { %223 = vmatprep.subr.bf16.mxu0 %v267_v1 }
  0x1e   :  { %224 = vmatpush3.bf16.msra.mxu0 %v241_v8 }
  0x21   :  { %226 = vmatmul.mubr.bf16.vlgmr.msra.gmra.mrb[0].mxu0 %v242_v9 }
  0xf4   :  { %v130_v10 = vpop.f32.mrb[0].mxu0 }
  0xf5   :  { %v227_v12 = vpop.f32.mrb[1].mxu0  ;;  %v153_v14 = vadd.f32 %v190_v11, %v130_v10 }
  0xf6   :  { %v133_v13 = vpop.f32.mrb[2].mxu0 }
  0xf7   :  { %v154_v15 = vadd.f32 %v190_v11, %v133_v13  ;;  %v228_v16 = vpop.f32.mrb[3].mxu0 }
  0xf9   :  { %v198_v17 = vpack.c.bf16 %v154_v15, %v153_v14 }
  0xfb   :  { %199 = vst [vmem:[#allocation3] sm:$0xff] %v198_v17  }
  0xfc   :  { %254 = shalt.err (!%p251_p4)
}
  0xfd   :  { %s255_s2 = scalar_lea.hbm %s337_s3, 128 }
  0xfe   :  { %p256_p5 = scmp.ne.s32.totalorder %s337_s3, %s255_s2  ;;  %p259_p6 = scmp.lt.u32.totalorder %s255_s2, %s337_s3 }
 0x100   :  { %p261_p7 = pnand %p259_p6, %p256_p5 }
 0x102   :  { %264 = shalt.err (!%p261_p7)
}
 0x103   :  { %s270_s12 = smov 64   ;;  %s271_s13 = smov 4  }
 0x104   :  { %176 = dma.vmem_to_hbm [thread:$0]  %s171_s6, 128, %s337_s3, [#allocation4], %s270_s12, %s270_s12, %s271_s13  }
 0x105   :  { %265 = dma.done.wait [#allocation4], 128  }
 0x106   :  { %266 = vsyncadd [#allocation4], 4294967168 }
 0x107   :  { %180 = vsyncpa [#allocation4], 1 }

// kernel: image_captions_forward.38
= control target key start
LH: loop header
LB: loop body
LE: loop exit
PB: predicated region body
PF: predicated region fallthrough
CT: control target
= control target key end

     0   :  { %s737_s12 = smov 0   ;;  %s739_s13 = smov 0   ;;  %s811_s0 = inlined_call_operand.vmem [shape: bf16[2,4,8,8], index: 0, kind: input, shape index: {}]   ;;  %s812_s1 = inlined_call_operand.vmem [shape: bf16[2,4,5,8], index: 1, kind: input, shape index: {}]   ;;  %s813_s2 = inlined_call_operand.vmem [shape: bf16[2,4,5,8], index: 2, kind: input, shape index: {}]   ;;  %s814_s3 = inlined_call_operand.vmem [shape: bf16[2,4,8,8], index: 3, kind: output, shape index: {}]  }
   0x1   :  { %s741_s14 = smov 0   ;;  %s743_s15 = smov 0  }
   0x2   :  { %s745_s16 = smov 0  }
   0x3 LB: > { %s28_s17 = sadd.s32 1, %s702_s14  ;;  %s32_s18 = sadd.s32 1, %s706_s15  ;;  %s710_s16 = sphi %s745_s16, %s13_s16   ;;  %s706_s15 = sphi %s743_s15, %s818_s15   ;;  %s702_s14 = sphi %s741_s14, %s817_s14   ;;  %s698_s13 = sphi %s739_s13, %s816_s13   ;;  %s694_s12 = sphi %s737_s12, %s815_s12  }
   0x4   : > { %p30_p0 = scmp.ge.s32.totalorder %s28_s17, 4  ;;  %p590_p1 = scmp.ge.s32.totalorder %s710_s16, 1 }
   0x5   : > { %p203_p2 = scmp.lt.s32.totalorder %s710_s16, 9 }
   0x6   : > { %s820_s17 = smov (%p30_p0, %s28_s17), 0  ;;  %s822_s18 = smov (!%p30_p0, %s32_s18), %s706_s15 }
   0x7   : > { %p204_p3 = pnand %p590_p1, %p203_p2  ;;  %p34_p4 = scmp.ge.s32.totalorder %s822_s18, 2 }
   0x8   : > { %p255_p5 = scmp.lt.s32.totalorder (!%p204_p3), %s698_s13, 1  ;;  %p257_p6 = scmp.lt.s32.totalorder (!%p204_p3), %s694_s12, 3  ;;  %vm301_vm0 = vcmask (!%p204_p3), 64512   ;;  %v712_v0 = vmov (!%p204_p3), 0.0   ;;  %vm713_vm1 = vmmov (!%p204_p3), 0   ;;  %vm298_vm2 = vcmask (!%p204_p3), 7168  }
   0x9   : > { %s824_s18 = smov (%p34_p4, %s822_s18), 0  ;;  %207 = sbr.rel (%p204_p3) target bundleno = 829 (0x33d), region = 32 }
   0xa   : > { %607 = vmatprep.subr.bf16.mxu0 (!%p204_p3), %v712_v0  ;;  %302 = vst.msk [vmem:[#allocation4] sm:$0xff] (!%p204_p3), %vm301_vm0, %v712_v0  ;;  %609 = vmatprep.mubr.msk.bf16.mxu0 (!%p204_p3), %vm713_vm1, %v712_v0  ;;  %v714_v4 = vmov (!%p204_p3), -inf   ;;  %vm355_vm3 = vcmask (!%p204_p3), 39936   ;;  %v715_v11 = vmov (!%p204_p3), 0   ;;  %vm390_vm4 = vcmask (!%p204_p3), 1041408  }
   0xb   : > { %613 = vmatprep.subr.bf16.mxu1 (!%p204_p3), %v712_v0  ;;  %615 = vmatprep.mubr.msk.bf16.mxu1 (!%p204_p3), %vm713_vm1, %v712_v0  ;;  %299 = vst.msk [vmem:[#allocation2] sm:$0xff] (!%p204_p3), %vm298_vm2, %v714_v4  ;;  %300 = vst.msk [vmem:[#allocation3] sm:$0xff] (!%p204_p3), %vm298_vm2, %v712_v0  ;;  %vm391_vm5 = vcmask (!%p204_p3), 1042432   ;;  %v716_v17 = vmov (!%p204_p3), 65535   ;;  %vm453_vm6 = vcmask (!%p204_p3), 60416  }
   0xc   : > { %664 = vset.pattern.permute.xlu0 (!%p204_p3), %v715_v11  ;;  %665 = vset.pattern.permute.xlu1 (!%p204_p3), %v715_v11  ;;  %v392_v18 = vsel (!%p204_p3), %vm390_vm4, 4294967295, %v716_v17 }
   0xd   : > { %v393_v19 = vsel (!%p204_p3), %vm391_vm5, %v392_v18, 0 }
  0x10   : > { %s826_s13 = smov (!%p255_p5, %s698_s13), 1  ;;  %s828_s12 = smov (!%p257_p6, %s694_s12), 3 }
  0x11   : > { %s591_s19 = sshll.u32 %s826_s13, 2  ;;  %v379_v35 = vld [vmem:[#allocation4] sm:$0xff] }
  0x12   : > { %s260_s20 = sadd.s32 %s591_s19, %s828_s12  ;;  %v354_v12 = vld [vmem:[#allocation2] sm:$0xff]  ;;  %v371_v29 = vld [vmem:[#allocation3] sm:$0xff] }
  0x13   : > { %s768_s21 = sshll.u32 %s260_s20, 2 }
  0x14   : > { %s273_s24 = scalar_lea.vmem %s812_s1, %s768_s21  ;;  %s262_s27 = scalar_lea.vmem %s811_s0, %s768_s21 }
  0x15   : > { %v304_v1 = vld [vmem:[%s273_s24] sm:$0x7]  ;;  %s284_s30 = scalar_lea.vmem %s813_s2, %s768_s21  ;;  %s292_s6 = scalar_lea.vmem %s814_s3, %s768_s21 }
  0x16   : > { %v311_v2 = vsel %vm301_vm0, %v304_v1, 0  ;;  %v303_v3 = vld [vmem:[%s262_s27] sm:$0xf] }
  0x17   : > { %608 = vmatpush3.bf16.xpose.msra.mxu0 %v311_v2  ;;  %v305_v16 = vld [vmem:[%s284_s30] sm:$0x7] }
  0x18   : > { %v395_v20 = vand.u32 %v393_v19, %v305_v16 }
  0x1a   : > { %614 = vmatpush3.bf16.msra.mxu1 %v395_v20 }
  0x1e   : > { %610 = vmatmul.mubr.msk.bf16.vlgmr.msra.gmra.mrb[0].mxu0 %vm301_vm0, %v303_v3 }
  0xf1   : > { %v347_v5 = vpop.f32.mrb[0].mxu0 }
  0xf2   : > { %v353_v6 = vmul.f32 0.35355338, %v347_v5  ;;  %v611_v7 = vpop.f32.mrb[1].mxu0 }
  0xf3   : > { %v350_v8 = vpop.f32.mrb[2].mxu0 }
  0xf4   : > { %v612_v9 = vpop.f32.mrb[3].mxu0  ;;  %v356_v10 = vsel %vm355_vm3, %v353_v6, -inf }
  0xf5   : > { %357 = vmax.xlane.f32.xlu0 %v356_v10 }
 0x182   : > { %v358_v13 = vpop.xlane.xlu0 %357 }
 0x183   : > { %v359_v14 = vmax.f32 %v354_v12, %v358_v13 }
 0x185   : > { %v360_v15 = vsub.f32 %v354_v12, %v359_v14  ;;  %439 = vst.msk [vmem:[#allocation2] sm:$0xff] %vm298_vm2, %v359_v14  ;;  %365 = vperm.xlu0 %664, %v359_v14  }
 0x187   : > { %v361_v27 = vmul.f32 1.442695, %v360_v15 }
 0x204   : > { %v366_v21 = vpop.permute.xlu0 %365 }
 0x205   : > { %v368_v22 = vsub.f32 %v353_v6, %v366_v21 }
 0x207   : > { %v369_v23 = vmul.f32 1.442695, %v368_v22 }
 0x209   : > { %666 = vpow2.f32 %v369_v23 }
 0x20a   : > { %668 = vpow2.f32 %v361_v27 }
 0x213   : > { %v667_v24 = vpop.eup %666 }
 0x214   : > { %v373_v25 = vsel %vm355_vm3, %v667_v24, 0.0  ;;  %v386_v26 = vpack.c.bf16 %v667_v24, %v667_v24  ;;  %v669_v28 = vpop.eup %668 }
 0x215   : > { %374 = vadd.xlane.f32.xlu1 %v373_v25  ;;  %v372_v30 = vmul.f32 %v669_v28, %v371_v29 }
 0x216   : > { %616 = vmatmul.mubr.msk.bf16.vlgmr.msra.gmra.mrb[0].mxu1 %vm355_vm3, %v386_v26 }
 0x226   : > { %382 = vperm.xlu1 %665, %v669_v28  }
 0x2a2   : > { %v375_v31 = vpop.xlane.xlu1 %374 }
 0x2a3   : > { %v376_v32 = vadd.f32 %v375_v31, %v372_v30 }
 0x2a5   : > { %378 = vst.msk [vmem:[#allocation3] sm:$0xff] %vm298_vm2, %v376_v32 }
 0x2a6   : > { %v383_v36 = vpop.permute.xlu1 %382 }
 0x2a7   : > { %v385_v37 = vmul.f32 %v383_v36, %v379_v35 }
 0x2ac   : > { %v444_v33 = vld [vmem:[#allocation3] sm:$0xff] }
 0x2ad   : > { %670 = vrcp.f32 %v444_v33 }
 0x2b7   : > { %v671_v34 = vpop.eup %670 }
 0x2b8   : > { %448 = vperm.xlu1 %665, %v671_v34  }
 0x2e9   : > { %v431_v38 = vpop.f32.mrb[0].mxu1 }
 0x2ea   : > { %v437_v39 = vadd.f32 %v431_v38, %v385_v37  ;;  %v617_v40 = vpop.f32.mrb[1].mxu1 }
 0x2eb   : > { %v434_v41 = vpop.f32.mrb[2].mxu1 }
 0x2ec   : > { %438 = vst.msk [vmem:[#allocation4] sm:$0xff] %vm301_vm0, %v437_v39  ;;  %v618_v42 = vpop.f32.mrb[3].mxu1 }
 0x2f3   : > { %v443_v43 = vld [vmem:[#allocation4] sm:$0xff] }
 0x337   : > { %v449_v44 = vpop.permute.xlu1 %448 }
 0x338   : > { %v451_v45 = vmul.f32 %v449_v44, %v443_v43 }
 0x33a   : > { %v452_v46 = vpack.c.bf16 %v451_v45, %v451_v45 }
 0x33c   : > { %454 = vst.msk [vmem:[%s292_s6] sm:$0xf] %vm453_vm6, %v452_v46 }
 0x33d PF: > { %s13_s16 = sadd.s32 1, %s710_s16   ;;  %s815_s12 = smov %s702_s14 }
 0x33e   : > { %p10_p7 = scmp.ge.s32.totalorder %s13_s16, 10   ;;  %s816_s13 = smov %s706_s15 }
 0x33f   : > { %s817_s14 = smov %s820_s17  ;;  %s818_s15 = smov %s824_s18 }
 0x340   :  { %12 = sbr.rel (!%p10_p7) target bundleno = 3 (0x3), region = 76 }

// kernel: image_captions_forward.34
= control target key start
LH: loop header
LB: loop body
LE: loop exit
PB: predicated region body
PF: predicated region fallthrough
CT: control target
= control target key end

     0   :  { %s818_s15 = smov 0   ;;  %s820_s16 = smov 0   ;;  %s895_s0 = inlined_call_operand.vmem [shape: bf16[2,4,8,8], index: 0, kind: input, shape index: {}]   ;;  %s896_s1 = inlined_call_operand.vmem [shape: bf16[2,4,8,8], index: 1, kind: input, shape index: {}]   ;;  %s897_s2 = inlined_call_operand.vmem [shape: bf16[2,4,8,8], index: 2, kind: input, shape index: {}]   ;;  %s898_s3 = inlined_call_operand.vmem [shape: f32[2,1,8], index: 3, kind: input, shape index: {}]   ;;  %s899_s4 = inlined_call_operand.vmem [shape: bf16[2,4,8,8], index: 4, kind: output, shape index: {}]  }
   0x1   :  { %s822_s17 = smov 0   ;;  %s824_s18 = smov 0  }
   0x2   :  { %s826_s19 = smov 0  }
   0x3 LB: > { %s29_s20 = sadd.s32 1, %s779_s17  ;;  %s33_s21 = sadd.s32 1, %s783_s18  ;;  %s787_s19 = sphi %s826_s19, %s14_s19   ;;  %s783_s18 = sphi %s824_s18, %s903_s18   ;;  %s779_s17 = sphi %s822_s17, %s902_s17   ;;  %s775_s16 = sphi %s820_s16, %s901_s16   ;;  %s771_s15 = sphi %s818_s15, %s900_s15  }
   0x4   : > { %p31_p0 = scmp.ge.s32.totalorder %s29_s20, 4  ;;  %p667_p1 = scmp.ge.s32.totalorder %s787_s19, 1 }
   0x5   : > { %p241_p2 = scmp.lt.s32.totalorder %s787_s19, 9 }
   0x6   : > { %s905_s20 = smov (%p31_p0, %s29_s20), 0  ;;  %s907_s21 = smov (!%p31_p0, %s33_s21), %s783_s18 }
   0x7   : > { %p242_p3 = pnand %p667_p1, %p241_p2  ;;  %p35_p4 = scmp.ge.s32.totalorder %s907_s21, 2 }
   0x8   : > { %p301_p5 = scmp.lt.s32.totalorder (!%p242_p3), %s775_s16, 1  ;;  %p303_p6 = scmp.lt.s32.totalorder (!%p242_p3), %s771_s15, 3  ;;  %vm353_vm0 = vcmask (!%p242_p3), 64512   ;;  %v789_v0 = vmov (!%p242_p3), 0.0   ;;  %vm790_vm1 = vmmov (!%p242_p3), 0   ;;  %vm350_vm2 = vcmask (!%p242_p3), 7168  }
   0x9   : > { %s909_s21 = smov (%p35_p4, %s907_s21), 0  ;;  %245 = sbr.rel (%p242_p3) target bundleno = 832 (0x340), region = 36 }
   0xa   : > { %685 = vmatprep.subr.bf16.mxu0 (!%p242_p3), %v789_v0  ;;  %354 = vst.msk [vmem:[#allocation4] sm:$0xff] (!%p242_p3), %vm353_vm0, %v789_v0  ;;  %687 = vmatprep.mubr.msk.bf16.mxu0 (!%p242_p3), %vm790_vm1, %v789_v0  ;;  %v791_v4 = vmov (!%p242_p3), -inf   ;;  %v406_v5 = vlaneseq (!%p242_p3)  ;;  %v792_v17 = vmov (!%p242_p3), 0   ;;  %vm458_vm4 = vcmask (!%p242_p3), 1043456  }
   0xb   : > { %691 = vmatprep.subr.bf16.mxu1 (!%p242_p3), %v789_v0  ;;  %693 = vmatprep.mubr.msk.bf16.mxu1 (!%p242_p3), %vm790_vm1, %v789_v0  ;;  %351 = vst.msk [vmem:[#allocation2] sm:$0xff] (!%p242_p3), %vm350_vm2, %v791_v4  ;;  %352 = vst.msk [vmem:[#allocation3] sm:$0xff] (!%p242_p3), %vm350_vm2, %v789_v0  ;;  %vm518_vm5 = vcmask (!%p242_p3), 60416  }
   0xc   : > { %v407_v6 = vshrl.u32 (!%p242_p3), %v406_v5, 7  ;;  %v409_v7 = vand.u32 (!%p242_p3), 127, %v406_v5  ;;  %741 = vset.pattern.permute.xlu0 (!%p242_p3), %v792_v17  ;;  %742 = vset.pattern.permute.xlu1 (!%p242_p3), %v792_v17 }
   0xe   : > { %vm413_vm3 = vcmp.le.s32.totalorder (!%p242_p3), %v409_v7, %v407_v6 }
  0x10   : > { %s911_s16 = smov (!%p301_p5, %s775_s16), 1  ;;  %s913_s15 = smov (!%p303_p6, %s771_s15), 3 }
  0x11   : > { %s668_s22 = sshll.u32 %s911_s16, 2  ;;  %s336_s7 = scalar_lea.vmem %s898_s3, %s911_s16  ;;  %v447_v38 = vld [vmem:[#allocation4] sm:$0xff] }
  0x12   : > { %s306_s23 = sadd.s32 %s668_s22, %s913_s15  ;;  %v677_v11 = vld [vmem:[%s336_s7] ss:$0 sm:$0xff]  ;;  %v439_v32 = vld [vmem:[#allocation3] sm:$0xff] }
  0x13   : > { %s849_s24 = sshll.u32 %s306_s23, 2  ;;  %v423_v18 = vld [vmem:[#allocation2] sm:$0xff] }
  0x14   : > { %s319_s27 = scalar_lea.vmem %s896_s1, %s849_s24  ;;  %s308_s30 = scalar_lea.vmem %s895_s0, %s849_s24 }
  0x15   : > { %v356_v1 = vld [vmem:[%s319_s27] sm:$0xf]  ;;  %s330_s10 = scalar_lea.vmem %s897_s2, %s849_s24  ;;  %s344_s13 = scalar_lea.vmem %s899_s4, %s849_s24 }
  0x16   : > { %v363_v2 = vsel %vm353_vm0, %v356_v1, 0  ;;  %v355_v3 = vld [vmem:[%s308_s30] sm:$0xf] }
  0x17   : > { %686 = vmatpush3.bf16.xpose.msra.mxu0 %v363_v2  ;;  %v357_v22 = vld [vmem:[%s330_s10] sm:$0xf] }
  0x18   : > { %v460_v23 = vsel %vm458_vm4, %v357_v22, 0 }
  0x19   : > { %692 = vmatpush3.bf16.msra.mxu1 %v460_v23 }
  0x1e   : > { %688 = vmatmul.mubr.msk.bf16.vlgmr.msra.gmra.mrb[0].mxu0 %vm353_vm0, %v355_v3 }
  0xf1   : > { %v399_v8 = vpop.f32.mrb[0].mxu0 }
  0xf2   : > { %v405_v9 = vmul.f32 0.35355338, %v399_v8  ;;  %v689_v10 = vpop.f32.mrb[1].mxu0 }
  0xf3   : > { %v402_v12 = vpop.f32.mrb[2].mxu0 }
  0xf4   : > { %v414_v13 = vsel %vm413_vm3, %v405_v9, -1e+09  ;;  %v690_v14 = vpop.f32.mrb[3].mxu0 }
  0xf5   : > { %v422_v15 = vadd.f32 %v677_v11, %v414_v13 }
  0xf7   : > { %v424_v16 = vsel %vm353_vm0, %v422_v15, -inf }
  0xf8   : > { %425 = vmax.xlane.f32.xlu0 %v424_v16 }
 0x185   : > { %v426_v19 = vpop.xlane.xlu0 %425 }
 0x186   : > { %v427_v20 = vmax.f32 %v423_v18, %v426_v19 }
 0x188   : > { %v428_v21 = vsub.f32 %v423_v18, %v427_v20  ;;  %504 = vst.msk [vmem:[#allocation2] sm:$0xff] %vm350_vm2, %v427_v20  ;;  %433 = vperm.xlu0 %741, %v427_v20  }
 0x18a   : > { %v429_v30 = vmul.f32 1.442695, %v428_v21 }
 0x207   : > { %v434_v24 = vpop.permute.xlu0 %433 }
 0x208   : > { %v436_v25 = vsub.f32 %v422_v15, %v434_v24 }
 0x20a   : > { %v437_v26 = vmul.f32 1.442695, %v436_v25 }
 0x20c   : > { %743 = vpow2.f32 %v437_v26 }
 0x20d   : > { %745 = vpow2.f32 %v429_v30 }
 0x216   : > { %v744_v27 = vpop.eup %743 }
 0x217   : > { %v441_v28 = vsel %vm353_vm0, %v744_v27, 0.0  ;;  %v454_v29 = vpack.c.bf16 %v744_v27, %v744_v27  ;;  %v746_v31 = vpop.eup %745 }
 0x218   : > { %442 = vadd.xlane.f32.xlu1 %v441_v28  ;;  %v440_v33 = vmul.f32 %v746_v31, %v439_v32 }
 0x219   : > { %694 = vmatmul.mubr.msk.bf16.vlgmr.msra.gmra.mrb[0].mxu1 %vm353_vm0, %v454_v29 }
 0x229   : > { %450 = vperm.xlu1 %742, %v746_v31  }
 0x2a5   : > { %v443_v34 = vpop.xlane.xlu1 %442 }
 0x2a6   : > { %v444_v35 = vadd.f32 %v443_v34, %v440_v33 }
 0x2a8   : > { %446 = vst.msk [vmem:[#allocation3] sm:$0xff] %vm350_vm2, %v444_v35 }
 0x2a9   : > { %v451_v39 = vpop.permute.xlu1 %450 }
 0x2aa   : > { %v453_v40 = vmul.f32 %v451_v39, %v447_v38 }
 0x2af   : > { %v509_v36 = vld [vmem:[#allocation3] sm:$0xff] }
 0x2b0   : > { %747 = vrcp.f32 %v509_v36 }
 0x2ba   : > { %v748_v37 = vpop.eup %747 }
 0x2bb   : > { %513 = vperm.xlu1 %742, %v748_v37  }
 0x2ec   : > { %v496_v41 = vpop.f32.mrb[0].mxu1 }
 0x2ed   : > { %v502_v42 = vadd.f32 %v496_v41, %v453_v40  ;;  %v695_v43 = vpop.f32.mrb[1].mxu1 }
 0x2ee   : > { %v499_v44 = vpop.f32.mrb[2].mxu1 }
 0x2ef   : > { %503 = vst.msk [vmem:[#allocation4] sm:$0xff] %vm353_vm0, %v502_v42  ;;  %v696_v45 = vpop.f32.mrb[3].mxu1 }
 0x2f6   : > { %v508_v46 = vld [vmem:[#allocation4] sm:$0xff] }
 0x33a   : > { %v514_v47 = vpop.permute.xlu1 %513 }
 0x33b   : > { %v516_v48 = vmul.f32 %v514_v47, %v508_v46 }
 0x33d   : > { %v517_v49 = vpack.c.bf16 %v516_v48, %v516_v48 }
 0x33f   : > { %519 = vst.msk [vmem:[%s344_s13] sm:$0xf] %vm518_vm5, %v517_v49 }
 0x340 PF: > { %s14_s19 = sadd.s32 1, %s787_s19   ;;  %s900_s15 = smov %s779_s17 }
 0x341   : > { %p11_p7 = scmp.ge.s32.totalorder %s14_s19, 10   ;;  %s901_s16 = smov %s783_s18 }
 0x342   : > { %s902_s17 = smov %s905_s20  ;;  %s903_s18 = smov %s909_s21 }
 0x343   :  { %13 = sbr.rel (!%p11_p7) target bundleno = 3 (0x3), region = 83 }

// kernel: image_captions_forward.40
= control target key start
LH: loop header
LB: loop body
LE: loop exit
PB: predicated region body
PF: predicated region fallthrough
CT: control target
= control target key end

     0   :  { %v304_v1 = vmov 0.0   ;;  %vm305_vm0 = vmmov 0   ;;  %s375_s0 = inlined_call_operand.vmem [shape: bf16[16,128], index: 0, kind: input, shape index: {}]   ;;  %s376_s1 = inlined_call_operand.vmem [shape: bf16[128,128], index: 1, kind: input, shape index: {}]   ;;  %s377_s3 = inlined_call_operand.vmem [shape: f32[1,128], index: 3, kind: input, shape index: {}]   ;;  %s378_s4 = inlined_call_operand.vmem [shape: f32[1,128], index: 4, kind: input, shape index: {}]   ;;  %s379_s2 = inlined_call_operand.vmem [shape: f32[1,128], index: 2, kind: input, shape index: {}]   ;;  %s380_s5 = inlined_call_operand.vmem [shape: bf16[16,128], index: 5, kind: output, shape index: {}]  }
   0x1   :  { %v249_v0 = vld [vmem:[%s375_s0] sm:$0xff]   ;;  %266 = vmatprep.subr.bf16.mxu0 %v304_v1  ;;  %v289_v7 = vld [vmem:[%s376_s1 + $0x8] sm:$0xff]   ;;  %v290_v8 = vld [vmem:[%s376_s1 + $0x10] sm:$0xff]   ;;  %282 = vmatprep.mubr.msk.bf16.mxu0 %vm305_vm0, %v304_v1 }
   0x2   :  { %v250_v2 = vunpack.c.l.bf16 %v249_v0  ;;  %v251_v3 = vunpack.c.h.bf16 %v249_v0  ;;  %v288_v6 = vld [vmem:[%s376_s1] sm:$0xff]   ;;  %v291_v9 = vld [vmem:[%s376_s1 + $0x18] sm:$0xff]   ;;  %v293_v11 = vld [vmem:[%s376_s1 + $0x28] sm:$0xff]  }
   0x3   :  { %267 = vmatpush3.bf16.msra.mxu0 %v288_v6  ;;  %v292_v10 = vld [vmem:[%s376_s1 + $0x20] sm:$0xff]   ;;  %v294_v12 = vld [vmem:[%s376_s1 + $0x30] sm:$0xff]   ;;  %v295_v13 = vld [vmem:[%s376_s1 + $0x38] sm:$0xff]  }
   0x4   :  { %31 = vadd.xlane.f32.xlu0 %v250_v2  ;;  %v37_v4 = vmul.f32 %v250_v2, %v250_v2  ;;  %v38_v5 = vmul.f32 %v251_v3, %v251_v3  ;;  %268 = vmatprep.subr.bf16.mxu0 %v304_v1  ;;  %v233_v31 = vld [vmem:[%s377_s3] ss:$0 sm:$0xff] }
   0x5   :  { %v234_v36 = vld [vmem:[%s378_s4] ss:$0 sm:$0xff] }
   0x6   :  { %39 = vadd.xlane.f32.xlu1 %v37_v4  ;;  %v243_v41 = vld [vmem:[%s379_s2] ss:$0 sm:$0xff] }
   0x7   :  { %269 = vmatpush3.bf16.msra.mxu0 %v289_v7 }
   0x8   :  { %33 = vadd.xlane.f32.xlu0 %v251_v3  ;;  %270 = vmatprep.subr.bf16.mxu0 %v304_v1 }
   0xa   :  { %41 = vadd.xlane.f32.xlu1 %v38_v5 }
   0xb   :  { %271 = vmatpush3.bf16.msra.mxu0 %v290_v8 }
   0xc   :  { %272 = vmatprep.subr.bf16.mxu0 %v304_v1 }
   0xf   :  { %273 = vmatpush3.bf16.msra.mxu0 %v291_v9 }
  0x10   :  { %274 = vmatprep.subr.bf16.mxu0 %v304_v1 }
  0x13   :  { %275 = vmatpush3.bf16.msra.mxu0 %v292_v10 }
  0x14   :  { %276 = vmatprep.subr.bf16.mxu0 %v304_v1 }
  0x17   :  { %277 = vmatpush3.bf16.msra.mxu0 %v293_v11 }
  0x18   :  { %278 = vmatprep.subr.bf16.mxu0 %v304_v1 }
  0x1b   :  { %279 = vmatpush3.bf16.msra.mxu0 %v294_v12 }
  0x1c   :  { %280 = vmatprep.subr.bf16.mxu0 %v304_v1 }
  0x1f   :  { %281 = vmatpush3.bf16.msra.mxu0 %v295_v13 }
  0x91   :  { %v32_v14 = vpop.xlane.xlu0 %31 }
  0x92   :  { %v35_v15 = vmul.f32 0.03125, %v32_v14 }
  0x93   :  { %v40_v16 = vpop.xlane.xlu1 %39 }
  0x94   :  { %v45_v17 = vmul.f32 %v35_v15, %v35_v15  ;;  %v43_v18 = vmul.f32 0.03125, %v40_v16  ;;  %v49_v28 = vsub.f32 %v250_v2, %v35_v15 }
  0x95   :  { %v34_v19 = vpop.xlane.xlu0 %33 }
  0x96   :  { %v47_v20 = vsub.f32 %v43_v18, %v45_v17  ;;  %v36_v21 = vmul.f32 0.03125, %v34_v19 }
  0x97   :  { %v42_v22 = vpop.xlane.xlu1 %41 }
  0x98   :  { %v51_v23 = vadd.f32 1e-05, %v47_v20  ;;  %v46_v24 = vmul.f32 %v36_v21, %v36_v21  ;;  %v44_v25 = vmul.f32 0.03125, %v42_v22  ;;  %v50_v32 = vsub.f32 %v251_v3, %v36_v21 }
  0x9a   :  { %296 = vrsqrt.f32 %v51_v23  ;;  %v48_v26 = vsub.f32 %v44_v25, %v46_v24 }
  0x9c   :  { %v52_v27 = vadd.f32 1e-05, %v48_v26 }
  0x9e   :  { %298 = vrsqrt.f32 %v52_v27 }
  0xa4   :  { %v297_v29 = vpop.eup %296 }
  0xa5   :  { %v55_v30 = vmul.f32 %v297_v29, %v49_v28 }
  0xa7   :  { %v64_v35 = vmul.f32 %v233_v31, %v55_v30 }
  0xa8   :  { %v299_v33 = vpop.eup %298 }
  0xa9   :  { %v56_v34 = vmul.f32 %v299_v33, %v50_v32  ;;  %v73_v38 = vadd.f32 %v234_v36, %v64_v35 }
  0xab   :  { %v65_v37 = vmul.f32 %v233_v31, %v56_v34 }
  0xad   :  { %v74_v39 = vadd.f32 %v234_v36, %v65_v37 }
  0xaf   :  { %v75_v40 = vpack.c.bf16 %v74_v39, %v73_v38 }
  0xb1   :  { %283 = vmatmul.mubr.bf16.vlgmr.msra.gmra.mrb[0].mxu0 %v75_v40 }
 0x184   :  { %v176_v42 = vpop.f32.mrb[0].mxu0 }
 0x185   :  { %v199_v43 = vadd.f32 %v243_v41, %v176_v42  ;;  %v284_v44 = vpop.f32.mrb[1].mxu0 }
 0x186   :  { %v179_v45 = vpop.f32.mrb[2].mxu0 }
 0x187   :  { %v203_v46 = vmul.f32 0.044715, %v199_v43  ;;  %v200_v47 = vadd.f32 %v243_v41, %v179_v45  ;;  %v285_v48 = vpop.f32.mrb[3].mxu0  ;;  %v201_v61 = vmul.f32 0.5, %v199_v43 }
 0x189   :  { %v205_v49 = vmul.f32 %v203_v46, %v199_v43  ;;  %v204_v50 = vmul.f32 0.044715, %v200_v47  ;;  %v202_v62 = vmul.f32 0.5, %v200_v47 }
 0x18b   :  { %v207_v51 = vmul.f32 %v205_v49, %v199_v43  ;;  %v206_v52 = vmul.f32 %v204_v50, %v200_v47 }
 0x18d   :  { %v209_v53 = vadd.f32 %v207_v51, %v199_v43  ;;  %v208_v54 = vmul.f32 %v206_v52, %v200_v47 }
 0x18f   :  { %v211_v55 = vmul.f32 0.7978846, %v209_v53  ;;  %v210_v56 = vadd.f32 %v208_v54, %v200_v47 }
 0x191   :  { %300 = vtanh.f32 %v211_v55  ;;  %v212_v57 = vmul.f32 0.7978846, %v210_v56 }
 0x193   :  { %302 = vtanh.f32 %v212_v57 }
 0x19b   :  { %v301_v58 = vpop.eup %300 }
 0x19c   :  { %v215_v59 = vadd.f32 1.0, %v301_v58 }
 0x19d   :  { %v303_v60 = vpop.eup %302 }
 0x19e   :  { %v216_v63 = vadd.f32 1.0, %v303_v60  ;;  %v217_v0 = vmul.f32 %v215_v59, %v201_v61 }
 0x1a0   :  { %v218_v1 = vmul.f32 %v216_v63, %v202_v62 }
 0x1a2   :  { %v255_v2 = vpack.c.bf16 %v218_v1, %v217_v0 }
 0x1a4   :  { %256 = vst [vmem:[%s380_s5] sm:$0xff] %v255_v2  }

</bundles_post_ra>
